<compile_context>
chip_gen: v5e
topology: v5e:2x2
jax: 0.10.0
libtpu: 0.0.40
codegen_flags: <defaults>
</compile_context>

<pallas_src>
import math
import functools

import jax
import jax.numpy as jnp
from jax import lax
from jax.experimental import pallas as pl
from jax.experimental.pallas import tpu as pltpu


def _default_vmem_limit_bytes():
    """Scoped-VMEM limit: generous on v5e/v6e (128 MiB physical), conservative
    on v7x (64 MiB physical) and unknown chips."""
    try:
        kind = jax.devices()[0].device_kind.lower()
    except Exception:
        return 48 * 1024 * 1024
    if ("v6" in kind) or ("v5e" in kind) or ("v5 lite" in kind):
        return 100 * 1024 * 1024
    return 48 * 1024 * 1024


# ---------------------------------------------------------------------------
# Fused kernel: per time-chunk input projection + unrolled LSTM recurrence
# ---------------------------------------------------------------------------
def _fused_lstm_kernel(x_ref, w_ref, b_ref, u_ref, h0_ref, c0_ref,
                       hseq_ref, hlast_ref, clast_ref,
                       pg_scr, h_scr, c_scr,
                       *, hidden_size, t_block, bs_pc, seq_len,
                       compute_dtype, gatewise, padded):
    HS = hidden_size
    tb = pl.program_id(1)          # time-chunk index (axis 0 is the core split)

    @pl.when(tb == 0)
    def _init():
        h_scr[...] = h0_ref[...]
        c_scr[...] = c0_ref[...]

    # Fused input projection for the whole chunk: one big-M matmul
    # (M = t_block * bs_pc rows).  Result lives in VMEM scratch only.
    x2 = x_ref[...].reshape(t_block * bs_pc, x_ref.shape[-1])
    pg_scr[...] = (jnp.dot(x2, w_ref[...], preferred_element_type=jnp.float32)
                   + b_ref[...])

    u = u_ref[...]
    if gatewise:
        # Lane-aligned per-gate weight slices (hidden % 128 == 0), hoisted out
        # of the unrolled step loop.
        u_g = [u[:, k * HS:(k + 1) * HS] for k in range(4)]

    def step(tt, carry):
        h, c = carry
        row0 = pl.multiple_of(tt * bs_pc, bs_pc)
        pg = pg_scr[pl.ds(row0, bs_pc), :]               # (bs_pc, 4*HS) f32
        hc = h.astype(compute_dtype)
        if gatewise:
            # Four (bs,HS)@(HS,HS) matmuls: EUP/VPU work for gate k overlaps
            # the MXU push of gate k+1 (different VLIW slots), and the live
            # gates tensor is 4x smaller.
            pre = [pg[:, k * HS:(k + 1) * HS]
                   + jnp.dot(hc, u_g[k], preferred_element_type=jnp.float32)
                   for k in range(4)]
            i_t = jax.nn.sigmoid(pre[0])
            f_t = jax.nn.sigmoid(pre[1])
            g_t = jnp.tanh(pre[2])
            o_t = jax.nn.sigmoid(pre[3])
        else:
            gates = pg + jnp.dot(hc, u, preferred_element_type=jnp.float32)
            i_t = jax.nn.sigmoid(gates[:, 0 * HS:1 * HS])
            f_t = jax.nn.sigmoid(gates[:, 1 * HS:2 * HS])
            g_t = jnp.tanh(gates[:, 2 * HS:3 * HS])
            o_t = jax.nn.sigmoid(gates[:, 3 * HS:4 * HS])
        # TODO(synk): on v6e/v7x, cast the gate preactivations to bf16 for the
        #             EUP transcendentals only if a bundle dump shows the EUP
        #             slot binding (never on v5e: no bf16 EUP).
        c_new = f_t * c + i_t * g_t
        h_new = o_t * jnp.tanh(c_new)
        if padded:
            # Padded (beyond true seq) timesteps must not advance the carry.
            keep = (tb * t_block + tt) < seq_len
            h_new = jnp.where(keep, h_new, h)
            c_new = jnp.where(keep, c_new, c)
        hseq_ref[tt] = h_new.astype(hseq_ref.dtype)
        return h_new, c_new

    # Fully unrolled: the LLO scheduler sees the whole chunk.
    h_fin, c_fin = lax.fori_loop(0, t_block, step,
                                 (h_scr[...], c_scr[...]), unroll=True)
    h_scr[...] = h_fin
    c_scr[...] = c_fin

    # Write the "last state" outputs only once, on the final time chunk.
    @pl.when(tb == pl.num_programs(1) - 1)
    def _finalize():
        hlast_ref[...] = h_fin.astype(hlast_ref.dtype)
        clast_ref[...] = c_fin.astype(clast_ref.dtype)


# ---------------------------------------------------------------------------
# Wrapper
# ---------------------------------------------------------------------------
def custom_lstm_forward(x, W, U, bias, init_states=None, *,
                        t_block=16, compute_dtype=jnp.bfloat16,
                        out_dtype=jnp.float32, core_split=1,
                        single_buffer_residents=True, vmem_limit_bytes=None):
    """Pallas implementation of CustomLSTM.forward (peephole=False).

    x:    (seq, batch, input_sz)
    W:    (input_sz, 4*hidden)
    U:    (hidden,   4*hidden)
    bias: (4*hidden,)
    compute_dtype: MXU operand dtype (bf16 default; accumulation, gate math and
                   c/h state stay float32 -- safe on v5e too).
    core_split:    leading "parallel" grid axis splitting the batch (use 2 on
                   v7x to occupy the second TensorCore).
    Returns (hidden_seq, (h_last, c_last)).
    """
    seq, bs, input_sz = x.shape
    hidden = U.shape[0]
    assert W.shape == (input_sz, 4 * hidden)
    assert bias.shape == (4 * hidden,)
    core_split = max(1, int(core_split))

    if vmem_limit_bytes is None:
        vmem_limit_bytes = _default_vmem_limit_bytes()

    # Time chunking: pad seq up to a multiple of t_block (masked in-kernel)
    # instead of shrinking t_block for awkward sequence lengths.
    t_block = max(1, min(int(t_block), seq))
    seq_pad = -(-seq // t_block) * t_block
    n_tblk = seq_pad // t_block
    padded = seq_pad != seq

    # Batch padding: per-core batch must be a multiple of 8 (sublane tile) so
    # the in-kernel (t_block, bs, in) -> (t_block*bs, in) collapse is a no-op.
    bs_mult = 8 * core_split
    bs_pad = -(-bs // bs_mult) * bs_mult
    bs_pc = bs_pad // core_split

    Wc = W.astype(compute_dtype)
    Uc = U.astype(compute_dtype)
    bias2d = bias.astype(jnp.float32).reshape(1, 4 * hidden)

    xp = x.astype(compute_dtype)
    if padded or bs_pad != bs:
        xp = jnp.pad(xp, ((0, seq_pad - seq), (0, bs_pad - bs), (0, 0)))

    if init_states is None:
        h0 = jnp.zeros((bs_pad, hidden), jnp.float32)
        c0 = jnp.zeros((bs_pad, hidden), jnp.float32)
    else:
        h0, c0 = init_states
        h0 = h0.astype(jnp.float32)
        c0 = c0.astype(jnp.float32)
        if bs_pad != bs:
            h0 = jnp.pad(h0, ((0, bs_pad - bs), (0, 0)))
            c0 = jnp.pad(c0, ((0, bs_pad - bs), (0, 0)))

    gatewise = (hidden % 128 == 0)

    kernel = functools.partial(
        _fused_lstm_kernel,
        hidden_size=hidden, t_block=t_block, bs_pc=bs_pc, seq_len=seq,
        compute_dtype=compute_dtype, gatewise=gatewise, padded=padded)

    def _run(single_buffer):
        def resident(shape, imap):
            # Constant-index resident weights: one VMEM buffer is enough
            # (default double-buffering would waste VMEM, critical on v7x).
            if single_buffer:
                return pl.BlockSpec(shape, imap, pipeline_mode=pl.Buffered(1))
            return pl.BlockSpec(shape, imap)

        grid_spec = pltpu.PrefetchScalarGridSpec(
            num_scalar_prefetch=0,
            grid=(core_split, n_tblk),           # (parallel batch split, time)
            in_specs=[
                pl.BlockSpec((t_block, bs_pc, input_sz), lambda c, t: (t, c, 0)),
                resident((input_sz, 4 * hidden), lambda c, t: (0, 0)),   # W
                resident((1, 4 * hidden), lambda c, t: (0, 0)),          # bias
                resident((hidden, 4 * hidden), lambda c, t: (0, 0)),     # U
                pl.BlockSpec((bs_pc, hidden), lambda c, t: (c, 0)),      # h0
                pl.BlockSpec((bs_pc, hidden), lambda c, t: (c, 0)),      # c0
            ],
            out_specs=[
                pl.BlockSpec((t_block, bs_pc, hidden), lambda c, t: (t, c, 0)),
                pl.BlockSpec((bs_pc, hidden), lambda c, t: (c, 0)),      # h_last
                pl.BlockSpec((bs_pc, hidden), lambda c, t: (c, 0)),      # c_last
            ],
            scratch_shapes=[
                pltpu.VMEM((t_block * bs_pc, 4 * hidden), jnp.float32),  # pre-gates
                pltpu.VMEM((bs_pc, hidden), jnp.float32),                # h carry
                pltpu.VMEM((bs_pc, hidden), jnp.float32),                # c carry
            ],
        )
        return pl.pallas_call(
            kernel,
            grid_spec=grid_spec,
            out_shape=(
                jax.ShapeDtypeStruct((seq_pad, bs_pad, hidden), out_dtype),
                jax.ShapeDtypeStruct((bs_pad, hidden), jnp.float32),
                jax.ShapeDtypeStruct((bs_pad, hidden), jnp.float32),
            ),
            compiler_params=pltpu.CompilerParams(
                dimension_semantics=("parallel", "arbitrary"),
                vmem_limit_bytes=vmem_limit_bytes,
            ),
        )(xp, Wc, bias2d, Uc, h0, c0)

    if single_buffer_residents:
        try:
            hseq, h_last, c_last = _run(True)
        except Exception:
            # Fallback for JAX builds without BlockSpec.pipeline_mode support.
            hseq, h_last, c_last = _run(False)
    else:
        hseq, h_last, c_last = _run(False)

    if padded or bs_pad != bs:
        hseq = hseq[:seq, :bs]
        h_last = h_last[:bs]
        c_last = c_last[:bs]
    return hseq, (h_last, c_last)


# ---------------------------------------------------------------------------
# Pure-JAX reference mirroring the PyTorch loop (peephole=False)
# ---------------------------------------------------------------------------
def lstm_reference(x, W, U, bias):
    seq, bs, _ = x.shape
    HS = U.shape[0]
    h = jnp.zeros((bs, HS), jnp.float32)
    c = jnp.zeros((bs, HS), jnp.float32)

    def step(carry, x_t):
        h, c = carry
        gates = x_t @ W + h @ U + bias
        i_t = jax.nn.sigmoid(gates[:, :HS])
        f_t = jax.nn.sigmoid(gates[:, HS:2 * HS])
        g_t = jnp.tanh(gates[:, 2 * HS:3 * HS])
        o_t = jax.nn.sigmoid(gates[:, 3 * HS:])
        c = f_t * c + i_t * g_t
        h = o_t * jnp.tanh(c)
        return (h, c), h

    (h, c), hs = jax.lax.scan(step, (h, c), x)
    return hs, (h, c)


if __name__ == "__main__":
    key = jax.random.PRNGKey(0)

    def make_params(k, input_sz, hidden_sz):
        kw, ku, kb = jax.random.split(k, 3)
        stdv = 1.0 / math.sqrt(hidden_sz)   # matches init_weights()
        W = jax.random.uniform(kw, (input_sz, 4 * hidden_sz), jnp.float32, -stdv, stdv)
        U = jax.random.uniform(ku, (hidden_sz, 4 * hidden_sz), jnp.float32, -stdv, stdv)
        b = jax.random.uniform(kb, (4 * hidden_sz,), jnp.float32, -stdv, stdv)
        return W, U, b

    # ---- Test 1: small shapes, f32 operands, fused-dot path, no padding ----
    seq, bs, input_sz, hidden_sz = 16, 8, 16, 32
    k1, k2, key = jax.random.split(key, 3)
    W, U, bias = make_params(k1, input_sz, hidden_sz)
    x = jax.random.normal(k2, (seq, bs, input_sz), jnp.float32)

    hs, (h, c) = custom_lstm_forward(x, W, U, bias, t_block=8,
                                     compute_dtype=jnp.float32)
    jax.block_until_ready((hs, h, c))
    rs, (rh, rc) = lstm_reference(x, W, U, bias)
    assert hs.shape == (seq, bs, hidden_sz)
    assert jnp.allclose(hs, rs, atol=1e-4, rtol=1e-4)
    assert jnp.allclose(h, rh, atol=1e-4, rtol=1e-4)
    assert jnp.allclose(c, rc, atol=1e-4, rtol=1e-4)

    # ---- Test 2: gate-wise path (hidden % 128 == 0), seq padding (12 -> 16),
    #              2-way batch split (v7x second-TC path), f32 exact ---------
    seq, bs, input_sz, hidden_sz = 12, 16, 64, 128
    k1, k2, key = jax.random.split(key, 3)
    W, U, bias = make_params(k1, input_sz, hidden_sz)
    x = jax.random.normal(k2, (seq, bs, input_sz), jnp.float32)

    hs, (h, c) = custom_lstm_forward(x, W, U, bias, t_block=8, core_split=2,
                                     compute_dtype=jnp.float32)
    jax.block_until_ready((hs, h, c))
    rs, (rh, rc) = lstm_reference(x, W, U, bias)
    assert hs.shape == (seq, bs, hidden_sz)
    assert jnp.allclose(hs, rs, atol=1e-4, rtol=1e-4)
    assert jnp.allclose(h, rh, atol=1e-4, rtol=1e-4)
    assert jnp.allclose(c, rc, atol=1e-4, rtol=1e-4)

    # ---- Test 3: default bf16 MXU operands (recommended on v6e/v7x) --------
    hs_b, (h_b, c_b) = custom_lstm_forward(x, W, U, bias, t_block=8, core_split=2)
    jax.block_until_ready((hs_b, h_b, c_b))
    assert jnp.allclose(hs_b, rs, atol=1e-1, rtol=0)
    assert jnp.allclose(h_b, rh, atol=1e-1, rtol=0)
    assert jnp.allclose(c_b, rc, atol=1e-1, rtol=0)

    print("KERNEL_OK")
</pallas_src>

<mosaic_0001>
module attributes {stable_mosaic.version = 11 : i64} {
  func.func @_fused_lstm_kernel(%arg0: i32, %arg1: i32, %arg2: memref<8x8x16xf32, #tpu.memory_space<vmem>>, %arg3: memref<16x128xf32, #tpu.memory_space<vmem>>, %arg4: memref<1x128xf32, #tpu.memory_space<vmem>>, %arg5: memref<32x128xf32, #tpu.memory_space<vmem>>, %arg6: memref<8x32xf32, #tpu.memory_space<vmem>>, %arg7: memref<8x32xf32, #tpu.memory_space<vmem>>, %arg8: memref<8x8x32xf32, #tpu.memory_space<vmem>>, %arg9: memref<8x32xf32, #tpu.memory_space<vmem>>, %arg10: memref<8x32xf32, #tpu.memory_space<vmem>>, %arg11: memref<64x128xf32, #tpu.memory_space<vmem>>, %arg12: memref<8x32xf32, #tpu.memory_space<vmem>>, %arg13: memref<8x32xf32, #tpu.memory_space<vmem>>) attributes {dimension_semantics = [#tpu.dimension_semantics<parallel>, #tpu.dimension_semantics<arbitrary>], iteration_bounds = array<i64: 1, 2>, scalar_prefetch = 0 : i64, scratch_operands = 3 : i64, tpu.core_type = #tpu.core_type<tc>, window_params = [{transform_indices = @transform_0, window_bounds = array<i64: 8, 8, 16>}, {pipeline_mode = #tpu.pipeline_mode<synchronous>, transform_indices = @transform_1, window_bounds = array<i64: 16, 128>}, {pipeline_mode = #tpu.pipeline_mode<synchronous>, transform_indices = @transform_2, window_bounds = array<i64: 1, 128>}, {pipeline_mode = #tpu.pipeline_mode<synchronous>, transform_indices = @transform_3, window_bounds = array<i64: 32, 128>}, {transform_indices = @transform_4, window_bounds = array<i64: 8, 32>}, {transform_indices = @transform_5, window_bounds = array<i64: 8, 32>}, {transform_indices = @transform_6, window_bounds = array<i64: 8, 8, 32>}, {transform_indices = @transform_7, window_bounds = array<i64: 8, 32>}, {transform_indices = @transform_8, window_bounds = array<i64: 8, 32>}]} {
    %c0_i32 = arith.constant 0 : i32
    %0 = arith.cmpi eq, %arg1, %c0_i32 : i32
    %1 = arith.extui %0 : i1 to i32
    %c0_i32_0 = arith.constant 0 : i32
    %2 = arith.cmpi ne, %1, %c0_i32_0 : i32
    scf.if %2 {
      %c0_86 = arith.constant 0 : index
      %c0_87 = arith.constant 0 : index
      %299 = vector.load %arg6[%c0_86, %c0_87] : memref<8x32xf32, #tpu.memory_space<vmem>>, vector<8x32xf32>
      %c0_88 = arith.constant 0 : index
      %c0_89 = arith.constant 0 : index
      %300 = vector.load %arg12[%c0_88, %c0_89] : memref<8x32xf32, #tpu.memory_space<vmem>>, vector<8x32xf32>
      tpu.vector_store %arg12[%c0_88, %c0_89], %299 {strides = array<i32>} : memref<8x32xf32, #tpu.memory_space<vmem>>, vector<8x32xf32>,
      %c0_90 = arith.constant 0 : index
      %c0_91 = arith.constant 0 : index
      %301 = vector.load %arg7[%c0_90, %c0_91] : memref<8x32xf32, #tpu.memory_space<vmem>>, vector<8x32xf32>
      %c0_92 = arith.constant 0 : index
      %c0_93 = arith.constant 0 : index
      %302 = vector.load %arg13[%c0_92, %c0_93] : memref<8x32xf32, #tpu.memory_space<vmem>>, vector<8x32xf32>
      tpu.vector_store %arg13[%c0_92, %c0_93], %301 {strides = array<i32>} : memref<8x32xf32, #tpu.memory_space<vmem>>, vector<8x32xf32>,
    } else {
    }
    %c0 = arith.constant 0 : index
    %c0_1 = arith.constant 0 : index
    %c0_2 = arith.constant 0 : index
    %3 = vector.load %arg2[%c0, %c0_1, %c0_2] : memref<8x8x16xf32, #tpu.memory_space<vmem>>, vector<8x8x16xf32>
    %4 = vector.shape_cast %3 : vector<8x8x16xf32> to vector<64x16xf32>
    %c0_3 = arith.constant 0 : index
    %c0_4 = arith.constant 0 : index
    %5 = vector.load %arg3[%c0_3, %c0_4] : memref<16x128xf32, #tpu.memory_space<vmem>>, vector<16x128xf32>
    %cst = arith.constant dense<0.000000e+00> : vector<64x128xf32>
    %6 = tpu.matmul %4, %5, %cst {dimension_numbers = #tpu.dot_dimension_numbers<[1], [0], [0], [1], [0, 0, 1, 1], [], []>} : vector<64x16xf32>, vector<16x128xf32>, vector<64x128xf32> -> vector<64x128xf32>
    %c0_5 = arith.constant 0 : index
    %c0_6 = arith.constant 0 : index
    %7 = vector.load %arg4[%c0_5, %c0_6] : memref<1x128xf32, #tpu.memory_space<vmem>>, vector<1x128xf32>
    %8 = vector.broadcast %7 : vector<1x128xf32> to vector<64x128xf32>
    %9 = arith.addf %6, %8 : vector<64x128xf32>
    %c0_7 = arith.constant 0 : index
    %c0_8 = arith.constant 0 : index
    %10 = vector.load %arg11[%c0_7, %c0_8] : memref<64x128xf32, #tpu.memory_space<vmem>>, vector<64x128xf32>
    tpu.vector_store %arg11[%c0_7, %c0_8], %9 {strides = array<i32>} : memref<64x128xf32, #tpu.memory_space<vmem>>, vector<64x128xf32>,
    %c0_9 = arith.constant 0 : index
    %c0_10 = arith.constant 0 : index
    %11 = vector.load %arg5[%c0_9, %c0_10] : memref<32x128xf32, #tpu.memory_space<vmem>>, vector<32x128xf32>
    %c0_11 = arith.constant 0 : index
    %c0_12 = arith.constant 0 : index
    %12 = vector.load %arg12[%c0_11, %c0_12] : memref<8x32xf32, #tpu.memory_space<vmem>>, vector<8x32xf32>
    %c0_13 = arith.constant 0 : index
    %c0_14 = arith.constant 0 : index
    %13 = vector.load %arg13[%c0_13, %c0_14] : memref<8x32xf32, #tpu.memory_space<vmem>>, vector<8x32xf32>
    %c0_i32_15 = arith.constant 0 : i32
    %c8_i32 = arith.constant 8 : i32
    %14 = arith.muli %c0_i32_15, %c8_i32 : i32
    %15 = tpu.assume_multiple %14, 8 : i32
    %16 = arith.index_cast %15 : i32 to index
    %c0_16 = arith.constant 0 : index
    %17 = vector.load %arg11[%16, %c0_16] : memref<64x128xf32, #tpu.memory_space<vmem>>, vector<8x128xf32>
    %cst_17 = arith.constant dense<0.000000e+00> : vector<8x128xf32>
    %18 = tpu.matmul %12, %11, %cst_17 {dimension_numbers = #tpu.dot_dimension_numbers<[1], [0], [0], [1], [0, 0, 1, 1], [], []>} : vector<8x32xf32>, vector<32x128xf32>, vector<8x128xf32> -> vector<8x128xf32>
    %19 = arith.addf %17, %18 : vector<8x128xf32>
    %20 = vector.extract_strided_slice %19 {offsets = [0, 0], sizes = [8, 32], strides = [1, 1]} : vector<8x128xf32> to vector<8x32xf32>
    %21 = arith.negf %20 : vector<8x32xf32>
    %22 = math.exp %21 : vector<8x32xf32>
    %cst_18 = arith.constant 1.000000e+00 : f32
    %23 = vector.broadcast %cst_18 : f32 to vector<8x32xf32>
    %24 = arith.addf %23, %22 : vector<8x32xf32>
    %25 = arith.divf %23, %24 : vector<8x32xf32>
    %26 = vector.extract_strided_slice %19 {offsets = [0, 32], sizes = [8, 32], strides = [1, 1]} : vector<8x128xf32> to vector<8x32xf32>
    %27 = arith.negf %26 : vector<8x32xf32>
    %28 = math.exp %27 : vector<8x32xf32>
    %cst_19 = arith.constant 1.000000e+00 : f32
    %29 = vector.broadcast %cst_19 : f32 to vector<8x32xf32>
    %30 = arith.addf %29, %28 : vector<8x32xf32>
    %31 = arith.divf %29, %30 : vector<8x32xf32>
    %32 = vector.extract_strided_slice %19 {offsets = [0, 64], sizes = [8, 32], strides = [1, 1]} : vector<8x128xf32> to vector<8x32xf32>
    %33 = math.tanh %32 : vector<8x32xf32>
    %34 = vector.extract_strided_slice %19 {offsets = [0, 96], sizes = [8, 32], strides = [1, 1]} : vector<8x128xf32> to vector<8x32xf32>
    %35 = arith.negf %34 : vector<8x32xf32>
    %36 = math.exp %35 : vector<8x32xf32>
    %cst_20 = arith.constant 1.000000e+00 : f32
    %37 = vector.broadcast %cst_20 : f32 to vector<8x32xf32>
    %38 = arith.addf %37, %36 : vector<8x32xf32>
    %39 = arith.divf %37, %38 : vector<8x32xf32>
    %40 = arith.mulf %31, %13 : vector<8x32xf32>
    %41 = arith.mulf %25, %33 : vector<8x32xf32>
    %42 = arith.addf %40, %41 : vector<8x32xf32>
    %43 = math.tanh %42 : vector<8x32xf32>
    %44 = arith.mulf %39, %43 : vector<8x32xf32>
    %45 = arith.index_cast %c0_i32_15 : i32 to index
    %c0_21 = arith.constant 0 : index
    %c0_22 = arith.constant 0 : index
    %46 = vector.load %arg8[%45, %c0_21, %c0_22] : memref<8x8x32xf32, #tpu.memory_space<vmem>>, vector<1x8x32xf32>
    %47 = vector.shape_cast %46 : vector<1x8x32xf32> to vector<8x32xf32>
    %48 = vector.shape_cast %44 : vector<8x32xf32> to vector<1x8x32xf32>
    tpu.vector_store %arg8[%45, %c0_21, %c0_22], %48 {strides = array<i32>} : memref<8x8x32xf32, #tpu.memory_space<vmem>>, vector<1x8x32xf32>,
    %c1_i32 = arith.constant 1 : i32
    %c8_i32_23 = arith.constant 8 : i32
    %49 = arith.muli %c1_i32, %c8_i32_23 : i32
    %50 = tpu.assume_multiple %49, 8 : i32
    %51 = arith.index_cast %50 : i32 to index
    %c0_24 = arith.constant 0 : index
    %52 = vector.load %arg11[%51, %c0_24] : memref<64x128xf32, #tpu.memory_space<vmem>>, vector<8x128xf32>
    %cst_25 = arith.constant dense<0.000000e+00> : vector<8x128xf32>
    %53 = tpu.matmul %44, %11, %cst_25 {dimension_numbers = #tpu.dot_dimension_numbers<[1], [0], [0], [1], [0, 0, 1, 1], [], []>} : vector<8x32xf32>, vector<32x128xf32>, vector<8x128xf32> -> vector<8x128xf32>
    %54 = arith.addf %52, %53 : vector<8x128xf32>
    %55 = vector.extract_strided_slice %54 {offsets = [0, 0], sizes = [8, 32], strides = [1, 1]} : vector<8x128xf32> to vector<8x32xf32>
    %56 = arith.negf %55 : vector<8x32xf32>
    %57 = math.exp %56 : vector<8x32xf32>
    %cst_26 = arith.constant 1.000000e+00 : f32
    %58 = vector.broadcast %cst_26 : f32 to vector<8x32xf32>
    %59 = arith.addf %58, %57 : vector<8x32xf32>
    %60 = arith.divf %58, %59 : vector<8x32xf32>
    %61 = vector.extract_strided_slice %54 {offsets = [0, 32], sizes = [8, 32], strides = [1, 1]} : vector<8x128xf32> to vector<8x32xf32>
    %62 = arith.negf %61 : vector<8x32xf32>
    %63 = math.exp %62 : vector<8x32xf32>
    %cst_27 = arith.constant 1.000000e+00 : f32
    %64 = vector.broadcast %cst_27 : f32 to vector<8x32xf32>
    %65 = arith.addf %64, %63 : vector<8x32xf32>
    %66 = arith.divf %64, %65 : vector<8x32xf32>
    %67 = vector.extract_strided_slice %54 {offsets = [0, 64], sizes = [8, 32], strides = [1, 1]} : vector<8x128xf32> to vector<8x32xf32>
    %68 = math.tanh %67 : vector<8x32xf32>
    %69 = vector.extract_strided_slice %54 {offsets = [0, 96], sizes = [8, 32], strides = [1, 1]} : vector<8x128xf32> to vector<8x32xf32>
    %70 = arith.negf %69 : vector<8x32xf32>
    %71 = math.exp %70 : vector<8x32xf32>
    %cst_28 = arith.constant 1.000000e+00 : f32
    %72 = vector.broadcast %cst_28 : f32 to vector<8x32xf32>
    %73 = arith.addf %72, %71 : vector<8x32xf32>
    %74 = arith.divf %72, %73 : vector<8x32xf32>
    %75 = arith.mulf %66, %42 : vector<8x32xf32>
    %76 = arith.mulf %60, %68 : vector<8x32xf32>
    %77 = arith.addf %75, %76 : vector<8x32xf32>
    %78 = math.tanh %77 : vector<8x32xf32>
    %79 = arith.mulf %74, %78 : vector<8x32xf32>
    %80 = arith.index_cast %c1_i32 : i32 to index
    %c0_29 = arith.constant 0 : index
    %c0_30 = arith.constant 0 : index
    %81 = vector.load %arg8[%80, %c0_29, %c0_30] : memref<8x8x32xf32, #tpu.memory_space<vmem>>, vector<1x8x32xf32>
    %82 = vector.shape_cast %81 : vector<1x8x32xf32> to vector<8x32xf32>
    %83 = vector.shape_cast %79 : vector<8x32xf32> to vector<1x8x32xf32>
    tpu.vector_store %arg8[%80, %c0_29, %c0_30], %83 {strides = array<i32>} : memref<8x8x32xf32, #tpu.memory_space<vmem>>, vector<1x8x32xf32>,
    %c2_i32 = arith.constant 2 : i32
    %c8_i32_31 = arith.constant 8 : i32
    %84 = arith.muli %c2_i32, %c8_i32_31 : i32
    %85 = tpu.assume_multiple %84, 8 : i32
    %86 = arith.index_cast %85 : i32 to index
    %c0_32 = arith.constant 0 : index
    %87 = vector.load %arg11[%86, %c0_32] : memref<64x128xf32, #tpu.memory_space<vmem>>, vector<8x128xf32>
    %cst_33 = arith.constant dense<0.000000e+00> : vector<8x128xf32>
    %88 = tpu.matmul %79, %11, %cst_33 {dimension_numbers = #tpu.dot_dimension_numbers<[1], [0], [0], [1], [0, 0, 1, 1], [], []>} : vector<8x32xf32>, vector<32x128xf32>, vector<8x128xf32> -> vector<8x128xf32>
    %89 = arith.addf %87, %88 : vector<8x128xf32>
    %90 = vector.extract_strided_slice %89 {offsets = [0, 0], sizes = [8, 32], strides = [1, 1]} : vector<8x128xf32> to vector<8x32xf32>
    %91 = arith.negf %90 : vector<8x32xf32>
    %92 = math.exp %91 : vector<8x32xf32>
    %cst_34 = arith.constant 1.000000e+00 : f32
    %93 = vector.broadcast %cst_34 : f32 to vector<8x32xf32>
    %94 = arith.addf %93, %92 : vector<8x32xf32>
    %95 = arith.divf %93, %94 : vector<8x32xf32>
    %96 = vector.extract_strided_slice %89 {offsets = [0, 32], sizes = [8, 32], strides = [1, 1]} : vector<8x128xf32> to vector<8x32xf32>
    %97 = arith.negf %96 : vector<8x32xf32>
    %98 = math.exp %97 : vector<8x32xf32>
    %cst_35 = arith.constant 1.000000e+00 : f32
    %99 = vector.broadcast %cst_35 : f32 to vector<8x32xf32>
    %100 = arith.addf %99, %98 : vector<8x32xf32>
    %101 = arith.divf %99, %100 : vector<8x32xf32>
    %102 = vector.extract_strided_slice %89 {offsets = [0, 64], sizes = [8, 32], strides = [1, 1]} : vector<8x128xf32> to vector<8x32xf32>
    %103 = math.tanh %102 : vector<8x32xf32>
    %104 = vector.extract_strided_slice %89 {offsets = [0, 96], sizes = [8, 32], strides = [1, 1]} : vector<8x128xf32> to vector<8x32xf32>
    %105 = arith.negf %104 : vector<8x32xf32>
    %106 = math.exp %105 : vector<8x32xf32>
    %cst_36 = arith.constant 1.000000e+00 : f32
    %107 = vector.broadcast %cst_36 : f32 to vector<8x32xf32>
    %108 = arith.addf %107, %106 : vector<8x32xf32>
    %109 = arith.divf %107, %108 : vector<8x32xf32>
    %110 = arith.mulf %101, %77 : vector<8x32xf32>
    %111 = arith.mulf %95, %103 : vector<8x32xf32>
    %112 = arith.addf %110, %111 : vector<8x32xf32>
    %113 = math.tanh %112 : vector<8x32xf32>
    %114 = arith.mulf %109, %113 : vector<8x32xf32>
    %115 = arith.index_cast %c2_i32 : i32 to index
    %c0_37 = arith.constant 0 : index
    %c0_38 = arith.constant 0 : index
    %116 = vector.load %arg8[%115, %c0_37, %c0_38] : memref<8x8x32xf32, #tpu.memory_space<vmem>>, vector<1x8x32xf32>
    %117 = vector.shape_cast %116 : vector<1x8x32xf32> to vector<8x32xf32>
    %118 = vector.shape_cast %114 : vector<8x32xf32> to vector<1x8x32xf32>
    tpu.vector_store %arg8[%115, %c0_37, %c0_38], %118 {strides = array<i32>} : memref<8x8x32xf32, #tpu.memory_space<vmem>>, vector<1x8x32xf32>,
    %c3_i32 = arith.constant 3 : i32
    %c8_i32_39 = arith.constant 8 : i32
    %119 = arith.muli %c3_i32, %c8_i32_39 : i32
    %120 = tpu.assume_multiple %119, 8 : i32
    %121 = arith.index_cast %120 : i32 to index
    %c0_40 = arith.constant 0 : index
    %122 = vector.load %arg11[%121, %c0_40] : memref<64x128xf32, #tpu.memory_space<vmem>>, vector<8x128xf32>
    %cst_41 = arith.constant dense<0.000000e+00> : vector<8x128xf32>
    %123 = tpu.matmul %114, %11, %cst_41 {dimension_numbers = #tpu.dot_dimension_numbers<[1], [0], [0], [1], [0, 0, 1, 1], [], []>} : vector<8x32xf32>, vector<32x128xf32>, vector<8x128xf32> -> vector<8x128xf32>
    %124 = arith.addf %122, %123 : vector<8x128xf32>
    %125 = vector.extract_strided_slice %124 {offsets = [0, 0], sizes = [8, 32], strides = [1, 1]} : vector<8x128xf32> to vector<8x32xf32>
    %126 = arith.negf %125 : vector<8x32xf32>
    %127 = math.exp %126 : vector<8x32xf32>
    %cst_42 = arith.constant 1.000000e+00 : f32
    %128 = vector.broadcast %cst_42 : f32 to vector<8x32xf32>
    %129 = arith.addf %128, %127 : vector<8x32xf32>
    %130 = arith.divf %128, %129 : vector<8x32xf32>
    %131 = vector.extract_strided_slice %124 {offsets = [0, 32], sizes = [8, 32], strides = [1, 1]} : vector<8x128xf32> to vector<8x32xf32>
    %132 = arith.negf %131 : vector<8x32xf32>
    %133 = math.exp %132 : vector<8x32xf32>
    %cst_43 = arith.constant 1.000000e+00 : f32
    %134 = vector.broadcast %cst_43 : f32 to vector<8x32xf32>
    %135 = arith.addf %134, %133 : vector<8x32xf32>
    %136 = arith.divf %134, %135 : vector<8x32xf32>
    %137 = vector.extract_strided_slice %124 {offsets = [0, 64], sizes = [8, 32], strides = [1, 1]} : vector<8x128xf32> to vector<8x32xf32>
    %138 = math.tanh %137 : vector<8x32xf32>
    %139 = vector.extract_strided_slice %124 {offsets = [0, 96], sizes = [8, 32], strides = [1, 1]} : vector<8x128xf32> to vector<8x32xf32>
    %140 = arith.negf %139 : vector<8x32xf32>
    %141 = math.exp %140 : vector<8x32xf32>
    %cst_44 = arith.constant 1.000000e+00 : f32
    %142 = vector.broadcast %cst_44 : f32 to vector<8x32xf32>
    %143 = arith.addf %142, %141 : vector<8x32xf32>
    %144 = arith.divf %142, %143 : vector<8x32xf32>
    %145 = arith.mulf %136, %112 : vector<8x32xf32>
    %146 = arith.mulf %130, %138 : vector<8x32xf32>
    %147 = arith.addf %145, %146 : vector<8x32xf32>
    %148 = math.tanh %147 : vector<8x32xf32>
    %149 = arith.mulf %144, %148 : vector<8x32xf32>
    %150 = arith.index_cast %c3_i32 : i32 to index
    %c0_45 = arith.constant 0 : index
    %c0_46 = arith.constant 0 : index
    %151 = vector.load %arg8[%150, %c0_45, %c0_46] : memref<8x8x32xf32, #tpu.memory_space<vmem>>, vector<1x8x32xf32>
    %152 = vector.shape_cast %151 : vector<1x8x32xf32> to vector<8x32xf32>
    %153 = vector.shape_cast %149 : vector<8x32xf32> to vector<1x8x32xf32>
    tpu.vector_store %arg8[%150, %c0_45, %c0_46], %153 {strides = array<i32>} : memref<8x8x32xf32, #tpu.memory_space<vmem>>, vector<1x8x32xf32>,
    %c4_i32 = arith.constant 4 : i32
    %c8_i32_47 = arith.constant 8 : i32
    %154 = arith.muli %c4_i32, %c8_i32_47 : i32
    %155 = tpu.assume_multiple %154, 8 : i32
    %156 = arith.index_cast %155 : i32 to index
    %c0_48 = arith.constant 0 : index
    %157 = vector.load %arg11[%156, %c0_48] : memref<64x128xf32, #tpu.memory_space<vmem>>, vector<8x128xf32>
    %cst_49 = arith.constant dense<0.000000e+00> : vector<8x128xf32>
    %158 = tpu.matmul %149, %11, %cst_49 {dimension_numbers = #tpu.dot_dimension_numbers<[1], [0], [0], [1], [0, 0, 1, 1], [], []>} : vector<8x32xf32>, vector<32x128xf32>, vector<8x128xf32> -> vector<8x128xf32>
    %159 = arith.addf %157, %158 : vector<8x128xf32>
    %160 = vector.extract_strided_slice %159 {offsets = [0, 0], sizes = [8, 32], strides = [1, 1]} : vector<8x128xf32> to vector<8x32xf32>
    %161 = arith.negf %160 : vector<8x32xf32>
    %162 = math.exp %161 : vector<8x32xf32>
    %cst_50 = arith.constant 1.000000e+00 : f32
    %163 = vector.broadcast %cst_50 : f32 to vector<8x32xf32>
    %164 = arith.addf %163, %162 : vector<8x32xf32>
    %165 = arith.divf %163, %164 : vector<8x32xf32>
    %166 = vector.extract_strided_slice %159 {offsets = [0, 32], sizes = [8, 32], strides = [1, 1]} : vector<8x128xf32> to vector<8x32xf32>
    %167 = arith.negf %166 : vector<8x32xf32>
    %168 = math.exp %167 : vector<8x32xf32>
    %cst_51 = arith.constant 1.000000e+00 : f32
    %169 = vector.broadcast %cst_51 : f32 to vector<8x32xf32>
    %170 = arith.addf %169, %168 : vector<8x32xf32>
    %171 = arith.divf %169, %170 : vector<8x32xf32>
    %172 = vector.extract_strided_slice %159 {offsets = [0, 64], sizes = [8, 32], strides = [1, 1]} : vector<8x128xf32> to vector<8x32xf32>
    %173 = math.tanh %172 : vector<8x32xf32>
    %174 = vector.extract_strided_slice %159 {offsets = [0, 96], sizes = [8, 32], strides = [1, 1]} : vector<8x128xf32> to vector<8x32xf32>
    %175 = arith.negf %174 : vector<8x32xf32>
    %176 = math.exp %175 : vector<8x32xf32>
    %cst_52 = arith.constant 1.000000e+00 : f32
    %177 = vector.broadcast %cst_52 : f32 to vector<8x32xf32>
    %178 = arith.addf %177, %176 : vector<8x32xf32>
    %179 = arith.divf %177, %178 : vector<8x32xf32>
    %180 = arith.mulf %171, %147 : vector<8x32xf32>
    %181 = arith.mulf %165, %173 : vector<8x32xf32>
    %182 = arith.addf %180, %181 : vector<8x32xf32>
    %183 = math.tanh %182 : vector<8x32xf32>
    %184 = arith.mulf %179, %183 : vector<8x32xf32>
    %185 = arith.index_cast %c4_i32 : i32 to index
    %c0_53 = arith.constant 0 : index
    %c0_54 = arith.constant 0 : index
    %186 = vector.load %arg8[%185, %c0_53, %c0_54] : memref<8x8x32xf32, #tpu.memory_space<vmem>>, vector<1x8x32xf32>
    %187 = vector.shape_cast %186 : vector<1x8x32xf32> to vector<8x32xf32>
    %188 = vector.shape_cast %184 : vector<8x32xf32> to vector<1x8x32xf32>
    tpu.vector_store %arg8[%185, %c0_53, %c0_54], %188 {strides = array<i32>} : memref<8x8x32xf32, #tpu.memory_space<vmem>>, vector<1x8x32xf32>,
    %c5_i32 = arith.constant 5 : i32
    %c8_i32_55 = arith.constant 8 : i32
    %189 = arith.muli %c5_i32, %c8_i32_55 : i32
    %190 = tpu.assume_multiple %189, 8 : i32
    %191 = arith.index_cast %190 : i32 to index
    %c0_56 = arith.constant 0 : index
    %192 = vector.load %arg11[%191, %c0_56] : memref<64x128xf32, #tpu.memory_space<vmem>>, vector<8x128xf32>
    %cst_57 = arith.constant dense<0.000000e+00> : vector<8x128xf32>
    %193 = tpu.matmul %184, %11, %cst_57 {dimension_numbers = #tpu.dot_dimension_numbers<[1], [0], [0], [1], [0, 0, 1, 1], [], []>} : vector<8x32xf32>, vector<32x128xf32>, vector<8x128xf32> -> vector<8x128xf32>
    %194 = arith.addf %192, %193 : vector<8x128xf32>
    %195 = vector.extract_strided_slice %194 {offsets = [0, 0], sizes = [8, 32], strides = [1, 1]} : vector<8x128xf32> to vector<8x32xf32>
    %196 = arith.negf %195 : vector<8x32xf32>
    %197 = math.exp %196 : vector<8x32xf32>
    %cst_58 = arith.constant 1.000000e+00 : f32
    %198 = vector.broadcast %cst_58 : f32 to vector<8x32xf32>
    %199 = arith.addf %198, %197 : vector<8x32xf32>
    %200 = arith.divf %198, %199 : vector<8x32xf32>
    %201 = vector.extract_strided_slice %194 {offsets = [0, 32], sizes = [8, 32], strides = [1, 1]} : vector<8x128xf32> to vector<8x32xf32>
    %202 = arith.negf %201 : vector<8x32xf32>
    %203 = math.exp %202 : vector<8x32xf32>
    %cst_59 = arith.constant 1.000000e+00 : f32
    %204 = vector.broadcast %cst_59 : f32 to vector<8x32xf32>
    %205 = arith.addf %204, %203 : vector<8x32xf32>
    %206 = arith.divf %204, %205 : vector<8x32xf32>
    %207 = vector.extract_strided_slice %194 {offsets = [0, 64], sizes = [8, 32], strides = [1, 1]} : vector<8x128xf32> to vector<8x32xf32>
    %208 = math.tanh %207 : vector<8x32xf32>
    %209 = vector.extract_strided_slice %194 {offsets = [0, 96], sizes = [8, 32], strides = [1, 1]} : vector<8x128xf32> to vector<8x32xf32>
    %210 = arith.negf %209 : vector<8x32xf32>
    %211 = math.exp %210 : vector<8x32xf32>
    %cst_60 = arith.constant 1.000000e+00 : f32
    %212 = vector.broadcast %cst_60 : f32 to vector<8x32xf32>
    %213 = arith.addf %212, %211 : vector<8x32xf32>
    %214 = arith.divf %212, %213 : vector<8x32xf32>
    %215 = arith.mulf %206, %182 : vector<8x32xf32>
    %216 = arith.mulf %200, %208 : vector<8x32xf32>
    %217 = arith.addf %215, %216 : vector<8x32xf32>
    %218 = math.tanh %217 : vector<8x32xf32>
    %219 = arith.mulf %214, %218 : vector<8x32xf32>
    %220 = arith.index_cast %c5_i32 : i32 to index
    %c0_61 = arith.constant 0 : index
    %c0_62 = arith.constant 0 : index
    %221 = vector.load %arg8[%220, %c0_61, %c0_62] : memref<8x8x32xf32, #tpu.memory_space<vmem>>, vector<1x8x32xf32>
    %222 = vector.shape_cast %221 : vector<1x8x32xf32> to vector<8x32xf32>
    %223 = vector.shape_cast %219 : vector<8x32xf32> to vector<1x8x32xf32>
    tpu.vector_store %arg8[%220, %c0_61, %c0_62], %223 {strides = array<i32>} : memref<8x8x32xf32, #tpu.memory_space<vmem>>, vector<1x8x32xf32>,
    %c6_i32 = arith.constant 6 : i32
    %c8_i32_63 = arith.constant 8 : i32
    %224 = arith.muli %c6_i32, %c8_i32_63 : i32
    %225 = tpu.assume_multiple %224, 8 : i32
    %226 = arith.index_cast %225 : i32 to index
    %c0_64 = arith.constant 0 : index
    %227 = vector.load %arg11[%226, %c0_64] : memref<64x128xf32, #tpu.memory_space<vmem>>, vector<8x128xf32>
    %cst_65 = arith.constant dense<0.000000e+00> : vector<8x128xf32>
    %228 = tpu.matmul %219, %11, %cst_65 {dimension_numbers = #tpu.dot_dimension_numbers<[1], [0], [0], [1], [0, 0, 1, 1], [], []>} : vector<8x32xf32>, vector<32x128xf32>, vector<8x128xf32> -> vector<8x128xf32>
    %229 = arith.addf %227, %228 : vector<8x128xf32>
    %230 = vector.extract_strided_slice %229 {offsets = [0, 0], sizes = [8, 32], strides = [1, 1]} : vector<8x128xf32> to vector<8x32xf32>
    %231 = arith.negf %230 : vector<8x32xf32>
    %232 = math.exp %231 : vector<8x32xf32>
    %cst_66 = arith.constant 1.000000e+00 : f32
    %233 = vector.broadcast %cst_66 : f32 to vector<8x32xf32>
    %234 = arith.addf %233, %232 : vector<8x32xf32>
    %235 = arith.divf %233, %234 : vector<8x32xf32>
    %236 = vector.extract_strided_slice %229 {offsets = [0, 32], sizes = [8, 32], strides = [1, 1]} : vector<8x128xf32> to vector<8x32xf32>
    %237 = arith.negf %236 : vector<8x32xf32>
    %238 = math.exp %237 : vector<8x32xf32>
    %cst_67 = arith.constant 1.000000e+00 : f32
    %239 = vector.broadcast %cst_67 : f32 to vector<8x32xf32>
    %240 = arith.addf %239, %238 : vector<8x32xf32>
    %241 = arith.divf %239, %240 : vector<8x32xf32>
    %242 = vector.extract_strided_slice %229 {offsets = [0, 64], sizes = [8, 32], strides = [1, 1]} : vector<8x128xf32> to vector<8x32xf32>
    %243 = math.tanh %242 : vector<8x32xf32>
    %244 = vector.extract_strided_slice %229 {offsets = [0, 96], sizes = [8, 32], strides = [1, 1]} : vector<8x128xf32> to vector<8x32xf32>
    %245 = arith.negf %244 : vector<8x32xf32>
    %246 = math.exp %245 : vector<8x32xf32>
    %cst_68 = arith.constant 1.000000e+00 : f32
    %247 = vector.broadcast %cst_68 : f32 to vector<8x32xf32>
    %248 = arith.addf %247, %246 : vector<8x32xf32>
    %249 = arith.divf %247, %248 : vector<8x32xf32>
    %250 = arith.mulf %241, %217 : vector<8x32xf32>
    %251 = arith.mulf %235, %243 : vector<8x32xf32>
    %252 = arith.addf %250, %251 : vector<8x32xf32>
    %253 = math.tanh %252 : vector<8x32xf32>
    %254 = arith.mulf %249, %253 : vector<8x32xf32>
    %255 = arith.index_cast %c6_i32 : i32 to index
    %c0_69 = arith.constant 0 : index
    %c0_70 = arith.constant 0 : index
    %256 = vector.load %arg8[%255, %c0_69, %c0_70] : memref<8x8x32xf32, #tpu.memory_space<vmem>>, vector<1x8x32xf32>
    %257 = vector.shape_cast %256 : vector<1x8x32xf32> to vector<8x32xf32>
    %258 = vector.shape_cast %254 : vector<8x32xf32> to vector<1x8x32xf32>
    tpu.vector_store %arg8[%255, %c0_69, %c0_70], %258 {strides = array<i32>} : memref<8x8x32xf32, #tpu.memory_space<vmem>>, vector<1x8x32xf32>,
    %c7_i32 = arith.constant 7 : i32
    %c8_i32_71 = arith.constant 8 : i32
    %259 = arith.muli %c7_i32, %c8_i32_71 : i32
    %260 = tpu.assume_multiple %259, 8 : i32
    %261 = arith.index_cast %260 : i32 to index
    %c0_72 = arith.constant 0 : index
    %262 = vector.load %arg11[%261, %c0_72] : memref<64x128xf32, #tpu.memory_space<vmem>>, vector<8x128xf32>
    %cst_73 = arith.constant dense<0.000000e+00> : vector<8x128xf32>
    %263 = tpu.matmul %254, %11, %cst_73 {dimension_numbers = #tpu.dot_dimension_numbers<[1], [0], [0], [1], [0, 0, 1, 1], [], []>} : vector<8x32xf32>, vector<32x128xf32>, vector<8x128xf32> -> vector<8x128xf32>
    %264 = arith.addf %262, %263 : vector<8x128xf32>
    %265 = vector.extract_strided_slice %264 {offsets = [0, 0], sizes = [8, 32], strides = [1, 1]} : vector<8x128xf32> to vector<8x32xf32>
    %266 = arith.negf %265 : vector<8x32xf32>
    %267 = math.exp %266 : vector<8x32xf32>
    %cst_74 = arith.constant 1.000000e+00 : f32
    %268 = vector.broadcast %cst_74 : f32 to vector<8x32xf32>
    %269 = arith.addf %268, %267 : vector<8x32xf32>
    %270 = arith.divf %268, %269 : vector<8x32xf32>
    %271 = vector.extract_strided_slice %264 {offsets = [0, 32], sizes = [8, 32], strides = [1, 1]} : vector<8x128xf32> to vector<8x32xf32>
    %272 = arith.negf %271 : vector<8x32xf32>
    %273 = math.exp %272 : vector<8x32xf32>
    %cst_75 = arith.constant 1.000000e+00 : f32
    %274 = vector.broadcast %cst_75 : f32 to vector<8x32xf32>
    %275 = arith.addf %274, %273 : vector<8x32xf32>
    %276 = arith.divf %274, %275 : vector<8x32xf32>
    %277 = vector.extract_strided_slice %264 {offsets = [0, 64], sizes = [8, 32], strides = [1, 1]} : vector<8x128xf32> to vector<8x32xf32>
    %278 = math.tanh %277 : vector<8x32xf32>
    %279 = vector.extract_strided_slice %264 {offsets = [0, 96], sizes = [8, 32], strides = [1, 1]} : vector<8x128xf32> to vector<8x32xf32>
    %280 = arith.negf %279 : vector<8x32xf32>
    %281 = math.exp %280 : vector<8x32xf32>
    %cst_76 = arith.constant 1.000000e+00 : f32
    %282 = vector.broadcast %cst_76 : f32 to vector<8x32xf32>
    %283 = arith.addf %282, %281 : vector<8x32xf32>
    %284 = arith.divf %282, %283 : vector<8x32xf32>
    %285 = arith.mulf %276, %252 : vector<8x32xf32>
    %286 = arith.mulf %270, %278 : vector<8x32xf32>
    %287 = arith.addf %285, %286 : vector<8x32xf32>
    %288 = math.tanh %287 : vector<8x32xf32>
    %289 = arith.mulf %284, %288 : vector<8x32xf32>
    %290 = arith.index_cast %c7_i32 : i32 to index
    %c0_77 = arith.constant 0 : index
    %c0_78 = arith.constant 0 : index
    %291 = vector.load %arg8[%290, %c0_77, %c0_78] : memref<8x8x32xf32, #tpu.memory_space<vmem>>, vector<1x8x32xf32>
    %292 = vector.shape_cast %291 : vector<1x8x32xf32> to vector<8x32xf32>
    %293 = vector.shape_cast %289 : vector<8x32xf32> to vector<1x8x32xf32>
    tpu.vector_store %arg8[%290, %c0_77, %c0_78], %293 {strides = array<i32>} : memref<8x8x32xf32, #tpu.memory_space<vmem>>, vector<1x8x32xf32>,
    %c8_i32_79 = arith.constant 8 : i32
    %c0_80 = arith.constant 0 : index
    %c0_81 = arith.constant 0 : index
    %294 = vector.load %arg12[%c0_80, %c0_81] : memref<8x32xf32, #tpu.memory_space<vmem>>, vector<8x32xf32>
    tpu.vector_store %arg12[%c0_80, %c0_81], %289 {strides = array<i32>} : memref<8x32xf32, #tpu.memory_space<vmem>>, vector<8x32xf32>,
    %c0_82 = arith.constant 0 : index
    %c0_83 = arith.constant 0 : index
    %295 = vector.load %arg13[%c0_82, %c0_83] : memref<8x32xf32, #tpu.memory_space<vmem>>, vector<8x32xf32>
    tpu.vector_store %arg13[%c0_82, %c0_83], %287 {strides = array<i32>} : memref<8x32xf32, #tpu.memory_space<vmem>>, vector<8x32xf32>,
    %c1_i32_84 = arith.constant 1 : i32
    %296 = arith.cmpi eq, %arg1, %c1_i32_84 : i32
    %297 = arith.extui %296 : i1 to i32
    %c0_i32_85 = arith.constant 0 : i32
    %298 = arith.cmpi ne, %297, %c0_i32_85 : i32
    scf.if %298 {
      %c0_86 = arith.constant 0 : index
      %c0_87 = arith.constant 0 : index
      %299 = vector.load %arg9[%c0_86, %c0_87] : memref<8x32xf32, #tpu.memory_space<vmem>>, vector<8x32xf32>
      tpu.vector_store %arg9[%c0_86, %c0_87], %289 {strides = array<i32>} : memref<8x32xf32, #tpu.memory_space<vmem>>, vector<8x32xf32>,
      %c0_88 = arith.constant 0 : index
      %c0_89 = arith.constant 0 : index
      %300 = vector.load %arg10[%c0_88, %c0_89] : memref<8x32xf32, #tpu.memory_space<vmem>>, vector<8x32xf32>
      tpu.vector_store %arg10[%c0_88, %c0_89], %287 {strides = array<i32>} : memref<8x32xf32, #tpu.memory_space<vmem>>, vector<8x32xf32>,
    } else {
    }
    return
  }
  func.func @transform_0(%arg0: i32, %arg1: i32) -> (i32, i32, i32) {
    %c0_i32 = arith.constant 0 : i32
    %c0_i32_0 = arith.constant 0 : i32
    return %arg1, %arg0, %c0_i32 : i32, i32, i32
  }
  func.func @transform_1(%arg0: i32, %arg1: i32) -> (i32, i32) {
    %c0_i32 = arith.constant 0 : i32
    %c0_i32_0 = arith.constant 0 : i32
    %c0_i32_1 = arith.constant 0 : i32
    return %c0_i32, %c0_i32_0 : i32, i32
  }
  func.func @transform_2(%arg0: i32, %arg1: i32) -> (i32, i32) {
    %c0_i32 = arith.constant 0 : i32
    %c0_i32_0 = arith.constant 0 : i32
    %c0_i32_1 = arith.constant 0 : i32
    return %c0_i32, %c0_i32_0 : i32, i32
  }
  func.func @transform_3(%arg0: i32, %arg1: i32) -> (i32, i32) {
    %c0_i32 = arith.constant 0 : i32
    %c0_i32_0 = arith.constant 0 : i32
    %c0_i32_1 = arith.constant 0 : i32
    return %c0_i32, %c0_i32_0 : i32, i32
  }
  func.func @transform_4(%arg0: i32, %arg1: i32) -> (i32, i32) {
    %c0_i32 = arith.constant 0 : i32
    %c0_i32_0 = arith.constant 0 : i32
    return %arg0, %c0_i32 : i32, i32
  }
  func.func @transform_5(%arg0: i32, %arg1: i32) -> (i32, i32) {
    %c0_i32 = arith.constant 0 : i32
    %c0_i32_0 = arith.constant 0 : i32
    return %arg0, %c0_i32 : i32, i32
  }
  func.func @transform_6(%arg0: i32, %arg1: i32) -> (i32, i32, i32) {
    %c0_i32 = arith.constant 0 : i32
    %c0_i32_0 = arith.constant 0 : i32
    return %arg1, %arg0, %c0_i32 : i32, i32, i32
  }
  func.func @transform_7(%arg0: i32, %arg1: i32) -> (i32, i32) {
    %c0_i32 = arith.constant 0 : i32
    %c0_i32_0 = arith.constant 0 : i32
    return %arg0, %c0_i32 : i32, i32
  }
  func.func @transform_8(%arg0: i32, %arg1: i32) -> (i32, i32) {
    %c0_i32 = arith.constant 0 : i32
    %c0_i32_0 = arith.constant 0 : i32
    return %arg0, %c0_i32 : i32, i32
  }
}

module attributes {stable_mosaic.version = 11 : i64} {
  func.func @_fused_lstm_kernel(%arg0: i32, %arg1: i32, %arg2: memref<8x8x16xf32, #tpu.memory_space<vmem>>, %arg3: memref<16x128xf32, #tpu.memory_space<vmem>>, %arg4: memref<1x128xf32, #tpu.memory_space<vmem>>, %arg5: memref<32x128xf32, #tpu.memory_space<vmem>>, %arg6: memref<8x32xf32, #tpu.memory_space<vmem>>, %arg7: memref<8x32xf32, #tpu.memory_space<vmem>>, %arg8: memref<8x8x32xf32, #tpu.memory_space<vmem>>, %arg9: memref<8x32xf32, #tpu.memory_space<vmem>>, %arg10: memref<8x32xf32, #tpu.memory_space<vmem>>, %arg11: memref<64x128xf32, #tpu.memory_space<vmem>>, %arg12: memref<8x32xf32, #tpu.memory_space<vmem>>, %arg13: memref<8x32xf32, #tpu.memory_space<vmem>>) attributes {dimension_semantics = [#tpu.dimension_semantics<parallel>, #tpu.dimension_semantics<arbitrary>], iteration_bounds = array<i64: 1, 2>, scalar_prefetch = 0 : i64, scratch_operands = 3 : i64, tpu.core_type = #tpu.core_type<tc>, window_params = [{transform_indices = @transform_0, window_bounds = array<i64: 8, 8, 16>}, {pipeline_mode = #tpu.pipeline_mode<synchronous>, transform_indices = @transform_1, window_bounds = array<i64: 16, 128>}, {pipeline_mode = #tpu.pipeline_mode<synchronous>, transform_indices = @transform_2, window_bounds = array<i64: 1, 128>}, {pipeline_mode = #tpu.pipeline_mode<synchronous>, transform_indices = @transform_3, window_bounds = array<i64: 32, 128>}, {transform_indices = @transform_4, window_bounds = array<i64: 8, 32>}, {transform_indices = @transform_5, window_bounds = array<i64: 8, 32>}, {transform_indices = @transform_6, window_bounds = array<i64: 8, 8, 32>}, {transform_indices = @transform_7, window_bounds = array<i64: 8, 32>}, {transform_indices = @transform_8, window_bounds = array<i64: 8, 32>}]} {
    %c0_i32 = arith.constant 0 : i32
    %0 = arith.cmpi eq, %arg1, %c0_i32 : i32
    %1 = arith.extui %0 : i1 to i32
    %c0_i32_0 = arith.constant 0 : i32
    %2 = arith.cmpi ne, %1, %c0_i32_0 : i32
    scf.if %2 {
      %c0_86 = arith.constant 0 : index
      %c0_87 = arith.constant 0 : index
      %299 = vector.load %arg6[%c0_86, %c0_87] : memref<8x32xf32, #tpu.memory_space<vmem>>, vector<8x32xf32>
      %c0_88 = arith.constant 0 : index
      %c0_89 = arith.constant 0 : index
      %300 = vector.load %arg12[%c0_88, %c0_89] : memref<8x32xf32, #tpu.memory_space<vmem>>, vector<8x32xf32>
      tpu.vector_store %arg12[%c0_88, %c0_89], %299 {strides = array<i32>} : memref<8x32xf32, #tpu.memory_space<vmem>>, vector<8x32xf32>,
      %c0_90 = arith.constant 0 : index
      %c0_91 = arith.constant 0 : index
      %301 = vector.load %arg7[%c0_90, %c0_91] : memref<8x32xf32, #tpu.memory_space<vmem>>, vector<8x32xf32>
      %c0_92 = arith.constant 0 : index
      %c0_93 = arith.constant 0 : index
      %302 = vector.load %arg13[%c0_92, %c0_93] : memref<8x32xf32, #tpu.memory_space<vmem>>, vector<8x32xf32>
      tpu.vector_store %arg13[%c0_92, %c0_93], %301 {strides = array<i32>} : memref<8x32xf32, #tpu.memory_space<vmem>>, vector<8x32xf32>,
    } else {
    }
    %c0 = arith.constant 0 : index
    %c0_1 = arith.constant 0 : index
    %c0_2 = arith.constant 0 : index
    %3 = vector.load %arg2[%c0, %c0_1, %c0_2] : memref<8x8x16xf32, #tpu.memory_space<vmem>>, vector<8x8x16xf32>
    %4 = vector.shape_cast %3 : vector<8x8x16xf32> to vector<64x16xf32>
    %c0_3 = arith.constant 0 : index
    %c0_4 = arith.constant 0 : index
    %5 = vector.load %arg3[%c0_3, %c0_4] : memref<16x128xf32, #tpu.memory_space<vmem>>, vector<16x128xf32>
    %cst = arith.constant dense<0.000000e+00> : vector<64x128xf32>
    %6 = tpu.matmul %4, %5, %cst {dimension_numbers = #tpu.dot_dimension_numbers<[1], [0], [0], [1], [0, 0, 1, 1], [], []>} : vector<64x16xf32>, vector<16x128xf32>, vector<64x128xf32> -> vector<64x128xf32>
    %c0_5 = arith.constant 0 : index
    %c0_6 = arith.constant 0 : index
    %7 = vector.load %arg4[%c0_5, %c0_6] : memref<1x128xf32, #tpu.memory_space<vmem>>, vector<1x128xf32>
    %8 = vector.broadcast %7 : vector<1x128xf32> to vector<64x128xf32>
    %9 = arith.addf %6, %8 : vector<64x128xf32>
    %c0_7 = arith.constant 0 : index
    %c0_8 = arith.constant 0 : index
    %10 = vector.load %arg11[%c0_7, %c0_8] : memref<64x128xf32, #tpu.memory_space<vmem>>, vector<64x128xf32>
    tpu.vector_store %arg11[%c0_7, %c0_8], %9 {strides = array<i32>} : memref<64x128xf32, #tpu.memory_space<vmem>>, vector<64x128xf32>,
    %c0_9 = arith.constant 0 : index
    %c0_10 = arith.constant 0 : index
    %11 = vector.load %arg5[%c0_9, %c0_10] : memref<32x128xf32, #tpu.memory_space<vmem>>, vector<32x128xf32>
    %c0_11 = arith.constant 0 : index
    %c0_12 = arith.constant 0 : index
    %12 = vector.load %arg12[%c0_11, %c0_12] : memref<8x32xf32, #tpu.memory_space<vmem>>, vector<8x32xf32>
    %c0_13 = arith.constant 0 : index
    %c0_14 = arith.constant 0 : index
    %13 = vector.load %arg13[%c0_13, %c0_14] : memref<8x32xf32, #tpu.memory_space<vmem>>, vector<8x32xf32>
    %c0_i32_15 = arith.constant 0 : i32
    %c8_i32 = arith.constant 8 : i32
    %14 = arith.muli %c0_i32_15, %c8_i32 : i32
    %15 = tpu.assume_multiple %14, 8 : i32
    %16 = arith.index_cast %15 : i32 to index
    %c0_16 = arith.constant 0 : index
    %17 = vector.load %arg11[%16, %c0_16] : memref<64x128xf32, #tpu.memory_space<vmem>>, vector<8x128xf32>
    %cst_17 = arith.constant dense<0.000000e+00> : vector<8x128xf32>
    %18 = tpu.matmul %12, %11, %cst_17 {dimension_numbers = #tpu.dot_dimension_numbers<[1], [0], [0], [1], [0, 0, 1, 1], [], []>} : vector<8x32xf32>, vector<32x128xf32>, vector<8x128xf32> -> vector<8x128xf32>
    %19 = arith.addf %17, %18 : vector<8x128xf32>
    %20 = vector.extract_strided_slice %19 {offsets = [0, 0], sizes = [8, 32], strides = [1, 1]} : vector<8x128xf32> to vector<8x32xf32>
    %21 = arith.negf %20 : vector<8x32xf32>
    %22 = math.exp %21 : vector<8x32xf32>
    %cst_18 = arith.constant 1.000000e+00 : f32
    %23 = vector.broadcast %cst_18 : f32 to vector<8x32xf32>
    %24 = arith.addf %23, %22 : vector<8x32xf32>
    %25 = arith.divf %23, %24 : vector<8x32xf32>
    %26 = vector.extract_strided_slice %19 {offsets = [0, 32], sizes = [8, 32], strides = [1, 1]} : vector<8x128xf32> to vector<8x32xf32>
    %27 = arith.negf %26 : vector<8x32xf32>
    %28 = math.exp %27 : vector<8x32xf32>
    %cst_19 = arith.constant 1.000000e+00 : f32
    %29 = vector.broadcast %cst_19 : f32 to vector<8x32xf32>
    %30 = arith.addf %29, %28 : vector<8x32xf32>
    %31 = arith.divf %29, %30 : vector<8x32xf32>
    %32 = vector.extract_strided_slice %19 {offsets = [0, 64], sizes = [8, 32], strides = [1, 1]} : vector<8x128xf32> to vector<8x32xf32>
    %33 = math.tanh %32 : vector<8x32xf32>
    %34 = vector.extract_strided_slice %19 {offsets = [0, 96], sizes = [8, 32], strides = [1, 1]} : vector<8x128xf32> to vector<8x32xf32>
    %35 = arith.negf %34 : vector<8x32xf32>
    %36 = math.exp %35 : vector<8x32xf32>
    %cst_20 = arith.constant 1.000000e+00 : f32
    %37 = vector.broadcast %cst_20 : f32 to vector<8x32xf32>
    %38 = arith.addf %37, %36 : vector<8x32xf32>
    %39 = arith.divf %37, %38 : vector<8x32xf32>
    %40 = arith.mulf %31, %13 : vector<8x32xf32>
    %41 = arith.mulf %25, %33 : vector<8x32xf32>
    %42 = arith.addf %40, %41 : vector<8x32xf32>
    %43 = math.tanh %42 : vector<8x32xf32>
    %44 = arith.mulf %39, %43 : vector<8x32xf32>
    %45 = arith.index_cast %c0_i32_15 : i32 to index
    %c0_21 = arith.constant 0 : index
    %c0_22 = arith.constant 0 : index
    %46 = vector.load %arg8[%45, %c0_21, %c0_22] : memref<8x8x32xf32, #tpu.memory_space<vmem>>, vector<1x8x32xf32>
    %47 = vector.shape_cast %46 : vector<1x8x32xf32> to vector<8x32xf32>
    %48 = vector.shape_cast %44 : vector<8x32xf32> to vector<1x8x32xf32>
    tpu.vector_store %arg8[%45, %c0_21, %c0_22], %48 {strides = array<i32>} : memref<8x8x32xf32, #tpu.memory_space<vmem>>, vector<1x8x32xf32>,
    %c1_i32 = arith.constant 1 : i32
    %c8_i32_23 = arith.constant 8 : i32
    %49 = arith.muli %c1_i32, %c8_i32_23 : i32
    %50 = tpu.assume_multiple %49, 8 : i32
    %51 = arith.index_cast %50 : i32 to index
    %c0_24 = arith.constant 0 : index
    %52 = vector.load %arg11[%51, %c0_24] : memref<64x128xf32, #tpu.memory_space<vmem>>, vector<8x128xf32>
    %cst_25 = arith.constant dense<0.000000e+00> : vector<8x128xf32>
    %53 = tpu.matmul %44, %11, %cst_25 {dimension_numbers = #tpu.dot_dimension_numbers<[1], [0], [0], [1], [0, 0, 1, 1], [], []>} : vector<8x32xf32>, vector<32x128xf32>, vector<8x128xf32> -> vector<8x128xf32>
    %54 = arith.addf %52, %53 : vector<8x128xf32>
    %55 = vector.extract_strided_slice %54 {offsets = [0, 0], sizes = [8, 32], strides = [1, 1]} : vector<8x128xf32> to vector<8x32xf32>
    %56 = arith.negf %55 : vector<8x32xf32>
    %57 = math.exp %56 : vector<8x32xf32>
    %cst_26 = arith.constant 1.000000e+00 : f32
    %58 = vector.broadcast %cst_26 : f32 to vector<8x32xf32>
    %59 = arith.addf %58, %57 : vector<8x32xf32>
    %60 = arith.divf %58, %59 : vector<8x32xf32>
    %61 = vector.extract_strided_slice %54 {offsets = [0, 32], sizes = [8, 32], strides = [1, 1]} : vector<8x128xf32> to vector<8x32xf32>
    %62 = arith.negf %61 : vector<8x32xf32>
    %63 = math.exp %62 : vector<8x32xf32>
    %cst_27 = arith.constant 1.000000e+00 : f32
    %64 = vector.broadcast %cst_27 : f32 to vector<8x32xf32>
    %65 = arith.addf %64, %63 : vector<8x32xf32>
    %66 = arith.divf %64, %65 : vector<8x32xf32>
    %67 = vector.extract_strided_slice %54 {offsets = [0, 64], sizes = [8, 32], strides = [1, 1]} : vector<8x128xf32> to vector<8x32xf32>
    %68 = math.tanh %67 : vector<8x32xf32>
    %69 = vector.extract_strided_slice %54 {offsets = [0, 96], sizes = [8, 32], strides = [1, 1]} : vector<8x128xf32> to vector<8x32xf32>
    %70 = arith.negf %69 : vector<8x32xf32>
    %71 = math.exp %70 : vector<8x32xf32>
    %cst_28 = arith.constant 1.000000e+00 : f32
    %72 = vector.broadcast %cst_28 : f32 to vector<8x32xf32>
    %73 = arith.addf %72, %71 : vector<8x32xf32>
    %74 = arith.divf %72, %73 : vector<8x32xf32>
    %75 = arith.mulf %66, %42 : vector<8x32xf32>
    %76 = arith.mulf %60, %68 : vector<8x32xf32>
    %77 = arith.addf %75, %76 : vector<8x32xf32>
    %78 = math.tanh %77 : vector<8x32xf32>
    %79 = arith.mulf %74, %78 : vector<8x32xf32>
    %80 = arith.index_cast %c1_i32 : i32 to index
    %c0_29 = arith.constant 0 : index
    %c0_30 = arith.constant 0 : index
    %81 = vector.load %arg8[%80, %c0_29, %c0_30] : memref<8x8x32xf32, #tpu.memory_space<vmem>>, vector<1x8x32xf32>
    %82 = vector.shape_cast %81 : vector<1x8x32xf32> to vector<8x32xf32>
    %83 = vector.shape_cast %79 : vector<8x32xf32> to vector<1x8x32xf32>
    tpu.vector_store %arg8[%80, %c0_29, %c0_30], %83 {strides = array<i32>} : memref<8x8x32xf32, #tpu.memory_space<vmem>>, vector<1x8x32xf32>,
    %c2_i32 = arith.constant 2 : i32
    %c8_i32_31 = arith.constant 8 : i32
    %84 = arith.muli %c2_i32, %c8_i32_31 : i32
    %85 = tpu.assume_multiple %84, 8 : i32
    %86 = arith.index_cast %85 : i32 to index
    %c0_32 = arith.constant 0 : index
    %87 = vector.load %arg11[%86, %c0_32] : memref<64x128xf32, #tpu.memory_space<vmem>>, vector<8x128xf32>
    %cst_33 = arith.constant dense<0.000000e+00> : vector<8x128xf32>
    %88 = tpu.matmul %79, %11, %cst_33 {dimension_numbers = #tpu.dot_dimension_numbers<[1], [0], [0], [1], [0, 0, 1, 1], [], []>} : vector<8x32xf32>, vector<32x128xf32>, vector<8x128xf32> -> vector<8x128xf32>
    %89 = arith.addf %87, %88 : vector<8x128xf32>
    %90 = vector.extract_strided_slice %89 {offsets = [0, 0], sizes = [8, 32], strides = [1, 1]} : vector<8x128xf32> to vector<8x32xf32>
    %91 = arith.negf %90 : vector<8x32xf32>
    %92 = math.exp %91 : vector<8x32xf32>
    %cst_34 = arith.constant 1.000000e+00 : f32
    %93 = vector.broadcast %cst_34 : f32 to vector<8x32xf32>
    %94 = arith.addf %93, %92 : vector<8x32xf32>
    %95 = arith.divf %93, %94 : vector<8x32xf32>
    %96 = vector.extract_strided_slice %89 {offsets = [0, 32], sizes = [8, 32], strides = [1, 1]} : vector<8x128xf32> to vector<8x32xf32>
    %97 = arith.negf %96 : vector<8x32xf32>
    %98 = math.exp %97 : vector<8x32xf32>
    %cst_35 = arith.constant 1.000000e+00 : f32
    %99 = vector.broadcast %cst_35 : f32 to vector<8x32xf32>
    %100 = arith.addf %99, %98 : vector<8x32xf32>
    %101 = arith.divf %99, %100 : vector<8x32xf32>
    %102 = vector.extract_strided_slice %89 {offsets = [0, 64], sizes = [8, 32], strides = [1, 1]} : vector<8x128xf32> to vector<8x32xf32>
    %103 = math.tanh %102 : vector<8x32xf32>
    %104 = vector.extract_strided_slice %89 {offsets = [0, 96], sizes = [8, 32], strides = [1, 1]} : vector<8x128xf32> to vector<8x32xf32>
    %105 = arith.negf %104 : vector<8x32xf32>
    %106 = math.exp %105 : vector<8x32xf32>
    %cst_36 = arith.constant 1.000000e+00 : f32
    %107 = vector.broadcast %cst_36 : f32 to vector<8x32xf32>
    %108 = arith.addf %107, %106 : vector<8x32xf32>
    %109 = arith.divf %107, %108 : vector<8x32xf32>
    %110 = arith.mulf %101, %77 : vector<8x32xf32>
    %111 = arith.mulf %95, %103 : vector<8x32xf32>
    %112 = arith.addf %110, %111 : vector<8x32xf32>
    %113 = math.tanh %112 : vector<8x32xf32>
    %114 = arith.mulf %109, %113 : vector<8x32xf32>
    %115 = arith.index_cast %c2_i32 : i32 to index
    %c0_37 = arith.constant 0 : index
    %c0_38 = arith.constant 0 : index
    %116 = vector.load %arg8[%115, %c0_37, %c0_38] : memref<8x8x32xf32, #tpu.memory_space<vmem>>, vector<1x8x32xf32>
    %117 = vector.shape_cast %116 : vector<1x8x32xf32> to vector<8x32xf32>
    %118 = vector.shape_cast %114 : vector<8x32xf32> to vector<1x8x32xf32>
    tpu.vector_store %arg8[%115, %c0_37, %c0_38], %118 {strides = array<i32>} : memref<8x8x32xf32, #tpu.memory_space<vmem>>, vector<1x8x32xf32>,
    %c3_i32 = arith.constant 3 : i32
    %c8_i32_39 = arith.constant 8 : i32
    %119 = arith.muli %c3_i32, %c8_i32_39 : i32
    %120 = tpu.assume_multiple %119, 8 : i32
    %121 = arith.index_cast %120 : i32 to index
    %c0_40 = arith.constant 0 : index
    %122 = vector.load %arg11[%121, %c0_40] : memref<64x128xf32, #tpu.memory_space<vmem>>, vector<8x128xf32>
    %cst_41 = arith.constant dense<0.000000e+00> : vector<8x128xf32>
    %123 = tpu.matmul %114, %11, %cst_41 {dimension_numbers = #tpu.dot_dimension_numbers<[1], [0], [0], [1], [0, 0, 1, 1], [], []>} : vector<8x32xf32>, vector<32x128xf32>, vector<8x128xf32> -> vector<8x128xf32>
    %124 = arith.addf %122, %123 : vector<8x128xf32>
    %125 = vector.extract_strided_slice %124 {offsets = [0, 0], sizes = [8, 32], strides = [1, 1]} : vector<8x128xf32> to vector<8x32xf32>
    %126 = arith.negf %125 : vector<8x32xf32>
    %127 = math.exp %126 : vector<8x32xf32>
    %cst_42 = arith.constant 1.000000e+00 : f32
    %128 = vector.broadcast %cst_42 : f32 to vector<8x32xf32>
    %129 = arith.addf %128, %127 : vector<8x32xf32>
    %130 = arith.divf %128, %129 : vector<8x32xf32>
    %131 = vector.extract_strided_slice %124 {offsets = [0, 32], sizes = [8, 32], strides = [1, 1]} : vector<8x128xf32> to vector<8x32xf32>
    %132 = arith.negf %131 : vector<8x32xf32>
    %133 = math.exp %132 : vector<8x32xf32>
    %cst_43 = arith.constant 1.000000e+00 : f32
    %134 = vector.broadcast %cst_43 : f32 to vector<8x32xf32>
    %135 = arith.addf %134, %133 : vector<8x32xf32>
    %136 = arith.divf %134, %135 : vector<8x32xf32>
    %137 = vector.extract_strided_slice %124 {offsets = [0, 64], sizes = [8, 32], strides = [1, 1]} : vector<8x128xf32> to vector<8x32xf32>
    %138 = math.tanh %137 : vector<8x32xf32>
    %139 = vector.extract_strided_slice %124 {offsets = [0, 96], sizes = [8, 32], strides = [1, 1]} : vector<8x128xf32> to vector<8x32xf32>
    %140 = arith.negf %139 : vector<8x32xf32>
    %141 = math.exp %140 : vector<8x32xf32>
    %cst_44 = arith.constant 1.000000e+00 : f32
    %142 = vector.broadcast %cst_44 : f32 to vector<8x32xf32>
    %143 = arith.addf %142, %141 : vector<8x32xf32>
    %144 = arith.divf %142, %143 : vector<8x32xf32>
    %145 = arith.mulf %136, %112 : vector<8x32xf32>
    %146 = arith.mulf %130, %138 : vector<8x32xf32>
    %147 = arith.addf %145, %146 : vector<8x32xf32>
    %148 = math.tanh %147 : vector<8x32xf32>
    %149 = arith.mulf %144, %148 : vector<8x32xf32>
    %150 = arith.index_cast %c3_i32 : i32 to index
    %c0_45 = arith.constant 0 : index
    %c0_46 = arith.constant 0 : index
    %151 = vector.load %arg8[%150, %c0_45, %c0_46] : memref<8x8x32xf32, #tpu.memory_space<vmem>>, vector<1x8x32xf32>
    %152 = vector.shape_cast %151 : vector<1x8x32xf32> to vector<8x32xf32>
    %153 = vector.shape_cast %149 : vector<8x32xf32> to vector<1x8x32xf32>
    tpu.vector_store %arg8[%150, %c0_45, %c0_46], %153 {strides = array<i32>} : memref<8x8x32xf32, #tpu.memory_space<vmem>>, vector<1x8x32xf32>,
    %c4_i32 = arith.constant 4 : i32
    %c8_i32_47 = arith.constant 8 : i32
    %154 = arith.muli %c4_i32, %c8_i32_47 : i32
    %155 = tpu.assume_multiple %154, 8 : i32
    %156 = arith.index_cast %155 : i32 to index
    %c0_48 = arith.constant 0 : index
    %157 = vector.load %arg11[%156, %c0_48] : memref<64x128xf32, #tpu.memory_space<vmem>>, vector<8x128xf32>
    %cst_49 = arith.constant dense<0.000000e+00> : vector<8x128xf32>
    %158 = tpu.matmul %149, %11, %cst_49 {dimension_numbers = #tpu.dot_dimension_numbers<[1], [0], [0], [1], [0, 0, 1, 1], [], []>} : vector<8x32xf32>, vector<32x128xf32>, vector<8x128xf32> -> vector<8x128xf32>
    %159 = arith.addf %157, %158 : vector<8x128xf32>
    %160 = vector.extract_strided_slice %159 {offsets = [0, 0], sizes = [8, 32], strides = [1, 1]} : vector<8x128xf32> to vector<8x32xf32>
    %161 = arith.negf %160 : vector<8x32xf32>
    %162 = math.exp %161 : vector<8x32xf32>
    %cst_50 = arith.constant 1.000000e+00 : f32
    %163 = vector.broadcast %cst_50 : f32 to vector<8x32xf32>
    %164 = arith.addf %163, %162 : vector<8x32xf32>
    %165 = arith.divf %163, %164 : vector<8x32xf32>
    %166 = vector.extract_strided_slice %159 {offsets = [0, 32], sizes = [8, 32], strides = [1, 1]} : vector<8x128xf32> to vector<8x32xf32>
    %167 = arith.negf %166 : vector<8x32xf32>
    %168 = math.exp %167 : vector<8x32xf32>
    %cst_51 = arith.constant 1.000000e+00 : f32
    %169 = vector.broadcast %cst_51 : f32 to vector<8x32xf32>
    %170 = arith.addf %169, %168 : vector<8x32xf32>
    %171 = arith.divf %169, %170 : vector<8x32xf32>
    %172 = vector.extract_strided_slice %159 {offsets = [0, 64], sizes = [8, 32], strides = [1, 1]} : vector<8x128xf32> to vector<8x32xf32>
    %173 = math.tanh %172 : vector<8x32xf32>
    %174 = vector.extract_strided_slice %159 {offsets = [0, 96], sizes = [8, 32], strides = [1, 1]} : vector<8x128xf32> to vector<8x32xf32>
    %175 = arith.negf %174 : vector<8x32xf32>
    %176 = math.exp %175 : vector<8x32xf32>
    %cst_52 = arith.constant 1.000000e+00 : f32
    %177 = vector.broadcast %cst_52 : f32 to vector<8x32xf32>
    %178 = arith.addf %177, %176 : vector<8x32xf32>
    %179 = arith.divf %177, %178 : vector<8x32xf32>
    %180 = arith.mulf %171, %147 : vector<8x32xf32>
    %181 = arith.mulf %165, %173 : vector<8x32xf32>
    %182 = arith.addf %180, %181 : vector<8x32xf32>
    %183 = math.tanh %182 : vector<8x32xf32>
    %184 = arith.mulf %179, %183 : vector<8x32xf32>
    %185 = arith.index_cast %c4_i32 : i32 to index
    %c0_53 = arith.constant 0 : index
    %c0_54 = arith.constant 0 : index
    %186 = vector.load %arg8[%185, %c0_53, %c0_54] : memref<8x8x32xf32, #tpu.memory_space<vmem>>, vector<1x8x32xf32>
    %187 = vector.shape_cast %186 : vector<1x8x32xf32> to vector<8x32xf32>
    %188 = vector.shape_cast %184 : vector<8x32xf32> to vector<1x8x32xf32>
    tpu.vector_store %arg8[%185, %c0_53, %c0_54], %188 {strides = array<i32>} : memref<8x8x32xf32, #tpu.memory_space<vmem>>, vector<1x8x32xf32>,
    %c5_i32 = arith.constant 5 : i32
    %c8_i32_55 = arith.constant 8 : i32
    %189 = arith.muli %c5_i32, %c8_i32_55 : i32
    %190 = tpu.assume_multiple %189, 8 : i32
    %191 = arith.index_cast %190 : i32 to index
    %c0_56 = arith.constant 0 : index
    %192 = vector.load %arg11[%191, %c0_56] : memref<64x128xf32, #tpu.memory_space<vmem>>, vector<8x128xf32>
    %cst_57 = arith.constant dense<0.000000e+00> : vector<8x128xf32>
    %193 = tpu.matmul %184, %11, %cst_57 {dimension_numbers = #tpu.dot_dimension_numbers<[1], [0], [0], [1], [0, 0, 1, 1], [], []>} : vector<8x32xf32>, vector<32x128xf32>, vector<8x128xf32> -> vector<8x128xf32>
    %194 = arith.addf %192, %193 : vector<8x128xf32>
    %195 = vector.extract_strided_slice %194 {offsets = [0, 0], sizes = [8, 32], strides = [1, 1]} : vector<8x128xf32> to vector<8x32xf32>
    %196 = arith.negf %195 : vector<8x32xf32>
    %197 = math.exp %196 : vector<8x32xf32>
    %cst_58 = arith.constant 1.000000e+00 : f32
    %198 = vector.broadcast %cst_58 : f32 to vector<8x32xf32>
    %199 = arith.addf %198, %197 : vector<8x32xf32>
    %200 = arith.divf %198, %199 : vector<8x32xf32>
    %201 = vector.extract_strided_slice %194 {offsets = [0, 32], sizes = [8, 32], strides = [1, 1]} : vector<8x128xf32> to vector<8x32xf32>
    %202 = arith.negf %201 : vector<8x32xf32>
    %203 = math.exp %202 : vector<8x32xf32>
    %cst_59 = arith.constant 1.000000e+00 : f32
    %204 = vector.broadcast %cst_59 : f32 to vector<8x32xf32>
    %205 = arith.addf %204, %203 : vector<8x32xf32>
    %206 = arith.divf %204, %205 : vector<8x32xf32>
    %207 = vector.extract_strided_slice %194 {offsets = [0, 64], sizes = [8, 32], strides = [1, 1]} : vector<8x128xf32> to vector<8x32xf32>
    %208 = math.tanh %207 : vector<8x32xf32>
    %209 = vector.extract_strided_slice %194 {offsets = [0, 96], sizes = [8, 32], strides = [1, 1]} : vector<8x128xf32> to vector<8x32xf32>
    %210 = arith.negf %209 : vector<8x32xf32>
    %211 = math.exp %210 : vector<8x32xf32>
    %cst_60 = arith.constant 1.000000e+00 : f32
    %212 = vector.broadcast %cst_60 : f32 to vector<8x32xf32>
    %213 = arith.addf %212, %211 : vector<8x32xf32>
    %214 = arith.divf %212, %213 : vector<8x32xf32>
    %215 = arith.mulf %206, %182 : vector<8x32xf32>
    %216 = arith.mulf %200, %208 : vector<8x32xf32>
    %217 = arith.addf %215, %216 : vector<8x32xf32>
    %218 = math.tanh %217 : vector<8x32xf32>
    %219 = arith.mulf %214, %218 : vector<8x32xf32>
    %220 = arith.index_cast %c5_i32 : i32 to index
    %c0_61 = arith.constant 0 : index
    %c0_62 = arith.constant 0 : index
    %221 = vector.load %arg8[%220, %c0_61, %c0_62] : memref<8x8x32xf32, #tpu.memory_space<vmem>>, vector<1x8x32xf32>
    %222 = vector.shape_cast %221 : vector<1x8x32xf32> to vector<8x32xf32>
    %223 = vector.shape_cast %219 : vector<8x32xf32> to vector<1x8x32xf32>
    tpu.vector_store %arg8[%220, %c0_61, %c0_62], %223 {strides = array<i32>} : memref<8x8x32xf32, #tpu.memory_space<vmem>>, vector<1x8x32xf32>,
    %c6_i32 = arith.constant 6 : i32
    %c8_i32_63 = arith.constant 8 : i32
    %224 = arith.muli %c6_i32, %c8_i32_63 : i32
    %225 = tpu.assume_multiple %224, 8 : i32
    %226 = arith.index_cast %225 : i32 to index
    %c0_64 = arith.constant 0 : index
    %227 = vector.load %arg11[%226, %c0_64] : memref<64x128xf32, #tpu.memory_space<vmem>>, vector<8x128xf32>
    %cst_65 = arith.constant dense<0.000000e+00> : vector<8x128xf32>
    %228 = tpu.matmul %219, %11, %cst_65 {dimension_numbers = #tpu.dot_dimension_numbers<[1], [0], [0], [1], [0, 0, 1, 1], [], []>} : vector<8x32xf32>, vector<32x128xf32>, vector<8x128xf32> -> vector<8x128xf32>
    %229 = arith.addf %227, %228 : vector<8x128xf32>
    %230 = vector.extract_strided_slice %229 {offsets = [0, 0], sizes = [8, 32], strides = [1, 1]} : vector<8x128xf32> to vector<8x32xf32>
    %231 = arith.negf %230 : vector<8x32xf32>
    %232 = math.exp %231 : vector<8x32xf32>
    %cst_66 = arith.constant 1.000000e+00 : f32
    %233 = vector.broadcast %cst_66 : f32 to vector<8x32xf32>
    %234 = arith.addf %233, %232 : vector<8x32xf32>
    %235 = arith.divf %233, %234 : vector<8x32xf32>
    %236 = vector.extract_strided_slice %229 {offsets = [0, 32], sizes = [8, 32], strides = [1, 1]} : vector<8x128xf32> to vector<8x32xf32>
    %237 = arith.negf %236 : vector<8x32xf32>
    %238 = math.exp %237 : vector<8x32xf32>
    %cst_67 = arith.constant 1.000000e+00 : f32
    %239 = vector.broadcast %cst_67 : f32 to vector<8x32xf32>
    %240 = arith.addf %239, %238 : vector<8x32xf32>
    %241 = arith.divf %239, %240 : vector<8x32xf32>
    %242 = vector.extract_strided_slice %229 {offsets = [0, 64], sizes = [8, 32], strides = [1, 1]} : vector<8x128xf32> to vector<8x32xf32>
    %243 = math.tanh %242 : vector<8x32xf32>
    %244 = vector.extract_strided_slice %229 {offsets = [0, 96], sizes = [8, 32], strides = [1, 1]} : vector<8x128xf32> to vector<8x32xf32>
    %245 = arith.negf %244 : vector<8x32xf32>
    %246 = math.exp %245 : vector<8x32xf32>
    %cst_68 = arith.constant 1.000000e+00 : f32
    %247 = vector.broadcast %cst_68 : f32 to vector<8x32xf32>
    %248 = arith.addf %247, %246 : vector<8x32xf32>
    %249 = arith.divf %247, %248 : vector<8x32xf32>
    %250 = arith.mulf %241, %217 : vector<8x32xf32>
    %251 = arith.mulf %235, %243 : vector<8x32xf32>
    %252 = arith.addf %250, %251 : vector<8x32xf32>
    %253 = math.tanh %252 : vector<8x32xf32>
    %254 = arith.mulf %249, %253 : vector<8x32xf32>
    %255 = arith.index_cast %c6_i32 : i32 to index
    %c0_69 = arith.constant 0 : index
    %c0_70 = arith.constant 0 : index
    %256 = vector.load %arg8[%255, %c0_69, %c0_70] : memref<8x8x32xf32, #tpu.memory_space<vmem>>, vector<1x8x32xf32>
    %257 = vector.shape_cast %256 : vector<1x8x32xf32> to vector<8x32xf32>
    %258 = vector.shape_cast %254 : vector<8x32xf32> to vector<1x8x32xf32>
    tpu.vector_store %arg8[%255, %c0_69, %c0_70], %258 {strides = array<i32>} : memref<8x8x32xf32, #tpu.memory_space<vmem>>, vector<1x8x32xf32>,
    %c7_i32 = arith.constant 7 : i32
    %c8_i32_71 = arith.constant 8 : i32
    %259 = arith.muli %c7_i32, %c8_i32_71 : i32
    %260 = tpu.assume_multiple %259, 8 : i32
    %261 = arith.index_cast %260 : i32 to index
    %c0_72 = arith.constant 0 : index
    %262 = vector.load %arg11[%261, %c0_72] : memref<64x128xf32, #tpu.memory_space<vmem>>, vector<8x128xf32>
    %cst_73 = arith.constant dense<0.000000e+00> : vector<8x128xf32>
    %263 = tpu.matmul %254, %11, %cst_73 {dimension_numbers = #tpu.dot_dimension_numbers<[1], [0], [0], [1], [0, 0, 1, 1], [], []>} : vector<8x32xf32>, vector<32x128xf32>, vector<8x128xf32> -> vector<8x128xf32>
    %264 = arith.addf %262, %263 : vector<8x128xf32>
    %265 = vector.extract_strided_slice %264 {offsets = [0, 0], sizes = [8, 32], strides = [1, 1]} : vector<8x128xf32> to vector<8x32xf32>
    %266 = arith.negf %265 : vector<8x32xf32>
    %267 = math.exp %266 : vector<8x32xf32>
    %cst_74 = arith.constant 1.000000e+00 : f32
    %268 = vector.broadcast %cst_74 : f32 to vector<8x32xf32>
    %269 = arith.addf %268, %267 : vector<8x32xf32>
    %270 = arith.divf %268, %269 : vector<8x32xf32>
    %271 = vector.extract_strided_slice %264 {offsets = [0, 32], sizes = [8, 32], strides = [1, 1]} : vector<8x128xf32> to vector<8x32xf32>
    %272 = arith.negf %271 : vector<8x32xf32>
    %273 = math.exp %272 : vector<8x32xf32>
    %cst_75 = arith.constant 1.000000e+00 : f32
    %274 = vector.broadcast %cst_75 : f32 to vector<8x32xf32>
    %275 = arith.addf %274, %273 : vector<8x32xf32>
    %276 = arith.divf %274, %275 : vector<8x32xf32>
    %277 = vector.extract_strided_slice %264 {offsets = [0, 64], sizes = [8, 32], strides = [1, 1]} : vector<8x128xf32> to vector<8x32xf32>
    %278 = math.tanh %277 : vector<8x32xf32>
    %279 = vector.extract_strided_slice %264 {offsets = [0, 96], sizes = [8, 32], strides = [1, 1]} : vector<8x128xf32> to vector<8x32xf32>
    %280 = arith.negf %279 : vector<8x32xf32>
    %281 = math.exp %280 : vector<8x32xf32>
    %cst_76 = arith.constant 1.000000e+00 : f32
    %282 = vector.broadcast %cst_76 : f32 to vector<8x32xf32>
    %283 = arith.addf %282, %281 : vector<8x32xf32>
    %284 = arith.divf %282, %283 : vector<8x32xf32>
    %285 = arith.mulf %276, %252 : vector<8x32xf32>
    %286 = arith.mulf %270, %278 : vector<8x32xf32>
    %287 = arith.addf %285, %286 : vector<8x32xf32>
    %288 = math.tanh %287 : vector<8x32xf32>
    %289 = arith.mulf %284, %288 : vector<8x32xf32>
    %290 = arith.index_cast %c7_i32 : i32 to index
    %c0_77 = arith.constant 0 : index
    %c0_78 = arith.constant 0 : index
    %291 = vector.load %arg8[%290, %c0_77, %c0_78] : memref<8x8x32xf32, #tpu.memory_space<vmem>>, vector<1x8x32xf32>
    %292 = vector.shape_cast %291 : vector<1x8x32xf32> to vector<8x32xf32>
    %293 = vector.shape_cast %289 : vector<8x32xf32> to vector<1x8x32xf32>
    tpu.vector_store %arg8[%290, %c0_77, %c0_78], %293 {strides = array<i32>} : memref<8x8x32xf32, #tpu.memory_space<vmem>>, vector<1x8x32xf32>,
    %c8_i32_79 = arith.constant 8 : i32
    %c0_80 = arith.constant 0 : index
    %c0_81 = arith.constant 0 : index
    %294 = vector.load %arg12[%c0_80, %c0_81] : memref<8x32xf32, #tpu.memory_space<vmem>>, vector<8x32xf32>
    tpu.vector_store %arg12[%c0_80, %c0_81], %289 {strides = array<i32>} : memref<8x32xf32, #tpu.memory_space<vmem>>, vector<8x32xf32>,
    %c0_82 = arith.constant 0 : index
    %c0_83 = arith.constant 0 : index
    %295 = vector.load %arg13[%c0_82, %c0_83] : memref<8x32xf32, #tpu.memory_space<vmem>>, vector<8x32xf32>
    tpu.vector_store %arg13[%c0_82, %c0_83], %287 {strides = array<i32>} : memref<8x32xf32, #tpu.memory_space<vmem>>, vector<8x32xf32>,
    %c1_i32_84 = arith.constant 1 : i32
    %296 = arith.cmpi eq, %arg1, %c1_i32_84 : i32
    %297 = arith.extui %296 : i1 to i32
    %c0_i32_85 = arith.constant 0 : i32
    %298 = arith.cmpi ne, %297, %c0_i32_85 : i32
    scf.if %298 {
      %c0_86 = arith.constant 0 : index
      %c0_87 = arith.constant 0 : index
      %299 = vector.load %arg9[%c0_86, %c0_87] : memref<8x32xf32, #tpu.memory_space<vmem>>, vector<8x32xf32>
      tpu.vector_store %arg9[%c0_86, %c0_87], %289 {strides = array<i32>} : memref<8x32xf32, #tpu.memory_space<vmem>>, vector<8x32xf32>,
      %c0_88 = arith.constant 0 : index
      %c0_89 = arith.constant 0 : index
      %300 = vector.load %arg10[%c0_88, %c0_89] : memref<8x32xf32, #tpu.memory_space<vmem>>, vector<8x32xf32>
      tpu.vector_store %arg10[%c0_88, %c0_89], %287 {strides = array<i32>} : memref<8x32xf32, #tpu.memory_space<vmem>>, vector<8x32xf32>,
    } else {
    }
    return
  }
  func.func @transform_0(%arg0: i32, %arg1: i32) -> (i32, i32, i32) {
    %c0_i32 = arith.constant 0 : i32
    %c0_i32_0 = arith.constant 0 : i32
    return %arg1, %arg0, %c0_i32 : i32, i32, i32
  }
  func.func @transform_1(%arg0: i32, %arg1: i32) -> (i32, i32) {
    %c0_i32 = arith.constant 0 : i32
    %c0_i32_0 = arith.constant 0 : i32
    %c0_i32_1 = arith.constant 0 : i32
    return %c0_i32, %c0_i32_0 : i32, i32
  }
  func.func @transform_2(%arg0: i32, %arg1: i32) -> (i32, i32) {
    %c0_i32 = arith.constant 0 : i32
    %c0_i32_0 = arith.constant 0 : i32
    %c0_i32_1 = arith.constant 0 : i32
    return %c0_i32, %c0_i32_0 : i32, i32
  }
  func.func @transform_3(%arg0: i32, %arg1: i32) -> (i32, i32) {
    %c0_i32 = arith.constant 0 : i32
    %c0_i32_0 = arith.constant 0 : i32
    %c0_i32_1 = arith.constant 0 : i32
    return %c0_i32, %c0_i32_0 : i32, i32
  }
  func.func @transform_4(%arg0: i32, %arg1: i32) -> (i32, i32) {
    %c0_i32 = arith.constant 0 : i32
    %c0_i32_0 = arith.constant 0 : i32
    return %arg0, %c0_i32 : i32, i32
  }
  func.func @transform_5(%arg0: i32, %arg1: i32) -> (i32, i32) {
    %c0_i32 = arith.constant 0 : i32
    %c0_i32_0 = arith.constant 0 : i32
    return %arg0, %c0_i32 : i32, i32
  }
  func.func @transform_6(%arg0: i32, %arg1: i32) -> (i32, i32, i32) {
    %c0_i32 = arith.constant 0 : i32
    %c0_i32_0 = arith.constant 0 : i32
    return %arg1, %arg0, %c0_i32 : i32, i32, i32
  }
  func.func @transform_7(%arg0: i32, %arg1: i32) -> (i32, i32) {
    %c0_i32 = arith.constant 0 : i32
    %c0_i32_0 = arith.constant 0 : i32
    return %arg0, %c0_i32 : i32, i32
  }
  func.func @transform_8(%arg0: i32, %arg1: i32) -> (i32, i32) {
    %c0_i32 = arith.constant 0 : i32
    %c0_i32_0 = arith.constant 0 : i32
    return %arg0, %c0_i32 : i32, i32
  }
}

</mosaic_0001>

<bundles_post_ra>
// kernel: tpu_custom_call.1
= control target key start
LH: loop header
LB: loop body
LE: loop exit
PB: predicated region body
PF: predicated region fallthrough
CT: control target
= control target key end

     0   :  { %s2245_s0 = inlined_call_operand.hbm [shape: f32[16,8,16], index: 0, kind: input, shape index: {}]   ;;  %s2246_s1 = inlined_call_operand.hbm [shape: f32[16,128], index: 1, kind: input, shape index: {}]   ;;  %s2247_s2 = inlined_call_operand.vmem [shape: f32[1,128], index: 2, kind: input, shape index: {}]   ;;  %s2248_s3 = inlined_call_operand.hbm [shape: f32[32,128], index: 3, kind: input, shape index: {}]   ;;  %s2249_s4 = inlined_call_operand.hbm [shape: f32[8,32], index: 4, kind: input, shape index: {}]   ;;  %s2250_s5 = inlined_call_operand.hbm [shape: f32[8,32], index: 5, kind: input, shape index: {}]   ;;  %s2251_s6 = inlined_call_operand.hbm [shape: f32[16,8,32], index: 6, kind: output, shape index: {0}]   ;;  %s2252_s7 = inlined_call_operand.hbm [shape: f32[8,32], index: 7, kind: output, shape index: {1}]   ;;  %s2253_s8 = inlined_call_operand.hbm [shape: f32[8,32], index: 8, kind: output, shape index: {2}]  }
   0x1   :  { %2260 = sst [smem:[#allocation25_spill]] %s2246_s1 }
   0x2   :  { %2261 = sst [smem:[#allocation26_spill]] %s2248_s3 }
   0x3   :  { %2262 = sst [smem:[#allocation27_spill]] %s2249_s4 }
   0x4   :  { %2263 = sst [smem:[#allocation28_spill]] %s2250_s5 }
   0x5   :  { %14 = vsyncpa [#allocation6], 0 }
   0x6   :  { %16 = vsyncpa [#allocation6 + $0x1], 0 }
   0x7   :  { %17 = vsyncpa [#allocation9], 0 }
   0x8   :  { %18 = vsyncpa [#allocation12], 0 }
   0x9   :  { %19 = vsyncpa [#allocation7], 0 }
   0xa   :  { %21 = vsyncpa [#allocation7 + $0x1], 0 }
   0xb   :  { %22 = vsyncpa [#allocation16], 0  ;;  %s1902_s27 = smov 0   ;;  %s1904_s28 = smov 0  }
   0xc   :  { %s1906_s29 = smov 0   ;;  %s1908_s30 = smov 0  }
   0xd   :  { %s1910_s9 = smov 0   ;;  %s1912_s10 = smov 0  }
   0xe LB: > { %s2254_s11 = sadd.s32 4294967295, %s1842_s10   ;;  %s1290_s12 = sadd.s32 4294967294, %s1842_s10   ;;  %s1842_s10 = sphi %s1912_s10, %s28_s10   ;;  %s1838_s9 = sphi %s1910_s9, %s2286_s9   ;;  %s1834_s30 = sphi %s1908_s30, %s2285_s30   ;;  %s1830_s29 = sphi %s1906_s29, %s2284_s29   ;;  %s1826_s28 = sphi %s1904_s28, %s2283_s28   ;;  %s1822_s27 = sphi %s1902_s27, %s2282_s27  }
   0xf   : > { %p62_p0 = scmp.ne.s32.totalorder %s1826_s28, %s1822_s27  ;;  %p1938_p1 = scmp.eq.s32.totalorder %s2254_s11, 0 }
  0x10   : > { %p209_p2 = scmp.eq.s32.totalorder %s1290_s12, 1  ;;  %p1291_p4 = scmp.ge.s32.totalorder %s1842_s10, 1 }
  0x11   : > { %p1944_p3 = por %p1938_p1, %p62_p0  ;;  %p268_p6 = scmp.lt.s32.totalorder %s1842_s10, 3 }
  0x12   : > { %p1949_p5 = por %p209_p2, %p62_p0  ;;  %s2268_s1 = sld [smem:[#allocation25_spill]] }
  0x13   : > { %p1957_p7 = pnand %p1291_p4, %p268_p6  ;;  %s1844_s20 = smov [#allocation8]  }
  0x14   : > { %s2266_s15 = scalar_select %p1949_p5, 1, 0 }
  0x15   : > { %p1381_p8 = pneg %p1957_p7  ;;  %s281_s21 = sshll.u32 %s1844_s20, 4  ;;  %s282_s21 = int_to_ptr.vmem [resolvable:$true] %s281_s21 }
  0x16   : > { %2267 = sst [smem:[#allocation23_spill]] %s2266_s15  ;;  %p1296_p10 = scmp.ge.s32.totalorder %s1842_s10, 2 }
  0x17   : > { %p1965_p9 = pnand %p1381_p8, %p1938_p1  ;;  %s2271_s4 = sld [smem:[#allocation27_spill]] }
  0x18   : > { %s279_s18 = sshll.u32 %s2268_s1, 4  ;;  %s2255_s26 = smov 128   ;;  %s280_s18 = int_to_ptr.hbm [resolvable:$true] %s279_s18 }
  0x19   : > { %s2257_s12 = smov 8   ;;  %s1847_s16 = smov [#allocation11]  }
  0x1a   : > { %1384 = dma.hbm_to_vmem [thread:$0]  (!%p1965_p9), %s280_s18, 256, %s282_s21, [#allocation9], %s2255_s26, %s2255_s26, %s2257_s12  }
  0x1b   : > { %s315_s17 = sshll.u32 %s1847_s16, 4  ;;  %s2272_s3 = sld [smem:[#allocation26_spill]]  ;;  %s316_s17 = int_to_ptr.vmem [resolvable:$true] %s315_s17 }
  0x1c   : > { %s2273_s5 = sld [smem:[#allocation28_spill]]  ;;  %s1848_s21 = smov [#allocation10]  }
  0x1d   : > { %s313_s25 = sshll.u32 %s2271_s4, 4  ;;  %s298_s26 = sshll.u32 %s1848_s21, 4  ;;  %s314_s25 = int_to_ptr.hbm [resolvable:$true] %s313_s25  ;;  %s299_s26 = int_to_ptr.vmem [resolvable:$true] %s298_s26 }
  0x1e   : > { %1390 = dma.hbm_to_vmem [thread:$0]  (!%p1965_p9), %s314_s25, 128, %s316_s17, [#allocation12]  }
  0x1f   : > { %s2274_s11 = smov 128   ;;  %s1849_s16 = smov [#allocation13]  }
  0x20   : > { %s329_s20 = sshll.u32 %s1849_s16, 4  ;;  %s2275_s25 = sadd.s32 4294967295, %s1842_s10   ;;  %s330_s20 = int_to_ptr.vmem [resolvable:$true] %s329_s20 }
  0x21   : > { %s296_s1 = sshll.u32 %s2272_s3, 4  ;;  %p1995_p11 = scmp.eq.s32.totalorder %s2275_s25, 1  ;;  %s297_s1 = int_to_ptr.hbm [resolvable:$true] %s296_s1 }
  0x22   : > { %s327_s18 = sshll.u32 %s2273_s5, 4  ;;  %s37_s23 = sadd.s32 1, %s1838_s9  ;;  %s328_s18 = int_to_ptr.hbm [resolvable:$true] %s327_s18 }
  0x23   : > { %1387 = dma.hbm_to_vmem [thread:$0]  (!%p1965_p9), %s297_s1, 512, %s299_s26, [#allocation9], %s2274_s11, %s2274_s11, %s2257_s12  }
  0x24   : > { %1393 = dma.hbm_to_vmem [thread:$0]  (!%p1965_p9), %s328_s18, 128, %s330_s20, [#allocation12]  }
  0x25   : > { %p38_p12 = scmp.ge.s32.totalorder %s37_s23, 2  ;;  %s49_s24 = sadd.s32 1, %s1830_s29 }
  0x26   : > { %p56_p13 = scmp.ne.s32.totalorder %s1830_s29, %s1826_s28  ;;  %p57_p0 = scmp.eq.s32.totalorder %s1842_s10, 0 }
  0x27   : > { %s2288_s23 = smov (%p38_p12, %s37_s23), 0  ;;  %p1406_p4 = scmp.lt.s32.totalorder %s1842_s10, 2 }
  0x28   : > { %2277 = sst [smem:[#allocation24_spill]] %s2288_s23  ;;  %p2008_p2 = por %p1995_p11, %p56_p13 }
  0x29   : > { %s44_s22 = ssub.s32 %s1838_s9, %s2288_s23  ;;  %s340_s26 = sand.u32 1, %s1830_s29  }
  0x2a   : > { %p47_p6 = scmp.eq.s32.totalorder %s44_s22, 0  ;;  %p58_p8 = por %p57_p0, %p56_p13 }
  0x2b   : > { %s1297_s18 = sshll.u32 %s340_s26, 6  ;;  %s1349_s21 = sshll.u32 %s1838_s9, 6 }
  0x2c   : > { %s2018_s16 = scalar_select %p47_p6, %s1830_s29, %s49_s24  }
  0x2d   : > { %s350_s12 = scalar_lea.hbm %s2245_s0, %s1349_s21  ;;  %s344_s4 = scalar_lea.vmem [#allocation5], %s1297_s18 }
  0x2e   : > { %s351_s3 = sshll.u32 %s350_s12, 4  ;;  %s353_s5 = sshll.u32 %s344_s4, 4  ;;  %s352_s3 = int_to_ptr.hbm [resolvable:$true] %s351_s3  ;;  %s354_s5 = int_to_ptr.vmem [resolvable:$true] %s353_s5 }
  0x2f   : > { %p1395_p9 = pnand %p1406_p4, %p58_p8  ;;  %s341_s15 = scalar_lea.sflag [#allocation6], %s340_s26 }
  0x30   : > { %s2279_s23 = smov 8   ;;  %365 = sbr.rel (%p1957_p7) target bundleno = 4733 (0x127d), region = 44 }
  0x31   : > { %1397 = dma.hbm_to_vmem [thread:$0]  (!%p1395_p9), %s352_s3, 1024, %s354_s5, %s341_s15, %s2274_s11, %s2274_s11, %s2279_s23  }
  0x32   : > { %s2031_s24 = sand.u32 (!%p1957_p7), 1, %s1826_s28  }
  0x33   : > { %s1301_s12 = sshll.u32 (!%p1957_p7), %s2031_s24, 6  ;;  %s368_s4 = scalar_lea.sflag (!%p1957_p7), [#allocation6], %s2031_s24 }
  0x34   : > { %s2035_s22 = scalar_lea.vmem (!%p1957_p7), [#allocation5], %s1301_s12 }
  0x35   : > { %1801 = dma.done.wait (%p1944_p3), %s368_s4, 1024  }
  0x36   : > { %1803 = vsyncadd (%p1944_p3), %s368_s4, 4294966272 }
  0x37   : > { %1805 = dma.done.wait (%p1938_p1), [#allocation9], 768  }
  0x38   : > { %1807 = vsyncadd (%p1938_p1), [#allocation9], 4294966528 }
  0x39   : > { %1809 = dma.done.wait (%p1938_p1), [#allocation12], 256  }
  0x3a   : > { %1811 = vsyncadd (%p1938_p1), [#allocation12], 4294967040  ;;  %s2049_s3 = scalar_lea.vmem [#allocation14], %s1301_s12  ;;  %p1307_p7 = scmp.ne.s32.totalorder %s1834_s30, 0 }
  0x3c   : > { %430 = sbr.rel (%p1307_p7) target bundleno = 68 (0x44), region = 68 }
  0x41   : > { %v431_v0 = vld [vmem:[#allocation11] sm:$0xff]  ;;  %vm432_vm0 = vcmask 261120   ;;  %v434_v1 = vld [vmem:[#allocation13] sm:$0xff] }
  0x42   : > { %433 = vst.msk [vmem:[#allocation3] sm:$0xff] %vm432_vm0, %v431_v0 }
  0x43   : > { %435 = vst.msk [vmem:[#allocation4] sm:$0xff] %vm432_vm0, %v434_v1 }
  0x44 PF: > { %v2052_v2 = vld [vmem:[#allocation10 + $0x18] sm:$0xff]  ;;  %v2054_v4 = vld [vmem:[#allocation10 + $0x10] sm:$0xff]  ;;  %vm450_vm1 = vcmask 130048   ;;  %v2058_v7 = vld [vmem:[#allocation10 + $0x8] sm:$0xff]  ;;  %vm531_vm2 = vcmask 261120   ;;  %s1850_s14 = smov 64  }
  0x45   : > { %v445_v3 = vld [vmem:[#allocation8 + $0x8] sm:$0xff]  ;;  %547 = vmatpush.msra.mxu1 %v2052_v2  ;;  %v444_v5 = vld [vmem:[#allocation8] sm:$0xff]  ;;  %618 = vmatpush.msra.mxu2 %v2052_v2  ;;  %v2063_v8 = vld [vmem:[#allocation10] sm:$0xff]  ;;  %s1851_s15 = smov 32   ;;  %s1852_s19 = smov 96  }
  0x46   : > { %489 = vmatpush.msra.mxu0 %v445_v3  ;;  %v436_v6 = vld [vmem:[%s2035_s22] sm:$0xff]  ;;  %1351 = vmatpush.msra.mxu3 %v445_v3  ;;  %v2090_v10 = vld [vmem:[%s2247_s2] ss:$0 sm:$0xff]  ;;  %v437_v39 = vld [vmem:[%s2035_s22 + $0x8] sm:$0xff]  ;;  %p1339_p1 = scmp.ne.s32.totalorder %s1834_s30, 1 }
  0x47   : > { %548 = vmatpush.msra.mxu1 %v2054_v4  ;;  %619 = vmatpush.msra.mxu2 %v2054_v4  ;;  %v441_v1 = vld [vmem:[%s2035_s22 + $0x28] sm:$0xff]  ;;  %v442_v3 = vld [vmem:[%s2035_s22 + $0x30] sm:$0xff] }
  0x48   : > { %490 = vmatpush.msra.mxu0 %v444_v5  ;;  %1352 = vmatpush.msra.mxu3 %v444_v5  ;;  %v443_v5 = vld [vmem:[%s2035_s22 + $0x38] sm:$0xff] }
  0x49   : > { %1308 = vmatmul.msk.f32.vlgmr.msra.gmra.mxu0 %vm450_vm1, %v436_v6  ;;  %549 = vmatpush.msra.mxu1 %v2058_v7  ;;  %v528_v9 = vld [vmem:[#allocation3] sm:$0xff] }
  0x4a   : > { %620 = vmatpush.msra.mxu2 %v2058_v7  ;;  %686 = vmatpush.msrb.mxu3 %v2052_v2  ;;  %v529_v16 = vld [vmem:[#allocation4] sm:$0xff] }
  0x4b   : > { %550 = vmatpush.msra.mxu1 %v2063_v8  ;;  %1313 = vmatmul.msk.f32.vlgmr.msra.gmra.mxu3 %vm450_vm1, %v441_v1 }
  0x4c   : > { %1316 = vmatmul.msk.f32.vlgmr.msra.gmra.mxu1 %vm531_vm2, %v528_v9  ;;  %621 = vmatpush.msra.mxu2 %v2063_v8 }
  0x4d   : > { %687 = vmatpush.msrb.mxu3 %v2054_v4  ;;  %754 = vmatpush.msrb.mxu1 %v2052_v2 }
  0x4e   : > { %822 = vmatpush.msrb.mxu2 %v2052_v2 }
  0x4f   : > { %688 = vmatpush.msrb.mxu3 %v2058_v7  ;;  %755 = vmatpush.msrb.mxu1 %v2054_v4 }
  0x50   : > { %823 = vmatpush.msrb.mxu2 %v2054_v4 }
  0x51   : > { %689 = vmatpush.msrb.mxu3 %v2063_v8  ;;  %756 = vmatpush.msrb.mxu1 %v2058_v7 }
  0x52   : > { %824 = vmatpush.msrb.mxu2 %v2058_v7  ;;  %1309 = vmatmul.msk.f32.gmra.mxu0 %vm450_vm1, %v437_v39 }
  0x53   : > { %757 = vmatpush.msrb.mxu1 %v2063_v8  ;;  %890 = vmatpush.msra.mxu3 %v2052_v2 }
  0x54   : > { %825 = vmatpush.msrb.mxu2 %v2063_v8  ;;  %1314 = vmatmul.msk.f32.gmra.mxu3 %vm450_vm1, %v442_v3  ;;  %v440_v3 = vld [vmem:[%s2035_s22 + $0x20] sm:$0xff] }
  0x55   : > { %958 = vmatpush.msra.mxu1 %v2052_v2  ;;  %891 = vmatpush.msra.mxu3 %v2054_v4 }
  0x57   : > { %959 = vmatpush.msra.mxu1 %v2054_v4  ;;  %892 = vmatpush.msra.mxu3 %v2058_v7 }
  0x59   : > { %960 = vmatpush.msra.mxu1 %v2058_v7  ;;  %893 = vmatpush.msra.mxu3 %v2063_v8 }
  0x5b   : > { %961 = vmatpush.msra.mxu1 %v2063_v8 }
  0x5c   : > { %1315 = vmatmul.msk.f32.gmra.mxu3 %vm450_vm1, %v443_v5 }
  0xc6   : > { %v492_v11 = vpop.f32.mrf.mxu0 }
  0xc7   : > { %v493_v12 = vadd.f32 %v2090_v10, %v492_v11  ;;  %v438_v11 = vld [vmem:[%s2035_s22 + $0x10] sm:$0xff] }
  0xc8   : > { %1310 = vmatmul.msk.f32.gmra.mxu0 %vm450_vm1, %v438_v11 }
  0xc9   : > { %v552_v13 = vpop.f32.mrf.mxu1 }
  0xca   : > { %v555_v14 = vadd.f32 %v552_v13, %v493_v12 }
  0xcc   : > { %1478 = vtanh.f32 %v555_v14  ;;  %v1317_v17 = vmul.f32 -1.442695, %v555_v14 }
  0xce   : > { %1480 = vpow2.f32 %v1317_v17 }
  0xcf   : > { %v495_v41 = vpop.f32.mrf.mxu0 }
  0xd0   : > { %v496_v42 = vadd.f32 %v2090_v10, %v495_v41 }
  0xd2   : > { %v1479_v15 = vpop.eup %1478 }
  0xd3   : > { %582 = vrot.lane.b32.xlu0 %v1479_v15, %s1850_s14 }
  0xd4   : > { %v1481_v18 = vpop.eup %1480 }
  0xd5   : > { %v559_v19 = vadd.f32 1.0, %v1481_v18 }
  0xd7   : > { %1482 = vrcp.f32 %v559_v19  ;;  %v571_v25 = vand.u32 2147483648, %v559_v19  ;;  %vm565_vm4 = vweird.f32 %v559_v19  ;;  %v569_v26 = vand.u32 2147483647, %v559_v19 }
  0xd9   : > { %v572_v28 = vor.u32 1.1754944e-38, %v571_v25  ;;  %vm570_vm6 = vcmp.eq.f32.partialorder %v569_v26, 8.507059e+37 }
  0xdb   : > { %577 = vrot.lane.b32.xlu0 %v529_v16, %s1851_s15 }
  0xdd   : > { %v1483_v20 = vpop.eup %1482 }
  0xde   : > { %v561_v21 = vmul.f32 %v1483_v20, %v559_v19  ;;  %vm566_vm3 = vweird.f32 %v1483_v20 }
  0xdf   : > { %vm567_vm5 = vmor %vm565_vm4, %vm566_vm3 }
  0xe0   : > { %v562_v22 = vsub.f32 1.0, %v561_v21 }
  0xe2   : > { %v563_v23 = vmul.f32 %v1483_v20, %v562_v22 }
  0xe4   : > { %v564_v24 = vadd.f32 %v1483_v20, %v563_v23 }
  0xe6   : > { %v568_v27 = vsel %vm567_vm5, %v1483_v20, %v564_v24 }
  0xe7   : > { %v573_v30 = vsel %vm570_vm6, %v572_v28, %v568_v27 }
 0x145   : > { %v583_v29 = vpop.permute.xlu0 %582  ;;  %v498_v12 = vpop.f32.mrf.mxu0 }
 0x146   : > { %v585_v31 = vmul.f32 %v583_v29, %v573_v30  ;;  %v499_v13 = vadd.f32 %v2090_v10, %v498_v12 }
 0x148   : > { %587 = vrot.lane.b32.xlu1 %v585_v31, %s1851_s15 }
 0x14d   : > { %v578_v32 = vpop.permute.xlu0 %577 }
 0x14e   : > { %v580_v33 = vmul.f32 %v578_v32, %v573_v30 }
 0x1ba   : > { %v588_v34 = vpop.permute.xlu1 %587 }
 0x1bb   : > { %v590_v35 = vadd.f32 %v588_v34, %v580_v33 }
 0x1bd   : > { %1484 = vtanh.f32 %v590_v35 }
 0x1c3   : > { %v1485_v36 = vpop.eup %1484 }
 0x1c4   : > { %593 = vrot.lane.b32.xlu1 %v1485_v36, %s1850_s14  ;;  %v439_v36 = vld [vmem:[%s2035_s22 + $0x18] sm:$0xff] }
 0x1c5   : > { %1311 = vmatmul.msk.f32.gmra.mxu0 %vm450_vm1, %v439_v36 }
 0x1cd   : > { %1312 = vmatmul.msk.f32.gmra.mxu0 %vm450_vm1, %v440_v3 }
 0x236   : > { %v594_v37 = vpop.permute.xlu1 %593 }
 0x237   : > { %v596_v38 = vmul.f32 %v594_v37, %v573_v30 }
 0x239   : > { %598 = vrot.lane.b32.xlu2 %v596_v38, %s1851_s15 }
 0x293   : > { %v599_v40 = vpop.permute.xlu2 %598 }
 0x294   : > { %601 = vst.msk [vmem:[%s2049_s3] sm:$0xff] %vm531_vm2, %v599_v40  ;;  %1318 = vmatmul.msk.f32.vlgmr.msra.gmra.mxu2 %vm531_vm2, %v599_v40  ;;  %v501_v40 = vpop.f32.mrf.mxu0 }
 0x295   : > { %1026 = vmatpush.msra.mxu2 %v2052_v2  ;;  %v502_v41 = vadd.f32 %v2090_v10, %v501_v40 }
 0x297   : > { %1027 = vmatpush.msra.mxu2 %v2054_v4  ;;  %v2127_v4 = vpop.f32.mrf.mxu3 }
 0x299   : > { %1028 = vmatpush.msra.mxu2 %v2058_v7 }
 0x29b   : > { %1029 = vmatpush.msra.mxu2 %v2063_v8 }
 0x29f   : > { %v2129_v7 = vpop.f32.mrf.mxu3 }
 0x2a7   : > { %v2131_v8 = vpop.f32.mrf.mxu3 }
 0x317   : > { %v623_v43 = vpop.f32.mrf.mxu2 }
 0x318   : > { %v626_v44 = vadd.f32 %v623_v43, %v496_v42 }
 0x31a   : > { %1486 = vtanh.f32 %v626_v44  ;;  %v1319_v46 = vmul.f32 -1.442695, %v626_v44 }
 0x31c   : > { %1488 = vpow2.f32 %v1319_v46 }
 0x320   : > { %v1487_v45 = vpop.eup %1486 }
 0x321   : > { %649 = vrot.lane.b32.xlu2 %v1487_v45, %s1850_s14 }
 0x322   : > { %v1489_v47 = vpop.eup %1488 }
 0x323   : > { %v630_v48 = vadd.f32 1.0, %v1489_v47 }
 0x325   : > { %1490 = vrcp.f32 %v630_v48  ;;  %v642_v54 = vand.u32 2147483648, %v630_v48  ;;  %vm636_vm8 = vweird.f32 %v630_v48  ;;  %v640_v55 = vand.u32 2147483647, %v630_v48 }
 0x327   : > { %v643_v57 = vor.u32 1.1754944e-38, %v642_v54  ;;  %vm641_vm10 = vcmp.eq.f32.partialorder %v640_v55, 8.507059e+37 }
 0x32b   : > { %v1491_v49 = vpop.eup %1490 }
 0x32c   : > { %v632_v50 = vmul.f32 %v1491_v49, %v630_v48  ;;  %vm637_vm7 = vweird.f32 %v1491_v49 }
 0x32d   : > { %vm638_vm9 = vmor %vm636_vm8, %vm637_vm7 }
 0x32e   : > { %v633_v51 = vsub.f32 1.0, %v632_v50 }
 0x330   : > { %v634_v52 = vmul.f32 %v1491_v49, %v633_v51 }
 0x332   : > { %v635_v53 = vadd.f32 %v1491_v49, %v634_v52 }
 0x334   : > { %v639_v56 = vsel %vm638_vm9, %v1491_v49, %v635_v53 }
 0x335   : > { %v644_v59 = vsel %vm641_vm10, %v643_v57, %v639_v56 }
 0x336   : > { %v647_v61 = vmul.f32 %v644_v59, %v590_v35 }
 0x37b   : > { %v650_v58 = vpop.permute.xlu2 %649 }
 0x37c   : > { %v652_v60 = vmul.f32 %v650_v58, %v644_v59 }
 0x37e   : > { %654 = vrot.lane.b32.xlu0 %v652_v60, %s1851_s15 }
 0x3f0   : > { %v655_v62 = vpop.permute.xlu0 %654 }
 0x3f1   : > { %v657_v63 = vadd.f32 %v655_v62, %v647_v61 }
 0x3f3   : > { %1492 = vtanh.f32 %v657_v63 }
 0x3f9   : > { %v1493_v0 = vpop.eup %1492 }
 0x3fa   : > { %660 = vrot.lane.b32.xlu1 %v1493_v0, %s1850_s14 }
 0x46c   : > { %v661_v6 = vpop.permute.xlu1 %660 }
 0x46d   : > { %v663_v9 = vmul.f32 %v661_v6, %v644_v59  ;;  %v504_v6 = vpop.f32.mrf.mxu0 }
 0x46f   : > { %665 = vrot.lane.b32.xlu2 %v663_v9, %s1851_s15  ;;  %v505_v9 = vadd.f32 %v2090_v10, %v504_v6 }
 0x4c9   : > { %v666_v2 = vpop.permute.xlu2 %665 }
 0x4ca   : > { %1320 = vst.msk [vmem:[%s2049_s3 + $0x8] sm:$0xff] %vm531_vm2, %v666_v2  ;;  %1321 = vmatmul.msk.f32.vlgmr.msrb.gmra.mxu3 %vm531_vm2, %v666_v2 }
 0x54d   : > { %v691_v14 = vpop.f32.mrf.mxu3 }
 0x54e   : > { %v694_v15 = vadd.f32 %v691_v14, %v499_v13 }
 0x550   : > { %1494 = vtanh.f32 %v694_v15  ;;  %v1322_v17 = vmul.f32 -1.442695, %v694_v15 }
 0x552   : > { %1496 = vpow2.f32 %v1322_v17 }
 0x556   : > { %v1495_v16 = vpop.eup %1494 }
 0x557   : > { %717 = vrot.lane.b32.xlu0 %v1495_v16, %s1850_s14 }
 0x558   : > { %v1497_v18 = vpop.eup %1496 }
 0x559   : > { %v698_v19 = vadd.f32 1.0, %v1497_v18 }
 0x55b   : > { %1498 = vrcp.f32 %v698_v19  ;;  %v710_v25 = vand.u32 2147483648, %v698_v19  ;;  %vm704_vm12 = vweird.f32 %v698_v19  ;;  %v708_v26 = vand.u32 2147483647, %v698_v19 }
 0x55d   : > { %v711_v28 = vor.u32 1.1754944e-38, %v710_v25  ;;  %vm709_vm14 = vcmp.eq.f32.partialorder %v708_v26, 8.507059e+37 }
 0x561   : > { %v1499_v20 = vpop.eup %1498 }
 0x562   : > { %v700_v21 = vmul.f32 %v1499_v20, %v698_v19  ;;  %vm705_vm11 = vweird.f32 %v1499_v20 }
 0x563   : > { %vm706_vm13 = vmor %vm704_vm12, %vm705_vm11 }
 0x564   : > { %v701_v22 = vsub.f32 1.0, %v700_v21 }
 0x566   : > { %v702_v23 = vmul.f32 %v1499_v20, %v701_v22 }
 0x568   : > { %v703_v24 = vadd.f32 %v1499_v20, %v702_v23 }
 0x56a   : > { %v707_v27 = vsel %vm706_vm13, %v1499_v20, %v703_v24 }
 0x56b   : > { %v712_v30 = vsel %vm709_vm14, %v711_v28, %v707_v27 }
 0x56c   : > { %v715_v32 = vmul.f32 %v712_v30, %v657_v63 }
 0x5c9   : > { %v718_v29 = vpop.permute.xlu0 %717 }
 0x5ca   : > { %v720_v31 = vmul.f32 %v718_v29, %v712_v30 }
 0x5cc   : > { %722 = vrot.lane.b32.xlu1 %v720_v31, %s1851_s15 }
 0x63e   : > { %v723_v33 = vpop.permute.xlu1 %722 }
 0x63f   : > { %v725_v34 = vadd.f32 %v723_v33, %v715_v32 }
 0x641   : > { %1500 = vtanh.f32 %v725_v34 }
 0x647   : > { %v1501_v35 = vpop.eup %1500 }
 0x648   : > { %728 = vrot.lane.b32.xlu2 %v1501_v35, %s1850_s14  ;;  %v508_v35 = vadd.f32 %v2090_v10, %v2127_v4 }
 0x6a2   : > { %v729_v37 = vpop.permute.xlu2 %728 }
 0x6a3   : > { %v731_v38 = vmul.f32 %v729_v37, %v712_v30 }
 0x6a5   : > { %733 = vrot.lane.b32.xlu0 %v731_v38, %s1851_s15 }
 0x717   : > { %v734_v39 = vpop.permute.xlu0 %733 }
 0x718   : > { %1323 = vst.msk [vmem:[%s2049_s3 + $0x10] sm:$0xff] %vm531_vm2, %v734_v39  ;;  %1324 = vmatmul.msk.f32.vlgmr.msrb.gmra.mxu1 %vm531_vm2, %v734_v39 }
 0x795   : > { %v759_v42 = vpop.f32.mrf.mxu1 }
 0x796   : > { %v762_v43 = vadd.f32 %v759_v42, %v502_v41 }
 0x798   : > { %1502 = vtanh.f32 %v762_v43  ;;  %v1325_v45 = vmul.f32 -1.442695, %v762_v43 }
 0x79a   : > { %1504 = vpow2.f32 %v1325_v45 }
 0x79e   : > { %v1503_v44 = vpop.eup %1502 }
 0x79f   : > { %785 = vrot.lane.b32.xlu1 %v1503_v44, %s1850_s14 }
 0x7a0   : > { %v1505_v46 = vpop.eup %1504 }
 0x7a1   : > { %v766_v47 = vadd.f32 1.0, %v1505_v46 }
 0x7a3   : > { %1506 = vrcp.f32 %v766_v47  ;;  %v778_v53 = vand.u32 2147483648, %v766_v47  ;;  %vm772_vm0 = vweird.f32 %v766_v47  ;;  %v776_v54 = vand.u32 2147483647, %v766_v47 }
 0x7a5   : > { %v779_v56 = vor.u32 1.1754944e-38, %v778_v53  ;;  %vm777_vm4 = vcmp.eq.f32.partialorder %v776_v54, 8.507059e+37 }
 0x7a9   : > { %v1507_v48 = vpop.eup %1506 }
 0x7aa   : > { %v768_v49 = vmul.f32 %v1507_v48, %v766_v47  ;;  %vm773_vm15 = vweird.f32 %v1507_v48 }
 0x7ab   : > { %vm774_vm3 = vmor %vm772_vm0, %vm773_vm15 }
 0x7ac   : > { %v769_v50 = vsub.f32 1.0, %v768_v49 }
 0x7ae   : > { %v770_v51 = vmul.f32 %v1507_v48, %v769_v50 }
 0x7b0   : > { %v771_v52 = vadd.f32 %v1507_v48, %v770_v51 }
 0x7b2   : > { %v775_v55 = vsel %vm774_vm3, %v1507_v48, %v771_v52 }
 0x7b3   : > { %v780_v58 = vsel %vm777_vm4, %v779_v56, %v775_v55 }
 0x7b4   : > { %v783_v60 = vmul.f32 %v780_v58, %v725_v34 }
 0x811   : > { %v786_v57 = vpop.permute.xlu1 %785 }
 0x812   : > { %v788_v59 = vmul.f32 %v786_v57, %v780_v58 }
 0x814   : > { %790 = vrot.lane.b32.xlu2 %v788_v59, %s1851_s15 }
 0x86e   : > { %v791_v61 = vpop.permute.xlu2 %790 }
 0x86f   : > { %v793_v62 = vadd.f32 %v791_v61, %v783_v60  ;;  %v511_v60 = vadd.f32 %v2090_v10, %v2129_v7 }
 0x871   : > { %1508 = vtanh.f32 %v793_v62 }
 0x877   : > { %v1509_v63 = vpop.eup %1508 }
 0x878   : > { %796 = vrot.lane.b32.xlu0 %v1509_v63, %s1850_s14 }
 0x8ea   : > { %v797_v0 = vpop.permute.xlu0 %796 }
 0x8eb   : > { %v799_v1 = vmul.f32 %v797_v0, %v780_v58 }
 0x8ed   : > { %801 = vrot.lane.b32.xlu1 %v799_v1, %s1851_s15 }
 0x95f   : > { %v802_v5 = vpop.permute.xlu1 %801 }
 0x960   : > { %1326 = vst.msk [vmem:[%s2049_s3 + $0x18] sm:$0xff] %vm531_vm2, %v802_v5  ;;  %1327 = vmatmul.msk.f32.vlgmr.msrb.gmra.mxu2 %vm531_vm2, %v802_v5 }
 0x9e3   : > { %v827_v11 = vpop.f32.mrf.mxu2 }
 0x9e4   : > { %v830_v2 = vadd.f32 %v827_v11, %v505_v9 }
 0x9e6   : > { %1510 = vtanh.f32 %v830_v2  ;;  %v1328_v13 = vmul.f32 -1.442695, %v830_v2 }
 0x9e8   : > { %1512 = vpow2.f32 %v1328_v13 }
 0x9ec   : > { %v1511_v12 = vpop.eup %1510 }
 0x9ed   : > { %853 = vrot.lane.b32.xlu2 %v1511_v12, %s1850_s14 }
 0x9ee   : > { %v1513_v14 = vpop.eup %1512 }
 0x9ef   : > { %v834_v15 = vadd.f32 1.0, %v1513_v14 }
 0x9f1   : > { %1514 = vrcp.f32 %v834_v15  ;;  %v846_v21 = vand.u32 2147483648, %v834_v15  ;;  %vm840_vm5 = vweird.f32 %v834_v15  ;;  %v844_v22 = vand.u32 2147483647, %v834_v15 }
 0x9f3   : > { %v847_v24 = vor.u32 1.1754944e-38, %v846_v21  ;;  %vm845_vm7 = vcmp.eq.f32.partialorder %v844_v22, 8.507059e+37 }
 0x9f7   : > { %v1515_v16 = vpop.eup %1514 }
 0x9f8   : > { %v836_v17 = vmul.f32 %v1515_v16, %v834_v15  ;;  %vm841_vm1 = vweird.f32 %v1515_v16 }
 0x9f9   : > { %vm842_vm6 = vmor %vm840_vm5, %vm841_vm1 }
 0x9fa   : > { %v837_v18 = vsub.f32 1.0, %v836_v17 }
 0x9fc   : > { %v838_v19 = vmul.f32 %v1515_v16, %v837_v18 }
 0x9fe   : > { %v839_v20 = vadd.f32 %v1515_v16, %v838_v19 }
 0xa00   : > { %v843_v23 = vsel %vm842_vm6, %v1515_v16, %v839_v20 }
 0xa01   : > { %v848_v26 = vsel %vm845_vm7, %v847_v24, %v843_v23 }
 0xa02   : > { %v851_v28 = vmul.f32 %v848_v26, %v793_v62 }
 0xa47   : > { %v854_v25 = vpop.permute.xlu2 %853 }
 0xa48   : > { %v856_v27 = vmul.f32 %v854_v25, %v848_v26  ;;  %v514_v25 = vadd.f32 %v2090_v10, %v2131_v8 }
 0xa4a   : > { %858 = vrot.lane.b32.xlu0 %v856_v27, %s1851_s15 }
 0xabc   : > { %v859_v29 = vpop.permute.xlu0 %858 }
 0xabd   : > { %v861_v30 = vadd.f32 %v859_v29, %v851_v28 }
 0xabf   : > { %1516 = vtanh.f32 %v861_v30 }
 0xac5   : > { %v1517_v31 = vpop.eup %1516 }
 0xac6   : > { %864 = vrot.lane.b32.xlu1 %v1517_v31, %s1850_s14 }
 0xb38   : > { %v865_v32 = vpop.permute.xlu1 %864 }
 0xb39   : > { %v867_v33 = vmul.f32 %v865_v32, %v848_v26 }
 0xb3b   : > { %869 = vrot.lane.b32.xlu2 %v867_v33, %s1851_s15 }
 0xb95   : > { %v870_v34 = vpop.permute.xlu2 %869 }
 0xb96   : > { %1329 = vst.msk [vmem:[%s2049_s3 + $0x20] sm:$0xff] %vm531_vm2, %v870_v34  ;;  %1330 = vmatmul.msk.f32.vlgmr.msra.gmra.mxu3 %vm531_vm2, %v870_v34 }
 0xc19   : > { %v895_v36 = vpop.f32.mrf.mxu3 }
 0xc1a   : > { %v898_v37 = vadd.f32 %v895_v36, %v508_v35 }
 0xc1c   : > { %1518 = vtanh.f32 %v898_v37  ;;  %v1331_v39 = vmul.f32 -1.442695, %v898_v37 }
 0xc1e   : > { %1520 = vpow2.f32 %v1331_v39 }
 0xc22   : > { %v1519_v38 = vpop.eup %1518 }
 0xc23   : > { %921 = vrot.lane.b32.xlu0 %v1519_v38, %s1850_s14 }
 0xc24   : > { %v1521_v40 = vpop.eup %1520 }
 0xc25   : > { %v902_v41 = vadd.f32 1.0, %v1521_v40 }
 0xc27   : > { %1522 = vrcp.f32 %v902_v41  ;;  %v914_v47 = vand.u32 2147483648, %v902_v41  ;;  %vm908_vm9 = vweird.f32 %v902_v41  ;;  %v912_v4 = vand.u32 2147483647, %v902_v41 }
 0xc29   : > { %v915_v49 = vor.u32 1.1754944e-38, %v914_v47  ;;  %vm913_vm11 = vcmp.eq.f32.partialorder %v912_v4, 8.507059e+37 }
 0xc2d   : > { %v1523_v42 = vpop.eup %1522 }
 0xc2e   : > { %v904_v43 = vmul.f32 %v1523_v42, %v902_v41  ;;  %vm909_vm8 = vweird.f32 %v1523_v42 }
 0xc2f   : > { %vm910_vm10 = vmor %vm908_vm9, %vm909_vm8 }
 0xc30   : > { %v905_v44 = vsub.f32 1.0, %v904_v43 }
 0xc32   : > { %v906_v45 = vmul.f32 %v1523_v42, %v905_v44 }
 0xc34   : > { %v907_v46 = vadd.f32 %v1523_v42, %v906_v45 }
 0xc36   : > { %v911_v48 = vsel %vm910_vm10, %v1523_v42, %v907_v46 }
 0xc37   : > { %v916_v51 = vsel %vm913_vm11, %v915_v49, %v911_v48 }
 0xc38   : > { %v919_v53 = vmul.f32 %v916_v51, %v861_v30 }
 0xc95   : > { %v922_v50 = vpop.permute.xlu0 %921 }
 0xc96   : > { %v924_v52 = vmul.f32 %v922_v50, %v916_v51 }
 0xc98   : > { %926 = vrot.lane.b32.xlu1 %v924_v52, %s1851_s15 }
 0xd0a   : > { %v927_v54 = vpop.permute.xlu1 %926 }
 0xd0b   : > { %v929_v55 = vadd.f32 %v927_v54, %v919_v53 }
 0xd0d   : > { %1524 = vtanh.f32 %v929_v55 }
 0xd13   : > { %v1525_v56 = vpop.eup %1524 }
 0xd14   : > { %932 = vrot.lane.b32.xlu2 %v1525_v56, %s1850_s14 }
 0xd6e   : > { %v933_v57 = vpop.permute.xlu2 %932 }
 0xd6f   : > { %v935_v58 = vmul.f32 %v933_v57, %v916_v51 }
 0xd71   : > { %937 = vrot.lane.b32.xlu0 %v935_v58, %s1851_s15 }
 0xde3   : > { %v938_v59 = vpop.permute.xlu0 %937 }
 0xde4   : > { %1332 = vst.msk [vmem:[%s2049_s3 + $0x28] sm:$0xff] %vm531_vm2, %v938_v59  ;;  %1333 = vmatmul.msk.f32.vlgmr.msra.gmra.mxu1 %vm531_vm2, %v938_v59 }
 0xe61   : > { %v963_v61 = vpop.f32.mrf.mxu1 }
 0xe62   : > { %v966_v62 = vadd.f32 %v963_v61, %v511_v60 }
 0xe64   : > { %1526 = vtanh.f32 %v966_v62  ;;  %v1334_v0 = vmul.f32 -1.442695, %v966_v62 }
 0xe66   : > { %1528 = vpow2.f32 %v1334_v0 }
 0xe6a   : > { %v1527_v63 = vpop.eup %1526 }
 0xe6b   : > { %989 = vrot.lane.b32.xlu1 %v1527_v63, %s1850_s14 }
 0xe6c   : > { %v1529_v1 = vpop.eup %1528 }
 0xe6d   : > { %v970_v3 = vadd.f32 1.0, %v1529_v1 }
 0xe6f   : > { %1530 = vrcp.f32 %v970_v3  ;;  %v982_v12 = vand.u32 2147483648, %v970_v3  ;;  %vm976_vm13 = vweird.f32 %v970_v3  ;;  %v980_v7 = vand.u32 2147483647, %v970_v3 }
 0xe71   : > { %v983_v14 = vor.u32 1.1754944e-38, %v982_v12  ;;  %vm981_vm15 = vcmp.eq.f32.partialorder %v980_v7, 8.507059e+37 }
 0xe75   : > { %v1531_v5 = vpop.eup %1530 }
 0xe76   : > { %v972_v6 = vmul.f32 %v1531_v5, %v970_v3  ;;  %vm977_vm12 = vweird.f32 %v1531_v5 }
 0xe77   : > { %vm978_vm14 = vmor %vm976_vm13, %vm977_vm12 }
 0xe78   : > { %v973_v9 = vsub.f32 1.0, %v972_v6 }
 0xe7a   : > { %v974_v11 = vmul.f32 %v1531_v5, %v973_v9 }
 0xe7c   : > { %v975_v2 = vadd.f32 %v1531_v5, %v974_v11 }
 0xe7e   : > { %v979_v13 = vsel %vm978_vm14, %v1531_v5, %v975_v2 }
 0xe7f   : > { %v984_v16 = vsel %vm981_vm15, %v983_v14, %v979_v13 }
 0xe80   : > { %v987_v18 = vmul.f32 %v984_v16, %v929_v55 }
 0xedd   : > { %v990_v15 = vpop.permute.xlu1 %989 }
 0xede   : > { %v992_v17 = vmul.f32 %v990_v15, %v984_v16 }
 0xee0   : > { %994 = vrot.lane.b32.xlu2 %v992_v17, %s1851_s15 }
 0xf3a   : > { %v995_v19 = vpop.permute.xlu2 %994 }
 0xf3b   : > { %v997_v20 = vadd.f32 %v995_v19, %v987_v18 }
 0xf3d   : > { %1532 = vtanh.f32 %v997_v20 }
 0xf43   : > { %v1533_v21 = vpop.eup %1532 }
 0xf44   : > { %1000 = vrot.lane.b32.xlu0 %v1533_v21, %s1850_s14 }
 0xfb6   : > { %v1001_v22 = vpop.permute.xlu0 %1000 }
 0xfb7   : > { %v1003_v23 = vmul.f32 %v1001_v22, %v984_v16 }
 0xfb9   : > { %1005 = vrot.lane.b32.xlu1 %v1003_v23, %s1851_s15 }
0x102b   : > { %v1006_v24 = vpop.permute.xlu1 %1005 }
0x102c   : > { %1335 = vst.msk [vmem:[%s2049_s3 + $0x30] sm:$0xff] %vm531_vm2, %v1006_v24  ;;  %1336 = vmatmul.msk.f32.vlgmr.msra.gmra.mxu2 %vm531_vm2, %v1006_v24 }
0x10af   : > { %v1031_v26 = vpop.f32.mrf.mxu2 }
0x10b0   : > { %v1034_v27 = vadd.f32 %v1031_v26, %v514_v25 }
0x10b2   : > { %1534 = vtanh.f32 %v1034_v27  ;;  %v1337_v29 = vmul.f32 -1.442695, %v1034_v27 }
0x10b4   : > { %1536 = vpow2.f32 %v1337_v29 }
0x10b8   : > { %v1535_v28 = vpop.eup %1534 }
0x10b9   : > { %1057 = vrot.lane.b32.xlu2 %v1535_v28, %s1850_s14 }
0x10ba   : > { %v1537_v30 = vpop.eup %1536 }
0x10bb   : > { %v1038_v31 = vadd.f32 1.0, %v1537_v30 }
0x10bd   : > { %1538 = vrcp.f32 %v1038_v31  ;;  %v1050_v37 = vand.u32 2147483648, %v1038_v31  ;;  %vm1044_vm3 = vweird.f32 %v1038_v31  ;;  %v1048_v10 = vand.u32 2147483647, %v1038_v31 }
0x10bf   : > { %v1051_v38 = vor.u32 1.1754944e-38, %v1050_v37  ;;  %vm1049_vm1 = vcmp.eq.f32.partialorder %v1048_v10, 8.507059e+37 }
0x10c3   : > { %v1539_v32 = vpop.eup %1538 }
0x10c4   : > { %v1040_v33 = vmul.f32 %v1539_v32, %v1038_v31  ;;  %vm1045_vm0 = vweird.f32 %v1539_v32 }
0x10c5   : > { %vm1046_vm4 = vmor %vm1044_vm3, %vm1045_vm0 }
0x10c6   : > { %v1041_v34 = vsub.f32 1.0, %v1040_v33 }
0x10c8   : > { %v1042_v35 = vmul.f32 %v1539_v32, %v1041_v34 }
0x10ca   : > { %v1043_v36 = vadd.f32 %v1539_v32, %v1042_v35 }
0x10cc   : > { %v1047_v8 = vsel %vm1046_vm4, %v1539_v32, %v1043_v36 }
0x10cd   : > { %v1052_v40 = vsel %vm1049_vm1, %v1051_v38, %v1047_v8 }
0x10ce   : > { %v1055_v42 = vmul.f32 %v1052_v40, %v997_v20 }
0x1113   : > { %v1058_v39 = vpop.permute.xlu2 %1057 }
0x1114   : > { %v1060_v41 = vmul.f32 %v1058_v39, %v1052_v40 }
0x1116   : > { %1062 = vrot.lane.b32.xlu0 %v1060_v41, %s1851_s15 }
0x1188   : > { %v1063_v43 = vpop.permute.xlu0 %1062 }
0x1189   : > { %v1065_v44 = vadd.f32 %v1063_v43, %v1055_v42 }
0x118b   : > { %1540 = vtanh.f32 %v1065_v44  ;;  %1080 = vrot.lane.b32.xlu0 %v1065_v44, %s1852_s19 }
0x1191   : > { %v1541_v45 = vpop.eup %1540 }
0x1192   : > { %1068 = vrot.lane.b32.xlu1 %v1541_v45, %s1850_s14 }
0x11fd   : > { %v1081_v46 = vpop.permute.xlu0 %1080 }
0x11fe   : > { %1083 = vst.msk [vmem:[#allocation4] sm:$0xff] %vm531_vm2, %v1081_v46 }
0x1204   : > { %v1069_v47 = vpop.permute.xlu1 %1068 }
0x1205   : > { %v1071_v4 = vmul.f32 %v1069_v47, %v1052_v40 }
0x1207   : > { %1073 = vrot.lane.b32.xlu2 %v1071_v4, %s1851_s15 }
0x125f   : > { %1087 = sbr.rel (%p1339_p1) target bundleno = 4710 (0x1266), region = 72 }
0x1261   : > { %v1074_v48 = vpop.permute.xlu2 %1073 }
0x1262   : > { %1338 = vst.msk [vmem:[%s2049_s3 + $0x38] sm:$0xff] %vm531_vm2, %v1074_v48 }
0x1263   : > { %1078 = vst.msk [vmem:[#allocation3] sm:$0xff] %vm531_vm2, %v1074_v48 }
0x1264   : > { %1088 = vst.msk [vmem:[#allocation15] sm:$0xff] %vm531_vm2, %v1074_v48 }
0x1265   : > { %1089 = vst.msk [vmem:[#allocation17] sm:$0xff] %vm531_vm2, %v1081_v46 }
0x1266 PF: > { %s1853_s11 = smov [#allocation15]   ;;  %s1123_s21 = sshll.u32 %s2252_s7, 4  ;;  %s1124_s21 = int_to_ptr.hbm [resolvable:$true] %s1123_s21 }
0x1267   : > { %s1121_s23 = sshll.u32 %s1853_s11, 4  ;;  %s1350_s20 = sshll.u32 %s1834_s30, 6  ;;  %s1122_s23 = int_to_ptr.vmem [resolvable:$true] %s1121_s23 }
0x1268   : > { %1373 = dma.vmem_to_hbm [thread:$0]  (%p1995_p11), %s1122_s23, 128, %s1124_s21, [#allocation16]  }
0x1269   : > { %s1103_s4 = scalar_lea.hbm %s2251_s6, %s1350_s20  ;;  %s1104_s22 = sshll.u32 %s2049_s3, 4  ;;  %s1105_s22 = int_to_ptr.vmem [resolvable:$true] %s1104_s22 }
0x126a   : > { %s1106_s5 = sshll.u32 %s1103_s4, 4  ;;  %s1091_s13 = scalar_lea.sflag [#allocation7], %s2031_s24  ;;  %s1107_s5 = int_to_ptr.hbm [resolvable:$true] %s1106_s5 }
0x126b   : > { %s1734_s14 = sshra.s32 %s1107_s5, 4  ;;  %s1740_s30 = scalar_lea.hbm %s2251_s6, 128  ;;  %s1735_s14 = int_to_ptr.hbm [resolvable:$true] %s1734_s14 }
0x126c   : > { %s1736_s15 = scalar_lea.hbm %s1735_s14, 64  ;;  %p1741_p0 = scmp.lt.s32.totalorder %s1735_s14, %s2251_s6 }
0x126d   : > { %p1737_p3 = scmp.ne.s32.totalorder %s1735_s14, %s1736_s15  ;;  %p1742_p4 = scmp.lt.s32.totalorder %s1740_s30, %s1736_s15 }
0x126f   : > { %p1738_p12 = pnand %p1737_p3, %p2008_p2  ;;  %p1743_p6 = por %p1742_p4, %p1741_p0 }
0x1271   : > { %p1739_p13 = pneg %p1738_p12 }
0x1273   : > { %p1744_p8 = pnand %p1743_p6, %p1739_p13 }
0x1275   : > { %1747 = shalt.err (!%p1744_p8)
}
0x1276   : > { %s1854_s24 = smov 128   ;;  %s1855_s3 = smov 8  }
0x1277   : > { %1371 = dma.vmem_to_hbm [thread:$0]  (%p2008_p2), %s1105_s22, 1024, %s1107_s5, %s1091_s13, %s1854_s24, %s1854_s24, %s1855_s3  }
0x1278   : > { %s1856_s18 = smov [#allocation17]   ;;  %s1137_s12 = sshll.u32 %s2253_s8, 4  ;;  %s1138_s12 = int_to_ptr.hbm [resolvable:$true] %s1137_s12 }
0x1279   : > { %s1135_s21 = sshll.u32 %s1856_s18, 4  ;;  %s1136_s21 = int_to_ptr.vmem [resolvable:$true] %s1135_s21 }
0x127a   : > { %1375 = dma.vmem_to_hbm [thread:$0]  (%p1995_p11), %s1136_s21, 128, %s1138_s12, [#allocation16]  }
0x127b   : > { %1813 = dma.done.wait (%p1995_p11), [#allocation16], 256  }
0x127c   : > { %1815 = vsyncadd (%p1995_p11), [#allocation16], 4294967040 }
0x127d PF: > { %s1159_s1 = sand.u32 1, %s1822_s27   ;;  %p1399_p2 = pnand %p1296_p10, %p1949_p5 }
0x127e   : > { %s1160_s22 = scalar_lea.sflag [#allocation7], %s1159_s1 }
0x127f   : > { %p1400_p9 = pneg %p1399_p2 }
0x1281   : > { %1817 = dma.done.wait (%p1400_p9), %s1160_s22, 1024  }
0x1282   : > { %1819 = vsyncadd (%p1400_p9), %s1160_s22, 4294966272  ;;  %s28_s10 = sadd.s32 1, %s1842_s10   ;;  %s2281_s17 = sld [smem:[#allocation24_spill]] }
0x1283   : > { %p25_p7 = scmp.ge.s32.totalorder %s28_s10, 4   ;;  %s2282_s27 = smov %s1826_s28 }
0x1284   : > { %s2283_s28 = smov %s1830_s29  ;;  %s2284_s29 = smov %s2018_s16 }
0x1285   : > { %s2285_s30 = smov %s1838_s9  ;;  %27 = sbr.rel (!%p25_p7) target bundleno = 14 (0xe), region = 147 }
0x1288   : > { %s2286_s9 = smov %s2281_s17 }
0x128a   :  { %1166 = vsyncpa [#allocation6], 1 }
0x128b   :  { %1168 = vsyncpa [#allocation6 + $0x1], 1 }
0x128c   :  { %1169 = vsyncpa [#allocation9], 1 }
0x128d   :  { %1170 = vsyncpa [#allocation12], 1 }
0x128e   :  { %1171 = vsyncpa [#allocation7], 1 }
0x128f   :  { %1173 = vsyncpa [#allocation7 + $0x1], 1 }
0x1290   :  { %1174 = vsyncpa [#allocation16], 1 }

// kernel: tpu_custom_call.1
= control target key start
LH: loop header
LB: loop body
LE: loop exit
PB: predicated region body
PF: predicated region fallthrough
CT: control target
= control target key end

     0   :  { %s2245_s0 = inlined_call_operand.hbm [shape: f32[16,8,16], index: 0, kind: input, shape index: {}]   ;;  %s2246_s1 = inlined_call_operand.hbm [shape: f32[16,128], index: 1, kind: input, shape index: {}]   ;;  %s2247_s2 = inlined_call_operand.vmem [shape: f32[1,128], index: 2, kind: input, shape index: {}]   ;;  %s2248_s3 = inlined_call_operand.hbm [shape: f32[32,128], index: 3, kind: input, shape index: {}]   ;;  %s2249_s4 = inlined_call_operand.hbm [shape: f32[8,32], index: 4, kind: input, shape index: {}]   ;;  %s2250_s5 = inlined_call_operand.hbm [shape: f32[8,32], index: 5, kind: input, shape index: {}]   ;;  %s2251_s6 = inlined_call_operand.hbm [shape: f32[16,8,32], index: 6, kind: output, shape index: {0}]   ;;  %s2252_s7 = inlined_call_operand.hbm [shape: f32[8,32], index: 7, kind: output, shape index: {1}]   ;;  %s2253_s8 = inlined_call_operand.hbm [shape: f32[8,32], index: 8, kind: output, shape index: {2}]  }
   0x1   :  { %2260 = sst [smem:[#allocation25_spill]] %s2246_s1 }
   0x2   :  { %2261 = sst [smem:[#allocation26_spill]] %s2248_s3 }
   0x3   :  { %2262 = sst [smem:[#allocation27_spill]] %s2249_s4 }
   0x4   :  { %2263 = sst [smem:[#allocation28_spill]] %s2250_s5 }
   0x5   :  { %14 = vsyncpa [#allocation6], 0 }
   0x6   :  { %16 = vsyncpa [#allocation6 + $0x1], 0 }
   0x7   :  { %17 = vsyncpa [#allocation9], 0 }
   0x8   :  { %18 = vsyncpa [#allocation12], 0 }
   0x9   :  { %19 = vsyncpa [#allocation7], 0 }
   0xa   :  { %21 = vsyncpa [#allocation7 + $0x1], 0 }
   0xb   :  { %22 = vsyncpa [#allocation16], 0  ;;  %s1902_s27 = smov 0   ;;  %s1904_s28 = smov 0  }
   0xc   :  { %s1906_s29 = smov 0   ;;  %s1908_s30 = smov 0  }
   0xd   :  { %s1910_s9 = smov 0   ;;  %s1912_s10 = smov 0  }
   0xe LB: > { %s2254_s11 = sadd.s32 4294967295, %s1842_s10   ;;  %s1290_s12 = sadd.s32 4294967294, %s1842_s10   ;;  %s1842_s10 = sphi %s1912_s10, %s28_s10   ;;  %s1838_s9 = sphi %s1910_s9, %s2286_s9   ;;  %s1834_s30 = sphi %s1908_s30, %s2285_s30   ;;  %s1830_s29 = sphi %s1906_s29, %s2284_s29   ;;  %s1826_s28 = sphi %s1904_s28, %s2283_s28   ;;  %s1822_s27 = sphi %s1902_s27, %s2282_s27  }
   0xf   : > { %p62_p0 = scmp.ne.s32.totalorder %s1826_s28, %s1822_s27  ;;  %p1938_p1 = scmp.eq.s32.totalorder %s2254_s11, 0 }
  0x10   : > { %p209_p2 = scmp.eq.s32.totalorder %s1290_s12, 1  ;;  %p1291_p4 = scmp.ge.s32.totalorder %s1842_s10, 1 }
  0x11   : > { %p1944_p3 = por %p1938_p1, %p62_p0  ;;  %p268_p6 = scmp.lt.s32.totalorder %s1842_s10, 3 }
  0x12   : > { %p1949_p5 = por %p209_p2, %p62_p0  ;;  %s2268_s1 = sld [smem:[#allocation25_spill]] }
  0x13   : > { %p1957_p7 = pnand %p1291_p4, %p268_p6  ;;  %s1844_s20 = smov [#allocation8]  }
  0x14   : > { %s2266_s15 = scalar_select %p1949_p5, 1, 0 }
  0x15   : > { %p1381_p8 = pneg %p1957_p7  ;;  %s281_s21 = sshll.u32 %s1844_s20, 4  ;;  %s282_s21 = int_to_ptr.vmem [resolvable:$true] %s281_s21 }
  0x16   : > { %2267 = sst [smem:[#allocation23_spill]] %s2266_s15  ;;  %p1296_p10 = scmp.ge.s32.totalorder %s1842_s10, 2 }
  0x17   : > { %p1965_p9 = pnand %p1381_p8, %p1938_p1  ;;  %s2271_s4 = sld [smem:[#allocation27_spill]] }
  0x18   : > { %s279_s18 = sshll.u32 %s2268_s1, 4  ;;  %s2255_s26 = smov 128   ;;  %s280_s18 = int_to_ptr.hbm [resolvable:$true] %s279_s18 }
  0x19   : > { %s2257_s12 = smov 8   ;;  %s1847_s16 = smov [#allocation11]  }
  0x1a   : > { %1384 = dma.hbm_to_vmem [thread:$0]  (!%p1965_p9), %s280_s18, 256, %s282_s21, [#allocation9], %s2255_s26, %s2255_s26, %s2257_s12  }
  0x1b   : > { %s315_s17 = sshll.u32 %s1847_s16, 4  ;;  %s2272_s3 = sld [smem:[#allocation26_spill]]  ;;  %s316_s17 = int_to_ptr.vmem [resolvable:$true] %s315_s17 }
  0x1c   : > { %s2273_s5 = sld [smem:[#allocation28_spill]]  ;;  %s1848_s21 = smov [#allocation10]  }
  0x1d   : > { %s313_s25 = sshll.u32 %s2271_s4, 4  ;;  %s298_s26 = sshll.u32 %s1848_s21, 4  ;;  %s314_s25 = int_to_ptr.hbm [resolvable:$true] %s313_s25  ;;  %s299_s26 = int_to_ptr.vmem [resolvable:$true] %s298_s26 }
  0x1e   : > { %1390 = dma.hbm_to_vmem [thread:$0]  (!%p1965_p9), %s314_s25, 128, %s316_s17, [#allocation12]  }
  0x1f   : > { %s2274_s11 = smov 128   ;;  %s1849_s16 = smov [#allocation13]  }
  0x20   : > { %s329_s20 = sshll.u32 %s1849_s16, 4  ;;  %s2275_s25 = sadd.s32 4294967295, %s1842_s10   ;;  %s330_s20 = int_to_ptr.vmem [resolvable:$true] %s329_s20 }
  0x21   : > { %s296_s1 = sshll.u32 %s2272_s3, 4  ;;  %p1995_p11 = scmp.eq.s32.totalorder %s2275_s25, 1  ;;  %s297_s1 = int_to_ptr.hbm [resolvable:$true] %s296_s1 }
  0x22   : > { %s327_s18 = sshll.u32 %s2273_s5, 4  ;;  %s37_s23 = sadd.s32 1, %s1838_s9  ;;  %s328_s18 = int_to_ptr.hbm [resolvable:$true] %s327_s18 }
  0x23   : > { %1387 = dma.hbm_to_vmem [thread:$0]  (!%p1965_p9), %s297_s1, 512, %s299_s26, [#allocation9], %s2274_s11, %s2274_s11, %s2257_s12  }
  0x24   : > { %1393 = dma.hbm_to_vmem [thread:$0]  (!%p1965_p9), %s328_s18, 128, %s330_s20, [#allocation12]  }
  0x25   : > { %p38_p12 = scmp.ge.s32.totalorder %s37_s23, 2  ;;  %s49_s24 = sadd.s32 1, %s1830_s29 }
  0x26   : > { %p56_p13 = scmp.ne.s32.totalorder %s1830_s29, %s1826_s28  ;;  %p57_p0 = scmp.eq.s32.totalorder %s1842_s10, 0 }
  0x27   : > { %s2288_s23 = smov (%p38_p12, %s37_s23), 0  ;;  %p1406_p4 = scmp.lt.s32.totalorder %s1842_s10, 2 }
  0x28   : > { %2277 = sst [smem:[#allocation24_spill]] %s2288_s23  ;;  %p2008_p2 = por %p1995_p11, %p56_p13 }
  0x29   : > { %s44_s22 = ssub.s32 %s1838_s9, %s2288_s23  ;;  %s340_s26 = sand.u32 1, %s1830_s29  }
  0x2a   : > { %p47_p6 = scmp.eq.s32.totalorder %s44_s22, 0  ;;  %p58_p8 = por %p57_p0, %p56_p13 }
  0x2b   : > { %s1297_s18 = sshll.u32 %s340_s26, 6  ;;  %s1349_s21 = sshll.u32 %s1838_s9, 6 }
  0x2c   : > { %s2018_s16 = scalar_select %p47_p6, %s1830_s29, %s49_s24  }
  0x2d   : > { %s350_s12 = scalar_lea.hbm %s2245_s0, %s1349_s21  ;;  %s344_s4 = scalar_lea.vmem [#allocation5], %s1297_s18 }
  0x2e   : > { %s351_s3 = sshll.u32 %s350_s12, 4  ;;  %s353_s5 = sshll.u32 %s344_s4, 4  ;;  %s352_s3 = int_to_ptr.hbm [resolvable:$true] %s351_s3  ;;  %s354_s5 = int_to_ptr.vmem [resolvable:$true] %s353_s5 }
  0x2f   : > { %p1395_p9 = pnand %p1406_p4, %p58_p8  ;;  %s341_s15 = scalar_lea.sflag [#allocation6], %s340_s26 }
  0x30   : > { %s2279_s23 = smov 8   ;;  %365 = sbr.rel (%p1957_p7) target bundleno = 4733 (0x127d), region = 44 }
  0x31   : > { %1397 = dma.hbm_to_vmem [thread:$0]  (!%p1395_p9), %s352_s3, 1024, %s354_s5, %s341_s15, %s2274_s11, %s2274_s11, %s2279_s23  }
  0x32   : > { %s2031_s24 = sand.u32 (!%p1957_p7), 1, %s1826_s28  }
  0x33   : > { %s1301_s12 = sshll.u32 (!%p1957_p7), %s2031_s24, 6  ;;  %s368_s4 = scalar_lea.sflag (!%p1957_p7), [#allocation6], %s2031_s24 }
  0x34   : > { %s2035_s22 = scalar_lea.vmem (!%p1957_p7), [#allocation5], %s1301_s12 }
  0x35   : > { %1801 = dma.done.wait (%p1944_p3), %s368_s4, 1024  }
  0x36   : > { %1803 = vsyncadd (%p1944_p3), %s368_s4, 4294966272 }
  0x37   : > { %1805 = dma.done.wait (%p1938_p1), [#allocation9], 768  }
  0x38   : > { %1807 = vsyncadd (%p1938_p1), [#allocation9], 4294966528 }
  0x39   : > { %1809 = dma.done.wait (%p1938_p1), [#allocation12], 256  }
  0x3a   : > { %1811 = vsyncadd (%p1938_p1), [#allocation12], 4294967040  ;;  %s2049_s3 = scalar_lea.vmem [#allocation14], %s1301_s12  ;;  %p1307_p7 = scmp.ne.s32.totalorder %s1834_s30, 0 }
  0x3c   : > { %430 = sbr.rel (%p1307_p7) target bundleno = 68 (0x44), region = 68 }
  0x41   : > { %v431_v0 = vld [vmem:[#allocation11] sm:$0xff]  ;;  %vm432_vm0 = vcmask 261120   ;;  %v434_v1 = vld [vmem:[#allocation13] sm:$0xff] }
  0x42   : > { %433 = vst.msk [vmem:[#allocation3] sm:$0xff] %vm432_vm0, %v431_v0 }
  0x43   : > { %435 = vst.msk [vmem:[#allocation4] sm:$0xff] %vm432_vm0, %v434_v1 }
  0x44 PF: > { %v2052_v2 = vld [vmem:[#allocation10 + $0x18] sm:$0xff]  ;;  %v2054_v4 = vld [vmem:[#allocation10 + $0x10] sm:$0xff]  ;;  %vm450_vm1 = vcmask 130048   ;;  %v2058_v7 = vld [vmem:[#allocation10 + $0x8] sm:$0xff]  ;;  %vm531_vm2 = vcmask 261120   ;;  %s1850_s14 = smov 64  }
  0x45   : > { %v445_v3 = vld [vmem:[#allocation8 + $0x8] sm:$0xff]  ;;  %547 = vmatpush.msra.mxu1 %v2052_v2  ;;  %v444_v5 = vld [vmem:[#allocation8] sm:$0xff]  ;;  %618 = vmatpush.msra.mxu2 %v2052_v2  ;;  %v2063_v8 = vld [vmem:[#allocation10] sm:$0xff]  ;;  %s1851_s15 = smov 32   ;;  %s1852_s19 = smov 96  }
  0x46   : > { %489 = vmatpush.msra.mxu0 %v445_v3  ;;  %v436_v6 = vld [vmem:[%s2035_s22] sm:$0xff]  ;;  %1351 = vmatpush.msra.mxu3 %v445_v3  ;;  %v2090_v10 = vld [vmem:[%s2247_s2] ss:$0 sm:$0xff]  ;;  %v437_v39 = vld [vmem:[%s2035_s22 + $0x8] sm:$0xff]  ;;  %p1339_p1 = scmp.ne.s32.totalorder %s1834_s30, 1 }
  0x47   : > { %548 = vmatpush.msra.mxu1 %v2054_v4  ;;  %619 = vmatpush.msra.mxu2 %v2054_v4  ;;  %v441_v1 = vld [vmem:[%s2035_s22 + $0x28] sm:$0xff]  ;;  %v442_v3 = vld [vmem:[%s2035_s22 + $0x30] sm:$0xff] }
  0x48   : > { %490 = vmatpush.msra.mxu0 %v444_v5  ;;  %1352 = vmatpush.msra.mxu3 %v444_v5  ;;  %v443_v5 = vld [vmem:[%s2035_s22 + $0x38] sm:$0xff] }
  0x49   : > { %1308 = vmatmul.msk.f32.vlgmr.msra.gmra.mxu0 %vm450_vm1, %v436_v6  ;;  %549 = vmatpush.msra.mxu1 %v2058_v7  ;;  %v528_v9 = vld [vmem:[#allocation3] sm:$0xff] }
  0x4a   : > { %620 = vmatpush.msra.mxu2 %v2058_v7  ;;  %686 = vmatpush.msrb.mxu3 %v2052_v2  ;;  %v529_v16 = vld [vmem:[#allocation4] sm:$0xff] }
  0x4b   : > { %550 = vmatpush.msra.mxu1 %v2063_v8  ;;  %1313 = vmatmul.msk.f32.vlgmr.msra.gmra.mxu3 %vm450_vm1, %v441_v1 }
  0x4c   : > { %1316 = vmatmul.msk.f32.vlgmr.msra.gmra.mxu1 %vm531_vm2, %v528_v9  ;;  %621 = vmatpush.msra.mxu2 %v2063_v8 }
  0x4d   : > { %687 = vmatpush.msrb.mxu3 %v2054_v4  ;;  %754 = vmatpush.msrb.mxu1 %v2052_v2 }
  0x4e   : > { %822 = vmatpush.msrb.mxu2 %v2052_v2 }
  0x4f   : > { %688 = vmatpush.msrb.mxu3 %v2058_v7  ;;  %755 = vmatpush.msrb.mxu1 %v2054_v4 }
  0x50   : > { %823 = vmatpush.msrb.mxu2 %v2054_v4 }
  0x51   : > { %689 = vmatpush.msrb.mxu3 %v2063_v8  ;;  %756 = vmatpush.msrb.mxu1 %v2058_v7 }
  0x52   : > { %824 = vmatpush.msrb.mxu2 %v2058_v7  ;;  %1309 = vmatmul.msk.f32.gmra.mxu0 %vm450_vm1, %v437_v39 }
  0x53   : > { %757 = vmatpush.msrb.mxu1 %v2063_v8  ;;  %890 = vmatpush.msra.mxu3 %v2052_v2 }
  0x54   : > { %825 = vmatpush.msrb.mxu2 %v2063_v8  ;;  %1314 = vmatmul.msk.f32.gmra.mxu3 %vm450_vm1, %v442_v3  ;;  %v440_v3 = vld [vmem:[%s2035_s22 + $0x20] sm:$0xff] }
  0x55   : > { %958 = vmatpush.msra.mxu1 %v2052_v2  ;;  %891 = vmatpush.msra.mxu3 %v2054_v4 }
  0x57   : > { %959 = vmatpush.msra.mxu1 %v2054_v4  ;;  %892 = vmatpush.msra.mxu3 %v2058_v7 }
  0x59   : > { %960 = vmatpush.msra.mxu1 %v2058_v7  ;;  %893 = vmatpush.msra.mxu3 %v2063_v8 }
  0x5b   : > { %961 = vmatpush.msra.mxu1 %v2063_v8 }
  0x5c   : > { %1315 = vmatmul.msk.f32.gmra.mxu3 %vm450_vm1, %v443_v5 }
  0xc6   : > { %v492_v11 = vpop.f32.mrf.mxu0 }
  0xc7   : > { %v493_v12 = vadd.f32 %v2090_v10, %v492_v11  ;;  %v438_v11 = vld [vmem:[%s2035_s22 + $0x10] sm:$0xff] }
  0xc8   : > { %1310 = vmatmul.msk.f32.gmra.mxu0 %vm450_vm1, %v438_v11 }
  0xc9   : > { %v552_v13 = vpop.f32.mrf.mxu1 }
  0xca   : > { %v555_v14 = vadd.f32 %v552_v13, %v493_v12 }
  0xcc   : > { %1478 = vtanh.f32 %v555_v14  ;;  %v1317_v17 = vmul.f32 -1.442695, %v555_v14 }
  0xce   : > { %1480 = vpow2.f32 %v1317_v17 }
  0xcf   : > { %v495_v41 = vpop.f32.mrf.mxu0 }
  0xd0   : > { %v496_v42 = vadd.f32 %v2090_v10, %v495_v41 }
  0xd2   : > { %v1479_v15 = vpop.eup %1478 }
  0xd3   : > { %582 = vrot.lane.b32.xlu0 %v1479_v15, %s1850_s14 }
  0xd4   : > { %v1481_v18 = vpop.eup %1480 }
  0xd5   : > { %v559_v19 = vadd.f32 1.0, %v1481_v18 }
  0xd7   : > { %1482 = vrcp.f32 %v559_v19  ;;  %v571_v25 = vand.u32 2147483648, %v559_v19  ;;  %vm565_vm4 = vweird.f32 %v559_v19  ;;  %v569_v26 = vand.u32 2147483647, %v559_v19 }
  0xd9   : > { %v572_v28 = vor.u32 1.1754944e-38, %v571_v25  ;;  %vm570_vm6 = vcmp.eq.f32.partialorder %v569_v26, 8.507059e+37 }
  0xdb   : > { %577 = vrot.lane.b32.xlu0 %v529_v16, %s1851_s15 }
  0xdd   : > { %v1483_v20 = vpop.eup %1482 }
  0xde   : > { %v561_v21 = vmul.f32 %v1483_v20, %v559_v19  ;;  %vm566_vm3 = vweird.f32 %v1483_v20 }
  0xdf   : > { %vm567_vm5 = vmor %vm565_vm4, %vm566_vm3 }
  0xe0   : > { %v562_v22 = vsub.f32 1.0, %v561_v21 }
  0xe2   : > { %v563_v23 = vmul.f32 %v1483_v20, %v562_v22 }
  0xe4   : > { %v564_v24 = vadd.f32 %v1483_v20, %v563_v23 }
  0xe6   : > { %v568_v27 = vsel %vm567_vm5, %v1483_v20, %v564_v24 }
  0xe7   : > { %v573_v30 = vsel %vm570_vm6, %v572_v28, %v568_v27 }
 0x145   : > { %v583_v29 = vpop.permute.xlu0 %582  ;;  %v498_v12 = vpop.f32.mrf.mxu0 }
 0x146   : > { %v585_v31 = vmul.f32 %v583_v29, %v573_v30  ;;  %v499_v13 = vadd.f32 %v2090_v10, %v498_v12 }
 0x148   : > { %587 = vrot.lane.b32.xlu1 %v585_v31, %s1851_s15 }
 0x14d   : > { %v578_v32 = vpop.permute.xlu0 %577 }
 0x14e   : > { %v580_v33 = vmul.f32 %v578_v32, %v573_v30 }
 0x1ba   : > { %v588_v34 = vpop.permute.xlu1 %587 }
 0x1bb   : > { %v590_v35 = vadd.f32 %v588_v34, %v580_v33 }
 0x1bd   : > { %1484 = vtanh.f32 %v590_v35 }
 0x1c3   : > { %v1485_v36 = vpop.eup %1484 }
 0x1c4   : > { %593 = vrot.lane.b32.xlu1 %v1485_v36, %s1850_s14  ;;  %v439_v36 = vld [vmem:[%s2035_s22 + $0x18] sm:$0xff] }
 0x1c5   : > { %1311 = vmatmul.msk.f32.gmra.mxu0 %vm450_vm1, %v439_v36 }
 0x1cd   : > { %1312 = vmatmul.msk.f32.gmra.mxu0 %vm450_vm1, %v440_v3 }
 0x236   : > { %v594_v37 = vpop.permute.xlu1 %593 }
 0x237   : > { %v596_v38 = vmul.f32 %v594_v37, %v573_v30 }
 0x239   : > { %598 = vrot.lane.b32.xlu2 %v596_v38, %s1851_s15 }
 0x293   : > { %v599_v40 = vpop.permute.xlu2 %598 }
 0x294   : > { %601 = vst.msk [vmem:[%s2049_s3] sm:$0xff] %vm531_vm2, %v599_v40  ;;  %1318 = vmatmul.msk.f32.vlgmr.msra.gmra.mxu2 %vm531_vm2, %v599_v40  ;;  %v501_v40 = vpop.f32.mrf.mxu0 }
 0x295   : > { %1026 = vmatpush.msra.mxu2 %v2052_v2  ;;  %v502_v41 = vadd.f32 %v2090_v10, %v501_v40 }
 0x297   : > { %1027 = vmatpush.msra.mxu2 %v2054_v4  ;;  %v2127_v4 = vpop.f32.mrf.mxu3 }
 0x299   : > { %1028 = vmatpush.msra.mxu2 %v2058_v7 }
 0x29b   : > { %1029 = vmatpush.msra.mxu2 %v2063_v8 }
 0x29f   : > { %v2129_v7 = vpop.f32.mrf.mxu3 }
 0x2a7   : > { %v2131_v8 = vpop.f32.mrf.mxu3 }
 0x317   : > { %v623_v43 = vpop.f32.mrf.mxu2 }
 0x318   : > { %v626_v44 = vadd.f32 %v623_v43, %v496_v42 }
 0x31a   : > { %1486 = vtanh.f32 %v626_v44  ;;  %v1319_v46 = vmul.f32 -1.442695, %v626_v44 }
 0x31c   : > { %1488 = vpow2.f32 %v1319_v46 }
 0x320   : > { %v1487_v45 = vpop.eup %1486 }
 0x321   : > { %649 = vrot.lane.b32.xlu2 %v1487_v45, %s1850_s14 }
 0x322   : > { %v1489_v47 = vpop.eup %1488 }
 0x323   : > { %v630_v48 = vadd.f32 1.0, %v1489_v47 }
 0x325   : > { %1490 = vrcp.f32 %v630_v48  ;;  %v642_v54 = vand.u32 2147483648, %v630_v48  ;;  %vm636_vm8 = vweird.f32 %v630_v48  ;;  %v640_v55 = vand.u32 2147483647, %v630_v48 }
 0x327   : > { %v643_v57 = vor.u32 1.1754944e-38, %v642_v54  ;;  %vm641_vm10 = vcmp.eq.f32.partialorder %v640_v55, 8.507059e+37 }
 0x32b   : > { %v1491_v49 = vpop.eup %1490 }
 0x32c   : > { %v632_v50 = vmul.f32 %v1491_v49, %v630_v48  ;;  %vm637_vm7 = vweird.f32 %v1491_v49 }
 0x32d   : > { %vm638_vm9 = vmor %vm636_vm8, %vm637_vm7 }
 0x32e   : > { %v633_v51 = vsub.f32 1.0, %v632_v50 }
 0x330   : > { %v634_v52 = vmul.f32 %v1491_v49, %v633_v51 }
 0x332   : > { %v635_v53 = vadd.f32 %v1491_v49, %v634_v52 }
 0x334   : > { %v639_v56 = vsel %vm638_vm9, %v1491_v49, %v635_v53 }
 0x335   : > { %v644_v59 = vsel %vm641_vm10, %v643_v57, %v639_v56 }
 0x336   : > { %v647_v61 = vmul.f32 %v644_v59, %v590_v35 }
 0x37b   : > { %v650_v58 = vpop.permute.xlu2 %649 }
 0x37c   : > { %v652_v60 = vmul.f32 %v650_v58, %v644_v59 }
 0x37e   : > { %654 = vrot.lane.b32.xlu0 %v652_v60, %s1851_s15 }
 0x3f0   : > { %v655_v62 = vpop.permute.xlu0 %654 }
 0x3f1   : > { %v657_v63 = vadd.f32 %v655_v62, %v647_v61 }
 0x3f3   : > { %1492 = vtanh.f32 %v657_v63 }
 0x3f9   : > { %v1493_v0 = vpop.eup %1492 }
 0x3fa   : > { %660 = vrot.lane.b32.xlu1 %v1493_v0, %s1850_s14 }
 0x46c   : > { %v661_v6 = vpop.permute.xlu1 %660 }
 0x46d   : > { %v663_v9 = vmul.f32 %v661_v6, %v644_v59  ;;  %v504_v6 = vpop.f32.mrf.mxu0 }
 0x46f   : > { %665 = vrot.lane.b32.xlu2 %v663_v9, %s1851_s15  ;;  %v505_v9 = vadd.f32 %v2090_v10, %v504_v6 }
 0x4c9   : > { %v666_v2 = vpop.permute.xlu2 %665 }
 0x4ca   : > { %1320 = vst.msk [vmem:[%s2049_s3 + $0x8] sm:$0xff] %vm531_vm2, %v666_v2  ;;  %1321 = vmatmul.msk.f32.vlgmr.msrb.gmra.mxu3 %vm531_vm2, %v666_v2 }
 0x54d   : > { %v691_v14 = vpop.f32.mrf.mxu3 }
 0x54e   : > { %v694_v15 = vadd.f32 %v691_v14, %v499_v13 }
 0x550   : > { %1494 = vtanh.f32 %v694_v15  ;;  %v1322_v17 = vmul.f32 -1.442695, %v694_v15 }
 0x552   : > { %1496 = vpow2.f32 %v1322_v17 }
 0x556   : > { %v1495_v16 = vpop.eup %1494 }
 0x557   : > { %717 = vrot.lane.b32.xlu0 %v1495_v16, %s1850_s14 }
 0x558   : > { %v1497_v18 = vpop.eup %1496 }
 0x559   : > { %v698_v19 = vadd.f32 1.0, %v1497_v18 }
 0x55b   : > { %1498 = vrcp.f32 %v698_v19  ;;  %v710_v25 = vand.u32 2147483648, %v698_v19  ;;  %vm704_vm12 = vweird.f32 %v698_v19  ;;  %v708_v26 = vand.u32 2147483647, %v698_v19 }
 0x55d   : > { %v711_v28 = vor.u32 1.1754944e-38, %v710_v25  ;;  %vm709_vm14 = vcmp.eq.f32.partialorder %v708_v26, 8.507059e+37 }
 0x561   : > { %v1499_v20 = vpop.eup %1498 }
 0x562   : > { %v700_v21 = vmul.f32 %v1499_v20, %v698_v19  ;;  %vm705_vm11 = vweird.f32 %v1499_v20 }
 0x563   : > { %vm706_vm13 = vmor %vm704_vm12, %vm705_vm11 }
 0x564   : > { %v701_v22 = vsub.f32 1.0, %v700_v21 }
 0x566   : > { %v702_v23 = vmul.f32 %v1499_v20, %v701_v22 }
 0x568   : > { %v703_v24 = vadd.f32 %v1499_v20, %v702_v23 }
 0x56a   : > { %v707_v27 = vsel %vm706_vm13, %v1499_v20, %v703_v24 }
 0x56b   : > { %v712_v30 = vsel %vm709_vm14, %v711_v28, %v707_v27 }
 0x56c   : > { %v715_v32 = vmul.f32 %v712_v30, %v657_v63 }
 0x5c9   : > { %v718_v29 = vpop.permute.xlu0 %717 }
 0x5ca   : > { %v720_v31 = vmul.f32 %v718_v29, %v712_v30 }
 0x5cc   : > { %722 = vrot.lane.b32.xlu1 %v720_v31, %s1851_s15 }
 0x63e   : > { %v723_v33 = vpop.permute.xlu1 %722 }
 0x63f   : > { %v725_v34 = vadd.f32 %v723_v33, %v715_v32 }
 0x641   : > { %1500 = vtanh.f32 %v725_v34 }
 0x647   : > { %v1501_v35 = vpop.eup %1500 }
 0x648   : > { %728 = vrot.lane.b32.xlu2 %v1501_v35, %s1850_s14  ;;  %v508_v35 = vadd.f32 %v2090_v10, %v2127_v4 }
 0x6a2   : > { %v729_v37 = vpop.permute.xlu2 %728 }
 0x6a3   : > { %v731_v38 = vmul.f32 %v729_v37, %v712_v30 }
 0x6a5   : > { %733 = vrot.lane.b32.xlu0 %v731_v38, %s1851_s15 }
 0x717   : > { %v734_v39 = vpop.permute.xlu0 %733 }
 0x718   : > { %1323 = vst.msk [vmem:[%s2049_s3 + $0x10] sm:$0xff] %vm531_vm2, %v734_v39  ;;  %1324 = vmatmul.msk.f32.vlgmr.msrb.gmra.mxu1 %vm531_vm2, %v734_v39 }
 0x795   : > { %v759_v42 = vpop.f32.mrf.mxu1 }
 0x796   : > { %v762_v43 = vadd.f32 %v759_v42, %v502_v41 }
 0x798   : > { %1502 = vtanh.f32 %v762_v43  ;;  %v1325_v45 = vmul.f32 -1.442695, %v762_v43 }
 0x79a   : > { %1504 = vpow2.f32 %v1325_v45 }
 0x79e   : > { %v1503_v44 = vpop.eup %1502 }
 0x79f   : > { %785 = vrot.lane.b32.xlu1 %v1503_v44, %s1850_s14 }
 0x7a0   : > { %v1505_v46 = vpop.eup %1504 }
 0x7a1   : > { %v766_v47 = vadd.f32 1.0, %v1505_v46 }
 0x7a3   : > { %1506 = vrcp.f32 %v766_v47  ;;  %v778_v53 = vand.u32 2147483648, %v766_v47  ;;  %vm772_vm0 = vweird.f32 %v766_v47  ;;  %v776_v54 = vand.u32 2147483647, %v766_v47 }
 0x7a5   : > { %v779_v56 = vor.u32 1.1754944e-38, %v778_v53  ;;  %vm777_vm4 = vcmp.eq.f32.partialorder %v776_v54, 8.507059e+37 }
 0x7a9   : > { %v1507_v48 = vpop.eup %1506 }
 0x7aa   : > { %v768_v49 = vmul.f32 %v1507_v48, %v766_v47  ;;  %vm773_vm15 = vweird.f32 %v1507_v48 }
 0x7ab   : > { %vm774_vm3 = vmor %vm772_vm0, %vm773_vm15 }
 0x7ac   : > { %v769_v50 = vsub.f32 1.0, %v768_v49 }
 0x7ae   : > { %v770_v51 = vmul.f32 %v1507_v48, %v769_v50 }
 0x7b0   : > { %v771_v52 = vadd.f32 %v1507_v48, %v770_v51 }
 0x7b2   : > { %v775_v55 = vsel %vm774_vm3, %v1507_v48, %v771_v52 }
 0x7b3   : > { %v780_v58 = vsel %vm777_vm4, %v779_v56, %v775_v55 }
 0x7b4   : > { %v783_v60 = vmul.f32 %v780_v58, %v725_v34 }
 0x811   : > { %v786_v57 = vpop.permute.xlu1 %785 }
 0x812   : > { %v788_v59 = vmul.f32 %v786_v57, %v780_v58 }
 0x814   : > { %790 = vrot.lane.b32.xlu2 %v788_v59, %s1851_s15 }
 0x86e   : > { %v791_v61 = vpop.permute.xlu2 %790 }
 0x86f   : > { %v793_v62 = vadd.f32 %v791_v61, %v783_v60  ;;  %v511_v60 = vadd.f32 %v2090_v10, %v2129_v7 }
 0x871   : > { %1508 = vtanh.f32 %v793_v62 }
 0x877   : > { %v1509_v63 = vpop.eup %1508 }
 0x878   : > { %796 = vrot.lane.b32.xlu0 %v1509_v63, %s1850_s14 }
 0x8ea   : > { %v797_v0 = vpop.permute.xlu0 %796 }
 0x8eb   : > { %v799_v1 = vmul.f32 %v797_v0, %v780_v58 }
 0x8ed   : > { %801 = vrot.lane.b32.xlu1 %v799_v1, %s1851_s15 }
 0x95f   : > { %v802_v5 = vpop.permute.xlu1 %801 }
 0x960   : > { %1326 = vst.msk [vmem:[%s2049_s3 + $0x18] sm:$0xff] %vm531_vm2, %v802_v5  ;;  %1327 = vmatmul.msk.f32.vlgmr.msrb.gmra.mxu2 %vm531_vm2, %v802_v5 }
 0x9e3   : > { %v827_v11 = vpop.f32.mrf.mxu2 }
 0x9e4   : > { %v830_v2 = vadd.f32 %v827_v11, %v505_v9 }
 0x9e6   : > { %1510 = vtanh.f32 %v830_v2  ;;  %v1328_v13 = vmul.f32 -1.442695, %v830_v2 }
 0x9e8   : > { %1512 = vpow2.f32 %v1328_v13 }
 0x9ec   : > { %v1511_v12 = vpop.eup %1510 }
 0x9ed   : > { %853 = vrot.lane.b32.xlu2 %v1511_v12, %s1850_s14 }
 0x9ee   : > { %v1513_v14 = vpop.eup %1512 }
 0x9ef   : > { %v834_v15 = vadd.f32 1.0, %v1513_v14 }
 0x9f1   : > { %1514 = vrcp.f32 %v834_v15  ;;  %v846_v21 = vand.u32 2147483648, %v834_v15  ;;  %vm840_vm5 = vweird.f32 %v834_v15  ;;  %v844_v22 = vand.u32 2147483647, %v834_v15 }
 0x9f3   : > { %v847_v24 = vor.u32 1.1754944e-38, %v846_v21  ;;  %vm845_vm7 = vcmp.eq.f32.partialorder %v844_v22, 8.507059e+37 }
 0x9f7   : > { %v1515_v16 = vpop.eup %1514 }
 0x9f8   : > { %v836_v17 = vmul.f32 %v1515_v16, %v834_v15  ;;  %vm841_vm1 = vweird.f32 %v1515_v16 }
 0x9f9   : > { %vm842_vm6 = vmor %vm840_vm5, %vm841_vm1 }
 0x9fa   : > { %v837_v18 = vsub.f32 1.0, %v836_v17 }
 0x9fc   : > { %v838_v19 = vmul.f32 %v1515_v16, %v837_v18 }
 0x9fe   : > { %v839_v20 = vadd.f32 %v1515_v16, %v838_v19 }
 0xa00   : > { %v843_v23 = vsel %vm842_vm6, %v1515_v16, %v839_v20 }
 0xa01   : > { %v848_v26 = vsel %vm845_vm7, %v847_v24, %v843_v23 }
 0xa02   : > { %v851_v28 = vmul.f32 %v848_v26, %v793_v62 }
 0xa47   : > { %v854_v25 = vpop.permute.xlu2 %853 }
 0xa48   : > { %v856_v27 = vmul.f32 %v854_v25, %v848_v26  ;;  %v514_v25 = vadd.f32 %v2090_v10, %v2131_v8 }
 0xa4a   : > { %858 = vrot.lane.b32.xlu0 %v856_v27, %s1851_s15 }
 0xabc   : > { %v859_v29 = vpop.permute.xlu0 %858 }
 0xabd   : > { %v861_v30 = vadd.f32 %v859_v29, %v851_v28 }
 0xabf   : > { %1516 = vtanh.f32 %v861_v30 }
 0xac5   : > { %v1517_v31 = vpop.eup %1516 }
 0xac6   : > { %864 = vrot.lane.b32.xlu1 %v1517_v31, %s1850_s14 }
 0xb38   : > { %v865_v32 = vpop.permute.xlu1 %864 }
 0xb39   : > { %v867_v33 = vmul.f32 %v865_v32, %v848_v26 }
 0xb3b   : > { %869 = vrot.lane.b32.xlu2 %v867_v33, %s1851_s15 }
 0xb95   : > { %v870_v34 = vpop.permute.xlu2 %869 }
 0xb96   : > { %1329 = vst.msk [vmem:[%s2049_s3 + $0x20] sm:$0xff] %vm531_vm2, %v870_v34  ;;  %1330 = vmatmul.msk.f32.vlgmr.msra.gmra.mxu3 %vm531_vm2, %v870_v34 }
 0xc19   : > { %v895_v36 = vpop.f32.mrf.mxu3 }
 0xc1a   : > { %v898_v37 = vadd.f32 %v895_v36, %v508_v35 }
 0xc1c   : > { %1518 = vtanh.f32 %v898_v37  ;;  %v1331_v39 = vmul.f32 -1.442695, %v898_v37 }
 0xc1e   : > { %1520 = vpow2.f32 %v1331_v39 }
 0xc22   : > { %v1519_v38 = vpop.eup %1518 }
 0xc23   : > { %921 = vrot.lane.b32.xlu0 %v1519_v38, %s1850_s14 }
 0xc24   : > { %v1521_v40 = vpop.eup %1520 }
 0xc25   : > { %v902_v41 = vadd.f32 1.0, %v1521_v40 }
 0xc27   : > { %1522 = vrcp.f32 %v902_v41  ;;  %v914_v47 = vand.u32 2147483648, %v902_v41  ;;  %vm908_vm9 = vweird.f32 %v902_v41  ;;  %v912_v4 = vand.u32 2147483647, %v902_v41 }
 0xc29   : > { %v915_v49 = vor.u32 1.1754944e-38, %v914_v47  ;;  %vm913_vm11 = vcmp.eq.f32.partialorder %v912_v4, 8.507059e+37 }
 0xc2d   : > { %v1523_v42 = vpop.eup %1522 }
 0xc2e   : > { %v904_v43 = vmul.f32 %v1523_v42, %v902_v41  ;;  %vm909_vm8 = vweird.f32 %v1523_v42 }
 0xc2f   : > { %vm910_vm10 = vmor %vm908_vm9, %vm909_vm8 }
 0xc30   : > { %v905_v44 = vsub.f32 1.0, %v904_v43 }
 0xc32   : > { %v906_v45 = vmul.f32 %v1523_v42, %v905_v44 }
 0xc34   : > { %v907_v46 = vadd.f32 %v1523_v42, %v906_v45 }
 0xc36   : > { %v911_v48 = vsel %vm910_vm10, %v1523_v42, %v907_v46 }
 0xc37   : > { %v916_v51 = vsel %vm913_vm11, %v915_v49, %v911_v48 }
 0xc38   : > { %v919_v53 = vmul.f32 %v916_v51, %v861_v30 }
 0xc95   : > { %v922_v50 = vpop.permute.xlu0 %921 }
 0xc96   : > { %v924_v52 = vmul.f32 %v922_v50, %v916_v51 }
 0xc98   : > { %926 = vrot.lane.b32.xlu1 %v924_v52, %s1851_s15 }
 0xd0a   : > { %v927_v54 = vpop.permute.xlu1 %926 }
 0xd0b   : > { %v929_v55 = vadd.f32 %v927_v54, %v919_v53 }
 0xd0d   : > { %1524 = vtanh.f32 %v929_v55 }
 0xd13   : > { %v1525_v56 = vpop.eup %1524 }
 0xd14   : > { %932 = vrot.lane.b32.xlu2 %v1525_v56, %s1850_s14 }
 0xd6e   : > { %v933_v57 = vpop.permute.xlu2 %932 }
 0xd6f   : > { %v935_v58 = vmul.f32 %v933_v57, %v916_v51 }
 0xd71   : > { %937 = vrot.lane.b32.xlu0 %v935_v58, %s1851_s15 }
 0xde3   : > { %v938_v59 = vpop.permute.xlu0 %937 }
 0xde4   : > { %1332 = vst.msk [vmem:[%s2049_s3 + $0x28] sm:$0xff] %vm531_vm2, %v938_v59  ;;  %1333 = vmatmul.msk.f32.vlgmr.msra.gmra.mxu1 %vm531_vm2, %v938_v59 }
 0xe61   : > { %v963_v61 = vpop.f32.mrf.mxu1 }
 0xe62   : > { %v966_v62 = vadd.f32 %v963_v61, %v511_v60 }
 0xe64   : > { %1526 = vtanh.f32 %v966_v62  ;;  %v1334_v0 = vmul.f32 -1.442695, %v966_v62 }
 0xe66   : > { %1528 = vpow2.f32 %v1334_v0 }
 0xe6a   : > { %v1527_v63 = vpop.eup %1526 }
 0xe6b   : > { %989 = vrot.lane.b32.xlu1 %v1527_v63, %s1850_s14 }
 0xe6c   : > { %v1529_v1 = vpop.eup %1528 }
 0xe6d   : > { %v970_v3 = vadd.f32 1.0, %v1529_v1 }
 0xe6f   : > { %1530 = vrcp.f32 %v970_v3  ;;  %v982_v12 = vand.u32 2147483648, %v970_v3  ;;  %vm976_vm13 = vweird.f32 %v970_v3  ;;  %v980_v7 = vand.u32 2147483647, %v970_v3 }
 0xe71   : > { %v983_v14 = vor.u32 1.1754944e-38, %v982_v12  ;;  %vm981_vm15 = vcmp.eq.f32.partialorder %v980_v7, 8.507059e+37 }
 0xe75   : > { %v1531_v5 = vpop.eup %1530 }
 0xe76   : > { %v972_v6 = vmul.f32 %v1531_v5, %v970_v3  ;;  %vm977_vm12 = vweird.f32 %v1531_v5 }
 0xe77   : > { %vm978_vm14 = vmor %vm976_vm13, %vm977_vm12 }
 0xe78   : > { %v973_v9 = vsub.f32 1.0, %v972_v6 }
 0xe7a   : > { %v974_v11 = vmul.f32 %v1531_v5, %v973_v9 }
 0xe7c   : > { %v975_v2 = vadd.f32 %v1531_v5, %v974_v11 }
 0xe7e   : > { %v979_v13 = vsel %vm978_vm14, %v1531_v5, %v975_v2 }
 0xe7f   : > { %v984_v16 = vsel %vm981_vm15, %v983_v14, %v979_v13 }
 0xe80   : > { %v987_v18 = vmul.f32 %v984_v16, %v929_v55 }
 0xedd   : > { %v990_v15 = vpop.permute.xlu1 %989 }
 0xede   : > { %v992_v17 = vmul.f32 %v990_v15, %v984_v16 }
 0xee0   : > { %994 = vrot.lane.b32.xlu2 %v992_v17, %s1851_s15 }
 0xf3a   : > { %v995_v19 = vpop.permute.xlu2 %994 }
 0xf3b   : > { %v997_v20 = vadd.f32 %v995_v19, %v987_v18 }
 0xf3d   : > { %1532 = vtanh.f32 %v997_v20 }
 0xf43   : > { %v1533_v21 = vpop.eup %1532 }
 0xf44   : > { %1000 = vrot.lane.b32.xlu0 %v1533_v21, %s1850_s14 }
 0xfb6   : > { %v1001_v22 = vpop.permute.xlu0 %1000 }
 0xfb7   : > { %v1003_v23 = vmul.f32 %v1001_v22, %v984_v16 }
 0xfb9   : > { %1005 = vrot.lane.b32.xlu1 %v1003_v23, %s1851_s15 }
0x102b   : > { %v1006_v24 = vpop.permute.xlu1 %1005 }
0x102c   : > { %1335 = vst.msk [vmem:[%s2049_s3 + $0x30] sm:$0xff] %vm531_vm2, %v1006_v24  ;;  %1336 = vmatmul.msk.f32.vlgmr.msra.gmra.mxu2 %vm531_vm2, %v1006_v24 }
0x10af   : > { %v1031_v26 = vpop.f32.mrf.mxu2 }
0x10b0   : > { %v1034_v27 = vadd.f32 %v1031_v26, %v514_v25 }
0x10b2   : > { %1534 = vtanh.f32 %v1034_v27  ;;  %v1337_v29 = vmul.f32 -1.442695, %v1034_v27 }
0x10b4   : > { %1536 = vpow2.f32 %v1337_v29 }
0x10b8   : > { %v1535_v28 = vpop.eup %1534 }
0x10b9   : > { %1057 = vrot.lane.b32.xlu2 %v1535_v28, %s1850_s14 }
0x10ba   : > { %v1537_v30 = vpop.eup %1536 }
0x10bb   : > { %v1038_v31 = vadd.f32 1.0, %v1537_v30 }
0x10bd   : > { %1538 = vrcp.f32 %v1038_v31  ;;  %v1050_v37 = vand.u32 2147483648, %v1038_v31  ;;  %vm1044_vm3 = vweird.f32 %v1038_v31  ;;  %v1048_v10 = vand.u32 2147483647, %v1038_v31 }
0x10bf   : > { %v1051_v38 = vor.u32 1.1754944e-38, %v1050_v37  ;;  %vm1049_vm1 = vcmp.eq.f32.partialorder %v1048_v10, 8.507059e+37 }
0x10c3   : > { %v1539_v32 = vpop.eup %1538 }
0x10c4   : > { %v1040_v33 = vmul.f32 %v1539_v32, %v1038_v31  ;;  %vm1045_vm0 = vweird.f32 %v1539_v32 }
0x10c5   : > { %vm1046_vm4 = vmor %vm1044_vm3, %vm1045_vm0 }
0x10c6   : > { %v1041_v34 = vsub.f32 1.0, %v1040_v33 }
0x10c8   : > { %v1042_v35 = vmul.f32 %v1539_v32, %v1041_v34 }
0x10ca   : > { %v1043_v36 = vadd.f32 %v1539_v32, %v1042_v35 }
0x10cc   : > { %v1047_v8 = vsel %vm1046_vm4, %v1539_v32, %v1043_v36 }
0x10cd   : > { %v1052_v40 = vsel %vm1049_vm1, %v1051_v38, %v1047_v8 }
0x10ce   : > { %v1055_v42 = vmul.f32 %v1052_v40, %v997_v20 }
0x1113   : > { %v1058_v39 = vpop.permute.xlu2 %1057 }
0x1114   : > { %v1060_v41 = vmul.f32 %v1058_v39, %v1052_v40 }
0x1116   : > { %1062 = vrot.lane.b32.xlu0 %v1060_v41, %s1851_s15 }
0x1188   : > { %v1063_v43 = vpop.permute.xlu0 %1062 }
0x1189   : > { %v1065_v44 = vadd.f32 %v1063_v43, %v1055_v42 }
0x118b   : > { %1540 = vtanh.f32 %v1065_v44  ;;  %1080 = vrot.lane.b32.xlu0 %v1065_v44, %s1852_s19 }
0x1191   : > { %v1541_v45 = vpop.eup %1540 }
0x1192   : > { %1068 = vrot.lane.b32.xlu1 %v1541_v45, %s1850_s14 }
0x11fd   : > { %v1081_v46 = vpop.permute.xlu0 %1080 }
0x11fe   : > { %1083 = vst.msk [vmem:[#allocation4] sm:$0xff] %vm531_vm2, %v1081_v46 }
0x1204   : > { %v1069_v47 = vpop.permute.xlu1 %1068 }
0x1205   : > { %v1071_v4 = vmul.f32 %v1069_v47, %v1052_v40 }
0x1207   : > { %1073 = vrot.lane.b32.xlu2 %v1071_v4, %s1851_s15 }
0x125f   : > { %1087 = sbr.rel (%p1339_p1) target bundleno = 4710 (0x1266), region = 72 }
0x1261   : > { %v1074_v48 = vpop.permute.xlu2 %1073 }
0x1262   : > { %1338 = vst.msk [vmem:[%s2049_s3 + $0x38] sm:$0xff] %vm531_vm2, %v1074_v48 }
0x1263   : > { %1078 = vst.msk [vmem:[#allocation3] sm:$0xff] %vm531_vm2, %v1074_v48 }
0x1264   : > { %1088 = vst.msk [vmem:[#allocation15] sm:$0xff] %vm531_vm2, %v1074_v48 }
0x1265   : > { %1089 = vst.msk [vmem:[#allocation17] sm:$0xff] %vm531_vm2, %v1081_v46 }
0x1266 PF: > { %s1853_s11 = smov [#allocation15]   ;;  %s1123_s21 = sshll.u32 %s2252_s7, 4  ;;  %s1124_s21 = int_to_ptr.hbm [resolvable:$true] %s1123_s21 }
0x1267   : > { %s1121_s23 = sshll.u32 %s1853_s11, 4  ;;  %s1350_s20 = sshll.u32 %s1834_s30, 6  ;;  %s1122_s23 = int_to_ptr.vmem [resolvable:$true] %s1121_s23 }
0x1268   : > { %1373 = dma.vmem_to_hbm [thread:$0]  (%p1995_p11), %s1122_s23, 128, %s1124_s21, [#allocation16]  }
0x1269   : > { %s1103_s4 = scalar_lea.hbm %s2251_s6, %s1350_s20  ;;  %s1104_s22 = sshll.u32 %s2049_s3, 4  ;;  %s1105_s22 = int_to_ptr.vmem [resolvable:$true] %s1104_s22 }
0x126a   : > { %s1106_s5 = sshll.u32 %s1103_s4, 4  ;;  %s1091_s13 = scalar_lea.sflag [#allocation7], %s2031_s24  ;;  %s1107_s5 = int_to_ptr.hbm [resolvable:$true] %s1106_s5 }
0x126b   : > { %s1734_s14 = sshra.s32 %s1107_s5, 4  ;;  %s1740_s30 = scalar_lea.hbm %s2251_s6, 128  ;;  %s1735_s14 = int_to_ptr.hbm [resolvable:$true] %s1734_s14 }
0x126c   : > { %s1736_s15 = scalar_lea.hbm %s1735_s14, 64  ;;  %p1741_p0 = scmp.lt.s32.totalorder %s1735_s14, %s2251_s6 }
0x126d   : > { %p1737_p3 = scmp.ne.s32.totalorder %s1735_s14, %s1736_s15  ;;  %p1742_p4 = scmp.lt.s32.totalorder %s1740_s30, %s1736_s15 }
0x126f   : > { %p1738_p12 = pnand %p1737_p3, %p2008_p2  ;;  %p1743_p6 = por %p1742_p4, %p1741_p0 }
0x1271   : > { %p1739_p13 = pneg %p1738_p12 }
0x1273   : > { %p1744_p8 = pnand %p1743_p6, %p1739_p13 }
0x1275   : > { %1747 = shalt.err (!%p1744_p8)
}
0x1276   : > { %s1854_s24 = smov 128   ;;  %s1855_s3 = smov 8  }
0x1277   : > { %1371 = dma.vmem_to_hbm [thread:$0]  (%p2008_p2), %s1105_s22, 1024, %s1107_s5, %s1091_s13, %s1854_s24, %s1854_s24, %s1855_s3  }
0x1278   : > { %s1856_s18 = smov [#allocation17]   ;;  %s1137_s12 = sshll.u32 %s2253_s8, 4  ;;  %s1138_s12 = int_to_ptr.hbm [resolvable:$true] %s1137_s12 }
0x1279   : > { %s1135_s21 = sshll.u32 %s1856_s18, 4  ;;  %s1136_s21 = int_to_ptr.vmem [resolvable:$true] %s1135_s21 }
0x127a   : > { %1375 = dma.vmem_to_hbm [thread:$0]  (%p1995_p11), %s1136_s21, 128, %s1138_s12, [#allocation16]  }
0x127b   : > { %1813 = dma.done.wait (%p1995_p11), [#allocation16], 256  }
0x127c   : > { %1815 = vsyncadd (%p1995_p11), [#allocation16], 4294967040 }
0x127d PF: > { %s1159_s1 = sand.u32 1, %s1822_s27   ;;  %p1399_p2 = pnand %p1296_p10, %p1949_p5 }
0x127e   : > { %s1160_s22 = scalar_lea.sflag [#allocation7], %s1159_s1 }
0x127f   : > { %p1400_p9 = pneg %p1399_p2 }
0x1281   : > { %1817 = dma.done.wait (%p1400_p9), %s1160_s22, 1024  }
0x1282   : > { %1819 = vsyncadd (%p1400_p9), %s1160_s22, 4294966272  ;;  %s28_s10 = sadd.s32 1, %s1842_s10   ;;  %s2281_s17 = sld [smem:[#allocation24_spill]] }
0x1283   : > { %p25_p7 = scmp.ge.s32.totalorder %s28_s10, 4   ;;  %s2282_s27 = smov %s1826_s28 }
0x1284   : > { %s2283_s28 = smov %s1830_s29  ;;  %s2284_s29 = smov %s2018_s16 }
0x1285   : > { %s2285_s30 = smov %s1838_s9  ;;  %27 = sbr.rel (!%p25_p7) target bundleno = 14 (0xe), region = 147 }
0x1288   : > { %s2286_s9 = smov %s2281_s17 }
0x128a   :  { %1166 = vsyncpa [#allocation6], 1 }
0x128b   :  { %1168 = vsyncpa [#allocation6 + $0x1], 1 }
0x128c   :  { %1169 = vsyncpa [#allocation9], 1 }
0x128d   :  { %1170 = vsyncpa [#allocation12], 1 }
0x128e   :  { %1171 = vsyncpa [#allocation7], 1 }
0x128f   :  { %1173 = vsyncpa [#allocation7 + $0x1], 1 }
0x1290   :  { %1174 = vsyncpa [#allocation16], 1 }

</bundles_post_ra>
